<compile_context>
chip_gen: v5e
topology: v5e:2x2
jax: 0.10.0
libtpu: 0.0.40
codegen_flags: <defaults>
</compile_context>

<pallas_src>
import jax
import jax.numpy as jnp
import numpy as np
from jax.experimental import pallas as pl
from jax.experimental.pallas import tpu as pltpu

LANE = 128
_PIN_X_BUDGET_BYTES = 16 * 1024 * 1024   # 2 pipeline buffers of resident X/T must fit here


def _round_up(v, m):
    return (v + m - 1) // m * m


def _pick_tile(n, pref):
    """Largest multiple of 128 that is <= pref and divides n (n, pref multiples of 128)."""
    assert n % LANE == 0 and pref % LANE == 0 and n >= LANE, (n, pref)
    t = min(pref, n)
    while n % t:
        t -= LANE
    return t


_VMEM_LIMIT_CACHE = None


def _vmem_limit_bytes():
    """Per-chip VMEM scoped limit: ~75% of physical, capped; safe fallback 48 MiB."""
    global _VMEM_LIMIT_CACHE
    if _VMEM_LIMIT_CACHE is None:
        cap = 64 * 1024 * 1024
        try:
            cap = int(pltpu.get_tpu_info().vmem_capacity_bytes)
        except Exception:
            pass
        _VMEM_LIMIT_CACHE = min(cap * 3 // 4, 96 * 1024 * 1024)
    return _VMEM_LIMIT_CACHE


# ------------------ projection kernel: T = (X @ W) * norm -------------------

def _proj_kernel(x_ref, w_ref, d_ref, o_ref):
    t = jnp.dot(x_ref[...], w_ref[...], preferred_element_type=jnp.float32)
    o_ref[...] = (t * d_ref[...]).astype(o_ref.dtype)


def project_pallas(x, w, d, *, out_dtype, tile_m=512):
    """Row-tiled (X @ W) * norm (hoists the projection for the in>out branch)."""
    Np, Fin = x.shape
    Fout = w.shape[1]
    tm = _pick_tile(Np, tile_m)
    grid_m = Np // tm
    bytes_accessed = int(x.size * x.dtype.itemsize
                         + w.size * w.dtype.itemsize
                         + d.size * d.dtype.itemsize
                         + Np * Fout * np.dtype(out_dtype).itemsize)
    return pl.pallas_call(
        _proj_kernel,
        out_shape=jax.ShapeDtypeStruct((Np, Fout), out_dtype),
        grid=(grid_m,),
        in_specs=[pl.BlockSpec((tm, Fin), lambda i: (i, 0)),
                  pl.BlockSpec((Fin, Fout), lambda i: (0, 0)),
                  pl.BlockSpec((tm, 1), lambda i: (i, 0))],
        out_specs=pl.BlockSpec((tm, Fout), lambda i: (i, 0)),
        compiler_params=pltpu.CompilerParams(
            dimension_semantics=("parallel",),
            vmem_limit_bytes=_vmem_limit_bytes()),
        cost_estimate=pl.CostEstimate(flops=int(2 * Np * Fin * Fout),
                                      transcendentals=0,
                                      bytes_accessed=bytes_accessed),
    )(x, w, d)


# ------------------- aggregation kernel: Y = A^T @ X (@W) -------------------

def _make_agg_kernel(apply_w, relu, residual, pin_x, tk, compute_dtype):
    """K-tiled aggregation with f32 VMEM accumulator; finalize fuses W/bias/res/ReLU.

    The A^T tile arrives as int8 (0/1, exact) and is cast to the compute dtype in
    VMEM right before the MXU dot, so HBM only ever sees 1 byte per edge slot.
    """

    def kernel(*refs):
        a_ref, x_ref = refs[0], refs[1]
        idx = 2
        if apply_w:
            w_ref = refs[idx]; idx += 1
        b_ref = refs[idx]; idx += 1
        if residual:
            r_ref = refs[idx]; idx += 1
        out_ref, acc_ref = refs[idx], refs[idx + 1]

        k = pl.program_id(1)

        @pl.when(k == 0)
        def _init():
            acc_ref[...] = jnp.zeros_like(acc_ref)

        a = a_ref[...].astype(compute_dtype)       # int8 0/1 -> bf16 (exact)
        if pin_x:
            start = pl.multiple_of(k * tk, tk)
            x = x_ref[pl.ds(start, tk), :]
        else:
            x = x_ref[...]
        acc_ref[...] += jnp.dot(a, x, preferred_element_type=jnp.float32)

        @pl.when(k == pl.num_programs(1) - 1)
        def _finalize():
            acc = acc_ref[...]
            if apply_w:
                y = jnp.dot(acc.astype(w_ref.dtype), w_ref[...],
                            preferred_element_type=jnp.float32)
            else:
                y = acc
            y = y + b_ref[...].astype(jnp.float32)
            if residual:
                y = y + r_ref[...].astype(jnp.float32)
            if relu:
                y = jnp.maximum(y, 0.0)
            out_ref[...] = y.astype(out_ref.dtype)

    return kernel


def _aggregate_pallas(at, x, w, b, res, *, relu, out_dtype, tile_m, tile_k):
    """Y = A^T @ X (optionally @ W) + b (+ res) (+ ReLU), K-tiled over source nodes."""
    Np, Fx = x.shape
    apply_w = w is not None
    Fout = w.shape[1] if apply_w else Fx
    residual = res is not None

    tm = _pick_tile(Np, tile_m)
    tk = _pick_tile(Np, tile_k)
    grid = (Np // tm, Np // tk)

    # Pin X/T fully resident in VMEM when both pipeline buffers fit comfortably
    # (kills the grid_m-fold re-stream); otherwise stream (tk, Fx) slabs.
    pin_x = 2 * x.size * x.dtype.itemsize <= _PIN_X_BUDGET_BYTES

    b2 = b.reshape(1, Fout).astype(jnp.float32)

    in_specs = [pl.BlockSpec((tm, tk), lambda i, k: (i, k))]      # A^T tile (int8)
    args = [at]
    if pin_x:
        in_specs.append(pl.BlockSpec((Np, Fx), lambda i, k: (0, 0)))  # resident slab
    else:
        in_specs.append(pl.BlockSpec((tk, Fx), lambda i, k: (k, 0)))  # streamed slab
    args.append(x)
    if apply_w:
        assert w.shape[0] == Fx
        in_specs.append(pl.BlockSpec((Fx, Fout), lambda i, k: (0, 0)))
        args.append(w)
    in_specs.append(pl.BlockSpec((1, Fout), lambda i, k: (0, 0)))
    args.append(b2)
    if residual:
        assert res.shape[1] == Fout, "residual feature width must equal output width"
        in_specs.append(pl.BlockSpec((tm, Fout), lambda i, k: (i, 0)))
        args.append(res)

    flops = 2 * Np * Np * Fx + (2 * Np * Fx * Fout if apply_w else 0)
    x_streams = 1 if pin_x else grid[0]
    bytes_accessed = int(
        at.size * at.dtype.itemsize
        + x.size * x.dtype.itemsize * x_streams
        + (w.size * w.dtype.itemsize if apply_w else 0)
        + Np * Fout * np.dtype(out_dtype).itemsize
        + (res.size * res.dtype.itemsize if residual else 0))

    return pl.pallas_call(
        _make_agg_kernel(apply_w, relu, residual, pin_x, tk, x.dtype),
        out_shape=jax.ShapeDtypeStruct((Np, Fout), out_dtype),
        grid=grid,
        in_specs=in_specs,
        out_specs=pl.BlockSpec((tm, Fout), lambda i, k: (i, 0)),
        scratch_shapes=[pltpu.VMEM((tm, Fx), jnp.float32)],
        compiler_params=pltpu.CompilerParams(
            dimension_semantics=("parallel", "arbitrary"),
            vmem_limit_bytes=_vmem_limit_bytes()),
        cost_estimate=pl.CostEstimate(flops=int(flops), transcendentals=0,
                                      bytes_accessed=bytes_accessed),
    )(*args)


def gcn_layer_pallas(at, inv_deg, x, w, b, *, mm_first, relu, residual_x=None,
                     tile_m=512, tile_k=1024, out_dtype=jnp.bfloat16):
    """One RightNormGraphConv (+ optional residual/ReLU) on TPU-padded inputs."""
    if mm_first:
        # feat_src = (X @ W) * norm  (projection + norm fused, hoisted), then A^T @ T.
        t = project_pallas(x, w, inv_deg, out_dtype=x.dtype, tile_m=tile_m)
        return _aggregate_pallas(at, t, None, b, residual_x, relu=relu,
                                 out_dtype=out_dtype, tile_m=tile_m, tile_k=tile_k)
    # feat_src = X * norm, aggregate, then @ W (fused in the finalize step).
    xs = (x.astype(jnp.float32) * inv_deg).astype(x.dtype)
    return _aggregate_pallas(at, xs, w, b, residual_x, relu=relu,
                             out_dtype=out_dtype, tile_m=tile_m, tile_k=tile_k)


# ------------------------------ GCN wrapper ---------------------------------

def xavier_uniform(key, shape):
    fan_in, fan_out = shape
    bound = float(np.sqrt(6.0 / (fan_in + fan_out)))
    return jax.random.uniform(key, shape, jnp.float32, -bound, bound)


def init_gcn_params(key, n_inp, n_hidden, n_layers, n_classes):
    """Deterministic param init mirroring RightNormGraphConv.reset_parameters."""
    keys = jax.random.split(key, n_layers + 1)
    dims = [(n_inp, n_hidden)] + [(n_hidden, n_hidden)] * (n_layers - 1)
    weights = [xavier_uniform(keys[i], dims[i]) for i in range(n_layers)]
    biases = [jnp.zeros((d[1],), jnp.float32) for d in dims]
    fw = xavier_uniform(keys[-1], (n_hidden, n_classes))
    fb = jnp.zeros((n_classes,), jnp.float32)
    return weights, biases, fw, fb


def gcn_forward_pallas(A, x, weights, biases, fw, fb, *, residual=True,
                       dtype=jnp.bfloat16, tile_m=512, tile_k=1024):
    """GCN.forward (eval mode, latent=None) driven by Pallas layer kernels.

    A is the dense 0/1 adjacency (A[u, v] = 1 iff edge u->v, unweighted graph,
    self-loops recommended so no node has 0 degree).
    """
    N = A.shape[0]
    n_classes = fw.shape[1]
    assert tile_m % LANE == 0 and tile_k % LANE == 0

    # Pad N up to a multiple of lcm(tile_m, tile_k) so the preferred tiles always
    # divide and _pick_tile never collapses to 128 (a few extra zero rows only).
    pad_mult = int(np.lcm(tile_m, tile_k))
    Np = _round_up(max(N, pad_mult), pad_mult)
    fin0_p = _round_up(x.shape[1], LANE)

    out_deg = jnp.clip(jnp.sum(A.astype(jnp.float32), axis=1), 1.0, None)
    inv_deg = jnp.pad(1.0 / out_deg, (0, Np - N)).astype(jnp.float32)[:, None]

    # A^T stored as exact int8 0/1: halves the dominant O(N^2) HBM stream vs bf16 P;
    # the 1/out_deg normalization is folded into the aggregated features instead.
    at_i8 = jnp.pad(A.T.astype(jnp.int8), ((0, Np - N), (0, Np - N)))

    h = jnp.pad(x, ((0, Np - N), (0, fin0_p - x.shape[1]))).astype(dtype)

    def pad_wb(w, b):
        fin, fout = w.shape
        fin_p, fout_p = _round_up(fin, LANE), _round_up(fout, LANE)
        w_p = jnp.pad(w, ((0, fin_p - fin), (0, fout_p - fout))).astype(dtype)
        b_p = jnp.pad(b, (0, fout_p - fout)).astype(jnp.float32)
        return w_p, b_p

    for i, (w, b) in enumerate(zip(weights, biases)):
        w_p, b_p = pad_wb(w, b)
        h = gcn_layer_pallas(
            at_i8, inv_deg, h, w_p, b_p,
            mm_first=(w.shape[0] > w.shape[1]),
            relu=True,
            residual_x=(h if (residual and i != 0) else None),
            tile_m=tile_m, tile_k=tile_k, out_dtype=dtype)

    fw_p, fb_p = pad_wb(fw, fb)
    out = gcn_layer_pallas(
        at_i8, inv_deg, h, fw_p, fb_p,
        mm_first=(fw.shape[0] > fw.shape[1]),
        relu=False, residual_x=None,
        tile_m=tile_m, tile_k=tile_k, out_dtype=jnp.float32)
    return out[:N, :n_classes]


# --------------------------- pure-JAX reference ------------------------------
# Mirrors the Pallas path cast-for-cast (int8/bf16 graph, bf16 features/weights,
# f32 accumulation, norm folded into features) so the comparison isolates kernel
# correctness rather than quantization choices.

def gcn_forward_ref(A, x, weights, biases, fw, fb, *, residual=True,
                    dtype=jnp.bfloat16):
    out_deg = jnp.clip(jnp.sum(A.astype(jnp.float32), axis=1), 1.0, None)
    inv = (1.0 / out_deg)[:, None]
    At = A.T.astype(dtype)   # 0/1 entries are exact in bf16

    def conv(h, w, b):
        wd = w.astype(dtype)
        if w.shape[0] > w.shape[1]:
            t = jnp.dot(h, wd, preferred_element_type=jnp.float32)
            t = (t * inv).astype(dtype)
            y = jnp.dot(At, t, preferred_element_type=jnp.float32)
        else:
            xs = (h.astype(jnp.float32) * inv).astype(dtype)
            t = jnp.dot(At, xs, preferred_element_type=jnp.float32).astype(dtype)
            y = jnp.dot(t, wd, preferred_element_type=jnp.float32)
        return y + b.astype(jnp.float32)

    h = x.astype(dtype)
    for i, (w, b) in enumerate(zip(weights, biases)):
        y = conv(h, w, b)
        if residual and i != 0:
            y = y + h.astype(jnp.float32)
        h = jnp.maximum(y, 0.0).astype(dtype)
    return conv(h, fw, fb)


# --------------------------------- main --------------------------------------

if __name__ == "__main__":
    key = jax.random.PRNGKey(0)
    k_graph, k_feat, k_params = jax.random.split(key, 3)

    # Small synthetic graph: N nodes, random edges + self loops (no 0-degree nodes).
    N = 64
    n_inp, n_hidden, n_layers, n_classes = 1, 32, 2, 2

    A = (jax.random.uniform(k_graph, (N, N)) < 0.1).astype(jnp.float32)
    A = jnp.maximum(A, jnp.eye(N, dtype=jnp.float32))   # self loops

    x = jax.random.normal(k_feat, (N, n_inp), jnp.float32)

    weights, biases, fw, fb = init_gcn_params(
        k_params, n_inp, n_hidden, n_layers, n_classes)

    out = gcn_forward_pallas(A, x, weights, biases, fw, fb, residual=True)
    out = jax.block_until_ready(out)

    ref = gcn_forward_ref(A, x, weights, biases, fw, fb, residual=True)
    np.testing.assert_allclose(np.asarray(out), np.asarray(ref),
                               rtol=5e-3, atol=5e-3)

    print("KERNEL_OK")
</pallas_src>

<mosaic_0001>
module attributes {stable_mosaic.version = 11 : i64} {
  func.func @kernel(%arg0: i32, %arg1: i32, %arg2: memref<512x1024xi8, #tpu.memory_space<vmem>>, %arg3: memref<1024x128xbf16, #tpu.memory_space<vmem>>, %arg4: memref<128x128xbf16, #tpu.memory_space<vmem>>, %arg5: memref<1x128xf32, #tpu.memory_space<vmem>>, %arg6: memref<512x128xbf16, #tpu.memory_space<vmem>>, %arg7: memref<512x128xf32, #tpu.memory_space<vmem>>) attributes {dimension_semantics = [#tpu.dimension_semantics<parallel>, #tpu.dimension_semantics<arbitrary>], iteration_bounds = array<i64: 2, 1>, scalar_prefetch = 0 : i64, scratch_operands = 1 : i64, tpu.core_type = #tpu.core_type<tc>, window_params = [{transform_indices = @transform_0, window_bounds = array<i64: 512, 1024>}, {pipeline_mode = #tpu.pipeline_mode<synchronous>, transform_indices = @transform_1, window_bounds = array<i64: 1024, 128>}, {pipeline_mode = #tpu.pipeline_mode<synchronous>, transform_indices = @transform_2, window_bounds = array<i64: 128, 128>}, {pipeline_mode = #tpu.pipeline_mode<synchronous>, transform_indices = @transform_3, window_bounds = array<i64: 1, 128>}, {transform_indices = @transform_4, window_bounds = array<i64: 512, 128>}]} {
    %c0_i32 = arith.constant 0 : i32
    %0 = arith.cmpi eq, %arg1, %c0_i32 : i32
    %1 = arith.extui %0 : i1 to i32
    %c0_i32_0 = arith.constant 0 : i32
    %2 = arith.cmpi ne, %1, %c0_i32_0 : i32
    scf.if %2 {
      %cst_9 = arith.constant 0.000000e+00 : f32
      %16 = vector.broadcast %cst_9 : f32 to vector<512x128xf32>
      %c0_10 = arith.constant 0 : index
      %c0_11 = arith.constant 0 : index
      %17 = vector.load %arg7[%c0_10, %c0_11] : memref<512x128xf32, #tpu.memory_space<vmem>>, vector<512x128xf32>
      tpu.vector_store %arg7[%c0_10, %c0_11], %16 {strides = array<i32>} : memref<512x128xf32, #tpu.memory_space<vmem>>, vector<512x128xf32>,
    } else {
    }
    %c0 = arith.constant 0 : index
    %c0_1 = arith.constant 0 : index
    %3 = vector.load %arg2[%c0, %c0_1] : memref<512x1024xi8, #tpu.memory_space<vmem>>, vector<512x1024xi8>
    %4 = arith.sitofp %3 : vector<512x1024xi8> to vector<512x1024xbf16>
    %c1024_i32 = arith.constant 1024 : i32
    %5 = arith.muli %arg1, %c1024_i32 : i32
    %6 = tpu.assume_multiple %5, 1024 : i32
    %7 = arith.index_cast %6 : i32 to index
    %c0_2 = arith.constant 0 : index
    %8 = vector.load %arg3[%7, %c0_2] : memref<1024x128xbf16, #tpu.memory_space<vmem>>, vector<1024x128xbf16>
    %c0_3 = arith.constant 0 : index
    %c0_4 = arith.constant 0 : index
    %9 = vector.load %arg7[%c0_3, %c0_4] : memref<512x128xf32, #tpu.memory_space<vmem>>, vector<512x128xf32>
    %cst = arith.constant dense<0.000000e+00> : vector<512x128xf32>
    %10 = tpu.matmul %4, %8, %cst {dimension_numbers = #tpu.dot_dimension_numbers<[1], [0], [0], [1], [0, 0, 1, 1], [], []>} : vector<512x1024xbf16>, vector<1024x128xbf16>, vector<512x128xf32> -> vector<512x128xf32>
    %11 = arith.addf %9, %10 : vector<512x128xf32>
    %c0_5 = arith.constant 0 : index
    %c0_6 = arith.constant 0 : index
    %12 = vector.load %arg7[%c0_5, %c0_6] : memref<512x128xf32, #tpu.memory_space<vmem>>, vector<512x128xf32>
    tpu.vector_store %arg7[%c0_5, %c0_6], %11 {strides = array<i32>} : memref<512x128xf32, #tpu.memory_space<vmem>>, vector<512x128xf32>,
    %c0_i32_7 = arith.constant 0 : i32
    %13 = arith.cmpi eq, %arg1, %c0_i32_7 : i32
    %14 = arith.extui %13 : i1 to i32
    %c0_i32_8 = arith.constant 0 : i32
    %15 = arith.cmpi ne, %14, %c0_i32_8 : i32
    scf.if %15 {
      %c0_9 = arith.constant 0 : index
      %c0_10 = arith.constant 0 : index
      %16 = vector.load %arg7[%c0_9, %c0_10] : memref<512x128xf32, #tpu.memory_space<vmem>>, vector<512x128xf32>
      %17 = arith.truncf %16 : vector<512x128xf32> to vector<512x128xbf16>
      %c0_11 = arith.constant 0 : index
      %c0_12 = arith.constant 0 : index
      %18 = vector.load %arg4[%c0_11, %c0_12] : memref<128x128xbf16, #tpu.memory_space<vmem>>, vector<128x128xbf16>
      %cst_13 = arith.constant dense<0.000000e+00> : vector<512x128xf32>
      %19 = tpu.matmul %17, %18, %cst_13 {dimension_numbers = #tpu.dot_dimension_numbers<[1], [0], [0], [1], [0, 0, 1, 1], [], []>} : vector<512x128xbf16>, vector<128x128xbf16>, vector<512x128xf32> -> vector<512x128xf32>
      %c0_14 = arith.constant 0 : index
      %c0_15 = arith.constant 0 : index
      %20 = vector.load %arg5[%c0_14, %c0_15] : memref<1x128xf32, #tpu.memory_space<vmem>>, vector<1x128xf32>
      %21 = vector.broadcast %20 : vector<1x128xf32> to vector<512x128xf32>
      %22 = arith.addf %19, %21 : vector<512x128xf32>
      %cst_16 = arith.constant 0.000000e+00 : f32
      %23 = vector.broadcast %cst_16 : f32 to vector<512x128xf32>
      %24 = arith.maximumf %22, %23 : vector<512x128xf32>
      %25 = arith.truncf %24 : vector<512x128xf32> to vector<512x128xbf16>
      %c0_17 = arith.constant 0 : index
      %c0_18 = arith.constant 0 : index
      %26 = vector.load %arg6[%c0_17, %c0_18] : memref<512x128xbf16, #tpu.memory_space<vmem>>, vector<512x128xbf16>
      tpu.vector_store %arg6[%c0_17, %c0_18], %25 {strides = array<i32>} : memref<512x128xbf16, #tpu.memory_space<vmem>>, vector<512x128xbf16>,
    } else {
    }
    return
  }
  func.func @transform_0(%arg0: i32, %arg1: i32) -> (i32, i32) {
    %c0_i32 = arith.constant 0 : i32
    return %arg0, %arg1 : i32, i32
  }
  func.func @transform_1(%arg0: i32, %arg1: i32) -> (i32, i32) {
    %c0_i32 = arith.constant 0 : i32
    %c0_i32_0 = arith.constant 0 : i32
    %c0_i32_1 = arith.constant 0 : i32
    return %c0_i32, %c0_i32_0 : i32, i32
  }
  func.func @transform_2(%arg0: i32, %arg1: i32) -> (i32, i32) {
    %c0_i32 = arith.constant 0 : i32
    %c0_i32_0 = arith.constant 0 : i32
    %c0_i32_1 = arith.constant 0 : i32
    return %c0_i32, %c0_i32_0 : i32, i32
  }
  func.func @transform_3(%arg0: i32, %arg1: i32) -> (i32, i32) {
    %c0_i32 = arith.constant 0 : i32
    %c0_i32_0 = arith.constant 0 : i32
    %c0_i32_1 = arith.constant 0 : i32
    return %c0_i32, %c0_i32_0 : i32, i32
  }
  func.func @transform_4(%arg0: i32, %arg1: i32) -> (i32, i32) {
    %c0_i32 = arith.constant 0 : i32
    %c0_i32_0 = arith.constant 0 : i32
    return %arg0, %c0_i32 : i32, i32
  }
}

</mosaic_0001>

<bundles_post_ra>
// kernel: tpu_custom_call.1
= control target key start
LH: loop header
LB: loop body
LE: loop exit
PB: predicated region body
PF: predicated region fallthrough
CT: control target
= control target key end

     0   :  { %s6378_s0 = inlined_call_operand.hbm [shape: s8[1024,1024], index: 0, kind: input, shape index: {}]   ;;  %s6379_s1 = inlined_call_operand.hbm [shape: bf16[1024,128], index: 1, kind: input, shape index: {}]   ;;  %s6380_s2 = inlined_call_operand.hbm [shape: bf16[128,128], index: 2, kind: input, shape index: {}]   ;;  %s6381_s3 = inlined_call_operand.vmem [shape: f32[1,128], index: 3, kind: input, shape index: {}]   ;;  %s6382_s4 = inlined_call_operand.hbm [shape: bf16[1024,128], index: 4, kind: output, shape index: {}]  }
   0x1   :  { %6384 = sst [smem:[#allocation55_spill]] %s6379_s1 }
   0x2   :  { %6385 = sst [smem:[#allocation56_spill]] %s6380_s2 }
   0x3   :  { %9 = vsyncpa [#allocation4], 0 }
   0x4   :  { %11 = vsyncpa [#allocation4 + $0x1], 0 }
   0x5   :  { %12 = vsyncpa [#allocation7], 0 }
   0x6   :  { %13 = vsyncpa [#allocation5], 0 }
   0x7   :  { %15 = vsyncpa [#allocation5 + $0x1], 0  ;;  %s5355_s15 = smov 0   ;;  %s5357_s16 = smov 0  }
   0x8   :  { %s5359_s17 = smov 0   ;;  %s5361_s18 = smov 0  }
   0x9   :  { %s5363_s19 = smov 0   ;;  %s5365_s20 = smov 0  }
   0xa LB: > { %s4457_s21 = sadd.s32 4294967295, %s5321_s20   ;;  %s4458_s22 = sadd.s32 4294967294, %s5321_s20   ;;  %s5321_s20 = sphi %s5365_s20, %s21_s20   ;;  %s5317_s19 = sphi %s5363_s19, %s6538_s19   ;;  %s5313_s18 = sphi %s5361_s18, %s6537_s18   ;;  %s5309_s17 = sphi %s5359_s17, %s6536_s17   ;;  %s5305_s16 = sphi %s5357_s16, %s6535_s16   ;;  %s5301_s15 = sphi %s5355_s15, %s6534_s15  }
   0xb   : > { %p55_p0 = scmp.ne.s32.totalorder %s5305_s16, %s5301_s15  ;;  %p5389_p1 = scmp.eq.s32.totalorder %s4457_s21, 0 }
   0xc   : > { %p5393_p2 = scmp.eq.s32.totalorder %s4457_s21, 1  ;;  %p148_p3 = scmp.eq.s32.totalorder %s4458_s22, 1 }
   0xd   : > { %p5399_p4 = por %p5389_p1, %p55_p0  ;;  %p4459_p5 = scmp.ge.s32.totalorder %s5321_s20, 1 }
   0xe   : > { %p5404_p6 = por %p148_p3, %p55_p0  ;;  %p155_p7 = scmp.lt.s32.totalorder %s5321_s20, 3 }
   0xf   : > { %s6390_s1 = sld [smem:[#allocation55_spill]]  ;;  %s5323_s5 = smov [#allocation6]  }
  0x10   : > { %p5412_p8 = pnand %p4459_p5, %p155_p7  ;;  %s168_s6 = sshll.u32 %s5323_s5, 4  ;;  %s169_s6 = int_to_ptr.vmem [resolvable:$true] %s168_s6 }
  0x11   : > { %p4462_p11 = scmp.ge.s32.totalorder %s5321_s20, 2  ;;  %s6392_s2 = sld [smem:[#allocation56_spill]] }
  0x12   : > { %p5067_p9 = pneg %p5412_p8  ;;  %s6383_s10 = smov 64  }
  0x13   : > { %s5325_s11 = smov 4   ;;  %s5326_s12 = smov [#allocation8]  }
  0x14   : > { %p5068_p10 = pnand %p5067_p9, %p5389_p1  ;;  %s182_s13 = sshll.u32 %s5326_s12, 4  ;;  %s183_s13 = int_to_ptr.vmem [resolvable:$true] %s182_s13 }
  0x15   : > { %s166_s29 = sshll.u32 %s6390_s1, 4  ;;  %s33_s14 = sadd.s32 1, %s5317_s19  ;;  %s167_s29 = int_to_ptr.hbm [resolvable:$true] %s166_s29 }
  0x16   : > { %5070 = dma.hbm_to_vmem [thread:$0]  (!%p5068_p10), %s167_s29, 8192, %s169_s6, [#allocation7], %s6383_s10, %s6383_s10, %s5325_s11  }
  0x17   : > { %s180_s9 = sshll.u32 %s6392_s2, 4  ;;  %s42_s21 = sadd.s32 1, %s5309_s17  ;;  %s181_s9 = int_to_ptr.hbm [resolvable:$true] %s180_s9 }
  0x18   : > { %5073 = dma.hbm_to_vmem [thread:$0]  (!%p5068_p10), %s181_s9, 1024, %s183_s13, [#allocation7], %s6383_s10, %s6383_s10, %s5325_s11  }
  0x19   : > { %p35_p12 = scmp.ge.s32.totalorder %s33_s14, 2  ;;  %p49_p13 = scmp.ne.s32.totalorder %s5309_s17, %s5305_s16 }
  0x1a   : > { %p50_p0 = scmp.eq.s32.totalorder %s5321_s20, 0  ;;  %p5084_p3 = scmp.lt.s32.totalorder %s5321_s20, 2 }
  0x1b   : > { %s6540_s14 = smov (%p35_p12, %s33_s14), 0  ;;  %p5442_p7 = por %p5393_p2, %p49_p13 }
  0x1c   : > { %p5436_p5 = por %p50_p0, %p49_p13  ;;  %s37_s28 = ssub.s32 %s5317_s19, %s6540_s14 }
  0x1d   : > { %s199_s29 = sand.u32 1, %s5309_s17   ;;  %p40_p9 = scmp.eq.s32.totalorder %s37_s28, 0 }
  0x1e   : > { %s4463_s5 = sshll.u32 %s199_s29, 10  ;;  %s4766_s6 = sshll.u32 %s5317_s19, 10 }
  0x1f   : > { %s5451_s7 = scalar_select %p40_p9, %s5309_s17, %s42_s21  }
  0x20   : > { %s211_s11 = scalar_lea.hbm %s6378_s0, %s4766_s6  ;;  %s203_s13 = scalar_lea.vmem [#allocation3], %s4463_s5 }
  0x21   : > { %s212_s12 = sshll.u32 %s211_s11, 4  ;;  %s214_s10 = sshll.u32 %s203_s13, 4  ;;  %s213_s12 = int_to_ptr.hbm [resolvable:$true] %s212_s12  ;;  %s215_s10 = int_to_ptr.vmem [resolvable:$true] %s214_s10 }
  0x22   : > { %p5075_p2 = pnand %p5084_p3, %p5436_p5  ;;  %s200_s24 = scalar_lea.sflag [#allocation4], %s199_s29 }
  0x23   : > { %s5327_s1 = smov 1024   ;;  %s6395_s2 = smov 64  }
  0x24   : > { %5077 = dma.hbm_to_vmem [thread:$0]  (!%p5075_p2), %s213_s12, 16384, %s215_s10, %s200_s24, %s5327_s1, %s5327_s1, %s6395_s2  }
  0x25   : > { %226 = sbr.rel (%p5412_p8) target bundleno = 1507 (0x5e3), region = 36 }
  0x2a   : > { %s5464_s21 = sand.u32 1, %s5305_s16  }
  0x2b   : > { %s4468_s28 = sshll.u32 %s5464_s21, 10  ;;  %s229_s5 = scalar_lea.sflag [#allocation4], %s5464_s21 }
  0x2c   : > { %s5468_s6 = scalar_lea.vmem [#allocation3], %s4468_s28 }
  0x2d   : > { %5288 = dma.done.wait (%p5399_p4), %s229_s5, 16384  }
  0x2e   : > { %5290 = vsyncadd (%p5399_p4), %s229_s5, 4294950912 }
  0x2f   : > { %5292 = dma.done.wait (%p5389_p1), [#allocation7], 9216  }
  0x30   : > { %5294 = vsyncadd (%p5389_p1), [#allocation7], 4294958080  ;;  %v4774_v0 = vld [vmem:[#allocation6 + $0x38] sm:$0xff]  ;;  %v4773_v1 = vld [vmem:[#allocation6 + $0x30] sm:$0xff]  ;;  %s4471_s23 = sshll.u32 %s5464_s21, 8  ;;  %s4839_s22 = sshll.u32 %s5313_s18, 8 }
  0x31   : > { %5031 = vmatpush.bf16.msra.mxu1 %v4774_v0  ;;  %5032 = vmatpush.bf16.msra.mxu2 %v4774_v0  ;;  %v4772_v2 = vld [vmem:[#allocation6 + $0x28] sm:$0xff]  ;;  %v4771_v3 = vld [vmem:[#allocation6 + $0x20] sm:$0xff]  ;;  %v4770_v4 = vld [vmem:[#allocation6 + $0x18] sm:$0xff]  ;;  %s6164_s25 = scalar_lea.vmem [#allocation9], %s4471_s23  ;;  %s4348_s9 = scalar_lea.hbm %s6382_s4, %s4839_s22 }
  0x32   : > { %5033 = vmatpush.bf16.msra.mxu3 %v4774_v0  ;;  %2328 = vmatpush.bf16.msra.mxu0 %v4774_v0  ;;  %v5479_v5 = vld [vmem:[%s5468_s6 + $0x100] sm:$0xff]  ;;  %v4769_v6 = vld [vmem:[#allocation6 + $0x10] sm:$0xff]  ;;  %v4768_v13 = vld [vmem:[#allocation6 + $0x8] sm:$0xff]  ;;  %s4349_s11 = sshll.u32 %s6164_s25, 4  ;;  %s4351_s12 = sshll.u32 %s4348_s9, 4  ;;  %s4350_s11 = int_to_ptr.vmem [resolvable:$true] %s4349_s11  ;;  %s4352_s12 = int_to_ptr.hbm [resolvable:$true] %s4351_s12 }
  0x33   : > { %v5482_v7 = vld [vmem:[%s5468_s6 + $0x200] sm:$0xff]  ;;  %v595_v9 = vunpack.c.0.s8 %v5479_v5  ;;  %v603_v10 = vunpack.c.1.s8 %v5479_v5  ;;  %v4790_v26 = vld [vmem:[#allocation6 + $0xb8] sm:$0xff]  ;;  %v4789_v34 = vld [vmem:[#allocation6 + $0xb0] sm:$0xff]  ;;  %v611_v39 = vunpack.c.2.s8 %v5479_v5  ;;  %v619_v40 = vunpack.c.3.s8 %v5479_v5  ;;  %s4337_s13 = scalar_lea.sflag [#allocation5], %s5464_s21  ;;  %s5249_s18 = sshra.s32 %s4352_s12, 4  ;;  %s5250_s18 = int_to_ptr.hbm [resolvable:$true] %s5249_s18 }
  0x34   : > { %v5485_v8 = vld [vmem:[%s5468_s6 + $0x300] sm:$0xff]  ;;  %v723_v11 = vunpack.c.0.s8 %v5482_v7  ;;  %v731_v12 = vunpack.c.1.s8 %v5482_v7  ;;  %v4798_v27 = vld [vmem:[#allocation6 + $0xf8] sm:$0xff]  ;;  %v4797_v35 = vld [vmem:[#allocation6 + $0xf0] sm:$0xff]  ;;  %v739_v43 = vunpack.c.2.s8 %v5482_v7  ;;  %v747_v44 = vunpack.c.3.s8 %v5482_v7  ;;  %s5251_s24 = scalar_lea.hbm %s5250_s18, 256  ;;  %p5256_p10 = scmp.lt.s32.totalorder %s5250_s18, %s6382_s4 }
  0x35   : > { %5034 = vmatpush.bf16.msra.mxu1 %v4773_v1  ;;  %5035 = vmatpush.bf16.msra.mxu2 %v4773_v1  ;;  %v851_v14 = vunpack.c.0.s8 %v5485_v8  ;;  %v859_v15 = vunpack.c.1.s8 %v5485_v8  ;;  %v5494_v16 = vld [vmem:[%s5468_s6] sm:$0xff]  ;;  %v1107_v17 = vcvt.s32.f32 %v595_v9  ;;  %v1115_v18 = vcvt.s32.f32 %v603_v10  ;;  %v4782_v28 = vld [vmem:[#allocation6 + $0x78] sm:$0xff]  ;;  %v4781_v36 = vld [vmem:[#allocation6 + $0x70] sm:$0xff]  ;;  %p5252_p1 = scmp.ne.s32.totalorder %s5250_s18, %s5251_s24 }
  0x36   : > { %5036 = vmatpush.bf16.msra.mxu3 %v4773_v1  ;;  %2329 = vmatpush.bf16.msra.mxu0 %v4773_v1  ;;  %v1235_v19 = vcvt.s32.f32 %v723_v11  ;;  %v1243_v20 = vcvt.s32.f32 %v731_v12  ;;  %v467_v21 = vunpack.c.0.s8 %v5494_v16  ;;  %v475_v22 = vunpack.c.1.s8 %v5494_v16  ;;  %v4767_v23 = vld [vmem:[#allocation6] sm:$0xff]  ;;  %v4788_v38 = vld [vmem:[#allocation6 + $0xa8] sm:$0xff] }
  0x37   : > { %v1363_v24 = vcvt.s32.f32 %v851_v14  ;;  %v1371_v25 = vcvt.s32.f32 %v859_v15  ;;  %v1555_v29 = vpack.c.bf16 %v1115_v18, %v1107_v17  ;;  %v4796_v41 = vld [vmem:[#allocation6 + $0xe8] sm:$0xff]  ;;  %v867_v45 = vunpack.c.2.s8 %v5485_v8  ;;  %v379_v61 = vld [vmem:[%s5468_s6 + $0x140] sm:$0xff]  ;;  %p5253_p4 = pnand %p5252_p1, %p5442_p7 }
  0x38   : > { %v1619_v30 = vpack.c.bf16 %v1243_v20, %v1235_v19  ;;  %v979_v31 = vcvt.s32.f32 %v467_v21  ;;  %v987_v32 = vcvt.s32.f32 %v475_v22  ;;  %v4780_v42 = vld [vmem:[#allocation6 + $0x68] sm:$0xff]  ;;  %v875_v46 = vunpack.c.3.s8 %v5485_v8  ;;  %v411_v62 = vld [vmem:[%s5468_s6 + $0x240] sm:$0xff] }
  0x39   : > { %5037 = vmatpush.bf16.msra.mxu1 %v4772_v2  ;;  %5038 = vmatpush.bf16.msra.mxu2 %v4772_v2  ;;  %v1683_v33 = vpack.c.bf16 %v1371_v25, %v1363_v24  ;;  %v1123_v47 = vcvt.s32.f32 %v611_v39  ;;  %v1131_v48 = vcvt.s32.f32 %v619_v40  ;;  %v1251_v49 = vcvt.s32.f32 %v739_v43  ;;  %v4787_v63 = vld [vmem:[#allocation6 + $0xa0] sm:$0xff]  ;;  %v4786_v24 = vld [vmem:[#allocation6 + $0x98] sm:$0xff]  ;;  %p5254_p8 = pneg %p5253_p4 }
  0x3a   : > { %5039 = vmatpush.bf16.msra.mxu3 %v4772_v2  ;;  %2330 = vmatpush.bf16.msra.mxu0 %v4772_v2  ;;  %v1491_v37 = vpack.c.bf16 %v987_v32, %v979_v31  ;;  %v1259_v50 = vcvt.s32.f32 %v747_v44  ;;  %v483_v51 = vunpack.c.2.s8 %v5494_v16  ;;  %v491_v52 = vunpack.c.3.s8 %v5494_v16  ;;  %v4795_v0 = vld [vmem:[#allocation6 + $0xe0] sm:$0xff]  ;;  %v4794_v25 = vld [vmem:[#allocation6 + $0xd8] sm:$0xff] }
  0x3b   : > { %v1379_v53 = vcvt.s32.f32 %v867_v45  ;;  %v1387_v54 = vcvt.s32.f32 %v875_v46  ;;  %v1563_v55 = vpack.c.bf16 %v1131_v48, %v1123_v47  ;;  %v4779_v1 = vld [vmem:[#allocation6 + $0x60] sm:$0xff]  ;;  %v755_v5 = vunpack.c.0.s8 %v411_v62 }
  0x3c   : > { %v1627_v56 = vpack.c.bf16 %v1259_v50, %v1251_v49  ;;  %v995_v57 = vcvt.s32.f32 %v483_v51  ;;  %v1003_v58 = vcvt.s32.f32 %v491_v52  ;;  %v443_v2 = vld [vmem:[%s5468_s6 + $0x340] sm:$0xff]  ;;  %v4785_v49 = vld [vmem:[#allocation6 + $0x90] sm:$0xff] }
  0x3d   : > { %5040 = vmatpush.bf16.msra.mxu1 %v4771_v3  ;;  %5041 = vmatpush.bf16.msra.mxu2 %v4771_v3  ;;  %v1691_v59 = vpack.c.bf16 %v1387_v54, %v1379_v53  ;;  %v883_v7 = vunpack.c.0.s8 %v443_v2  ;;  %v891_v8 = vunpack.c.1.s8 %v443_v2  ;;  %v347_v9 = vld [vmem:[%s5468_s6 + $0x40] sm:$0xff]  ;;  %v1267_v12 = vcvt.s32.f32 %v755_v5  ;;  %v4793_v50 = vld [vmem:[#allocation6 + $0xd0] sm:$0xff] }
  0x3e   : > { %5042 = vmatpush.bf16.msra.mxu3 %v4771_v3  ;;  %2331 = vmatpush.bf16.msra.mxu0 %v4771_v3  ;;  %v1499_v60 = vpack.c.bf16 %v1003_v58, %v995_v57  ;;  %v627_v3 = vunpack.c.0.s8 %v379_v61  ;;  %v499_v14 = vunpack.c.0.s8 %v347_v9  ;;  %v507_v15 = vunpack.c.1.s8 %v347_v9  ;;  %v387_v47 = vld [vmem:[%s5468_s6 + $0x180] sm:$0xff]  ;;  %v4777_v51 = vld [vmem:[#allocation6 + $0x50] sm:$0xff] }
  0x3f   : > { %v1395_v16 = vcvt.s32.f32 %v883_v7  ;;  %v1403_v17 = vcvt.s32.f32 %v891_v8  ;;  %v899_v31 = vunpack.c.2.s8 %v443_v2  ;;  %v907_v32 = vunpack.c.3.s8 %v443_v2  ;;  %v419_v48 = vld [vmem:[%s5468_s6 + $0x280] sm:$0xff] }
  0x40   : > { %v1139_v10 = vcvt.s32.f32 %v627_v3  ;;  %v1011_v20 = vcvt.s32.f32 %v499_v14  ;;  %v1019_v21 = vcvt.s32.f32 %v507_v15  ;;  %v451_v52 = vld [vmem:[%s5468_s6 + $0x380] sm:$0xff]  ;;  %v659_v53 = vunpack.c.0.s8 %v387_v47 }
  0x41   : > { %5043 = vmatpush.bf16.msra.mxu1 %v4770_v4  ;;  %5044 = vmatpush.bf16.msra.mxu2 %v4770_v4  ;;  %v1699_v22 = vpack.c.bf16 %v1403_v17, %v1395_v16  ;;  %v1411_v39 = vcvt.s32.f32 %v899_v31  ;;  %v1419_v40 = vcvt.s32.f32 %v907_v32  ;;  %v667_v54 = vunpack.c.1.s8 %v387_v47  ;;  %v4806_v17 = vld [vmem:[#allocation6 + $0x138] sm:$0xff] }
  0x42   : > { %5045 = vmatpush.bf16.msra.mxu3 %v4770_v4  ;;  %2332 = vmatpush.bf16.msra.mxu0 %v4770_v4  ;;  %v635_v4 = vunpack.c.1.s8 %v379_v61  ;;  %v915_v57 = vunpack.c.0.s8 %v451_v52  ;;  %v923_v58 = vunpack.c.1.s8 %v451_v52  ;;  %v683_v14 = vunpack.c.3.s8 %v387_v47 }
  0x43   : > { %v1707_v45 = vpack.c.bf16 %v1419_v40, %v1411_v39  ;;  %v803_v15 = vunpack.c.2.s8 %v419_v48  ;;  %v811_v16 = vunpack.c.3.s8 %v419_v48  ;;  %v4804_v39 = vld [vmem:[#allocation6 + $0x128] sm:$0xff]  ;;  %v459_v40 = vld [vmem:[%s5468_s6 + $0x3c0] sm:$0xff] }
  0x44   : > { %v1147_v11 = vcvt.s32.f32 %v635_v4  ;;  %v1427_v2 = vcvt.s32.f32 %v915_v57  ;;  %v1435_v3 = vcvt.s32.f32 %v923_v58  ;;  %v4802_v58 = vld [vmem:[#allocation6 + $0x118] sm:$0xff] }
  0x45   : > { %5046 = vmatpush.bf16.msra.mxu1 %v4769_v6  ;;  %5047 = vmatpush.bf16.msra.mxu2 %v4769_v6 }
  0x46   : > { %5048 = vmatpush.bf16.msra.mxu3 %v4769_v6  ;;  %2333 = vmatpush.bf16.msra.mxu0 %v4769_v6  ;;  %v763_v6 = vunpack.c.1.s8 %v411_v62  ;;  %v1571_v18 = vpack.c.bf16 %v1147_v11, %v1139_v10  ;;  %v1715_v8 = vpack.c.bf16 %v1435_v3, %v1427_v2  ;;  %v4784_v10 = vld [vmem:[#allocation6 + $0x88] sm:$0xff]  ;;  %v4822_v2 = vld [vmem:[#allocation6 + $0x1b8] sm:$0xff] }
  0x47   : > { %v4792_v11 = vld [vmem:[#allocation6 + $0xc8] sm:$0xff]  ;;  %v4830_v3 = vld [vmem:[#allocation6 + $0x1f8] sm:$0xff] }
  0x49   : > { %5049 = vmatpush.bf16.msra.mxu1 %v4768_v13  ;;  %5050 = vmatpush.bf16.msra.mxu2 %v4768_v13 }
  0x4a   : > { %5051 = vmatpush.bf16.msra.mxu3 %v4768_v13  ;;  %2334 = vmatpush.bf16.msra.mxu0 %v4768_v13  ;;  %v1275_v13 = vcvt.s32.f32 %v763_v6 }
  0x4c   : > { %v1635_v19 = vpack.c.bf16 %v1275_v13, %v1267_v12  ;;  %v4776_v12 = vld [vmem:[#allocation6 + $0x48] sm:$0xff]  ;;  %v675_v13 = vunpack.c.2.s8 %v387_v47  ;;  %v955_v47 = vunpack.c.1.s8 %v459_v40 }
  0x4d   : > { %5052 = vmatpush.bf16.msra.mxu1 %v4767_v23  ;;  %5053 = vmatpush.bf16.msra.mxu2 %v4767_v23 }
  0x4e   : > { %5054 = vmatpush.bf16.msra.mxu3 %v4767_v23  ;;  %2335 = vmatpush.bf16.msra.mxu0 %v4767_v23  ;;  %v1507_v23 = vpack.c.bf16 %v1019_v21, %v1011_v20  ;;  %v4805_v20 = vld [vmem:[#allocation6 + $0x130] sm:$0xff]  ;;  %v1187_v21 = vcvt.s32.f32 %v675_v13  ;;  %v1467_v57 = vcvt.s32.f32 %v955_v47 }
  0x50   : > { %2376 = vmatmul.bf16.vlgmr.msra.gmra.mxu1 %v1555_v29  ;;  %2416 = vmatmul.bf16.vlgmr.msra.gmra.mxu2 %v1619_v30  ;;  %v771_v29 = vunpack.c.2.s8 %v411_v62  ;;  %v779_v30 = vunpack.c.3.s8 %v411_v62 }
  0x51   : > { %2666 = vmatpush.bf16.msrb.mxu2 %v4790_v26  ;;  %2497 = vmatpush.bf16.msrb.mxu1 %v4782_v28  ;;  %v4778_v26 = vld [vmem:[#allocation6 + $0x58] sm:$0xff]  ;;  %v651_v28 = vunpack.c.3.s8 %v379_v61 }
  0x52   : > { %2835 = vmatpush.bf16.msrb.mxu3 %v4798_v27  ;;  %2336 = vmatmul.bf16.vlgmr.msra.gmra.mxu0 %v1491_v37  ;;  %v643_v27 = vunpack.c.2.s8 %v379_v61  ;;  %v515_v37 = vunpack.c.2.s8 %v347_v9  ;;  %v1179_v61 = vcvt.s32.f32 %v667_v54 }
  0x53   : > { %2456 = vmatmul.bf16.vlgmr.msra.gmra.mxu3 %v1683_v33  ;;  %3004 = vmatpush.bf16.msrb.mxu0 %v4806_v17 }
  0x54   : > { %v1155_v33 = vcvt.s32.f32 %v643_v27  ;;  %v1027_v43 = vcvt.s32.f32 %v515_v37  ;;  %v4783_v37 = vld [vmem:[#allocation6 + $0x80] sm:$0xff] }
  0x55   : > { %2667 = vmatpush.bf16.msrb.mxu2 %v4789_v34  ;;  %2498 = vmatpush.bf16.msrb.mxu1 %v4781_v36  ;;  %v1163_v34 = vcvt.s32.f32 %v651_v28  ;;  %v1291_v36 = vcvt.s32.f32 %v779_v30 }
  0x56   : > { %2836 = vmatpush.bf16.msrb.mxu3 %v4797_v35  ;;  %v1283_v35 = vcvt.s32.f32 %v771_v29 }
  0x57   : > { %3005 = vmatpush.bf16.msrb.mxu0 %v4805_v20 }
  0x59   : > { %2668 = vmatpush.bf16.msrb.mxu2 %v4788_v38  ;;  %2499 = vmatpush.bf16.msrb.mxu1 %v4780_v42  ;;  %v523_v38 = vunpack.c.3.s8 %v347_v9  ;;  %v1643_v42 = vpack.c.bf16 %v1291_v36, %v1283_v35  ;;  %v395_v35 = vld [vmem:[%s5468_s6 + $0x1c0] sm:$0xff] }
  0x5a   : > { %2837 = vmatpush.bf16.msrb.mxu3 %v4796_v41  ;;  %v1579_v41 = vpack.c.bf16 %v1163_v34, %v1155_v33  ;;  %v427_v36 = vld [vmem:[%s5468_s6 + $0x2c0] sm:$0xff] }
  0x5b   : > { %v1035_v44 = vcvt.s32.f32 %v523_v38  ;;  %v4791_v38 = vld [vmem:[#allocation6 + $0xc0] sm:$0xff]  ;;  %3006 = vmatpush.bf16.msrb.mxu0 %v4804_v39 }
  0x5d   : > { %2669 = vmatpush.bf16.msrb.mxu2 %v4787_v63  ;;  %2500 = vmatpush.bf16.msrb.mxu1 %v4779_v1  ;;  %v1515_v46 = vpack.c.bf16 %v1035_v44, %v1027_v43  ;;  %v699_v43 = vunpack.c.1.s8 %v395_v35  ;;  %v819_v44 = vunpack.c.0.s8 %v427_v36 }
  0x5e   : > { %2838 = vmatpush.bf16.msrb.mxu3 %v4795_v0 }
  0x60   : > { %2381 = vmatmul.bf16.gmra.mxu1 %v1563_v55  ;;  %2421 = vmatmul.bf16.gmra.mxu2 %v1627_v56  ;;  %v787_v55 = vunpack.c.0.s8 %v419_v48  ;;  %v795_v56 = vunpack.c.1.s8 %v419_v48  ;;  %v363_v48 = vld [vmem:[%s5468_s6 + $0xc0] sm:$0xff] }
  0x61   : > { %2670 = vmatpush.bf16.msrb.mxu2 %v4786_v24  ;;  %2501 = vmatpush.bf16.msrb.mxu1 %v4778_v26  ;;  %v1323_v24 = vcvt.s32.f32 %v811_v16  ;;  %v563_v54 = vunpack.c.0.s8 %v363_v48  ;;  %v579_v17 = vunpack.c.2.s8 %v363_v48 }
  0x62   : > { %2341 = vmatmul.bf16.gmra.mxu0 %v1499_v60  ;;  %2839 = vmatpush.bf16.msrb.mxu3 %v4794_v25  ;;  %v1171_v60 = vcvt.s32.f32 %v659_v53  ;;  %v1299_v62 = vcvt.s32.f32 %v787_v55  ;;  %v1307_v63 = vcvt.s32.f32 %v795_v56  ;;  %v571_v55 = vunpack.c.1.s8 %v363_v48 }
  0x63   : > { %2461 = vmatmul.bf16.gmra.mxu3 %v1691_v59  ;;  %v355_v59 = vld [vmem:[%s5468_s6 + $0x80] sm:$0xff] }
  0x64   : > { %v531_v0 = vunpack.c.0.s8 %v355_v59  ;;  %v539_v1 = vunpack.c.1.s8 %v355_v59  ;;  %v1587_v4 = vpack.c.bf16 %v1179_v61, %v1171_v60  ;;  %v1651_v5 = vpack.c.bf16 %v1307_v63, %v1299_v62 }
  0x65   : > { %2671 = vmatpush.bf16.msrb.mxu2 %v4785_v49  ;;  %2502 = vmatpush.bf16.msrb.mxu1 %v4777_v51  ;;  %v547_v25 = vunpack.c.2.s8 %v355_v59  ;;  %v555_v26 = vunpack.c.3.s8 %v355_v59  ;;  %v4803_v49 = vld [vmem:[#allocation6 + $0x120] sm:$0xff]  ;;  %v1211_v51 = vcvt.s32.f32 %v699_v43  ;;  %v1075_v61 = vcvt.s32.f32 %v563_v54 }
  0x66   : > { %2840 = vmatpush.bf16.msrb.mxu3 %v4793_v50  ;;  %v1043_v6 = vcvt.s32.f32 %v531_v0  ;;  %v1051_v7 = vcvt.s32.f32 %v539_v1  ;;  %3007 = vmatpush.bf16.msrb.mxu0 %v4803_v49  ;;  %v1083_v62 = vcvt.s32.f32 %v571_v55  ;;  %v4801_v0 = vld [vmem:[#allocation6 + $0x110] sm:$0xff] }
  0x67   : > { %v1059_v31 = vcvt.s32.f32 %v547_v25  ;;  %v1067_v32 = vcvt.s32.f32 %v555_v26 }
  0x68   : > { %v1523_v9 = vpack.c.bf16 %v1051_v7, %v1043_v6  ;;  %v1539_v1 = vpack.c.bf16 %v1083_v62, %v1075_v61  ;;  %v715_v6 = vunpack.c.3.s8 %v395_v35  ;;  %v835_v7 = vunpack.c.2.s8 %v427_v36 }
  0x69   : > { %2672 = vmatpush.bf16.msrb.mxu2 %v4784_v10  ;;  %2503 = vmatpush.bf16.msrb.mxu1 %v4776_v12  ;;  %v1531_v34 = vpack.c.bf16 %v1067_v32, %v1059_v31  ;;  %v963_v10 = vunpack.c.2.s8 %v459_v40  ;;  %v4799_v12 = vld [vmem:[#allocation6 + $0x100] sm:$0xff] }
  0x6a   : > { %2841 = vmatpush.bf16.msrb.mxu3 %v4792_v11  ;;  %3008 = vmatpush.bf16.msrb.mxu0 %v4802_v58  ;;  %v971_v11 = vunpack.c.3.s8 %v459_v40 }
  0x6c   : > { %v1483_v20 = vcvt.s32.f32 %v971_v11 }
  0x6d   : > { %2673 = vmatpush.bf16.msrb.mxu2 %v4783_v37 }
  0x6e   : > { %2842 = vmatpush.bf16.msrb.mxu3 %v4791_v38  ;;  %3009 = vmatpush.bf16.msrb.mxu0 %v4801_v0 }
  0x70   : > { %2386 = vmatmul.bf16.gmra.mxu1 %v1571_v18  ;;  %2426 = vmatmul.bf16.gmra.mxu2 %v1635_v19  ;;  %v931_v18 = vunpack.c.2.s8 %v451_v52  ;;  %v939_v19 = vunpack.c.3.s8 %v451_v52  ;;  %v1331_v52 = vcvt.s32.f32 %v819_v44 }
  0x71   : > { %3342 = vmatpush.bf16.msra.mxu2 %v4822_v2 }
  0x72   : > { %2346 = vmatmul.bf16.gmra.mxu0 %v1507_v23  ;;  %v1315_v23 = vcvt.s32.f32 %v803_v15  ;;  %v1443_v27 = vcvt.s32.f32 %v931_v18  ;;  %v1451_v28 = vcvt.s32.f32 %v939_v19  ;;  %3511 = vmatpush.bf16.msra.mxu3 %v4830_v3  ;;  %v1347_v15 = vcvt.s32.f32 %v835_v7 }
  0x73   : > { %2466 = vmatmul.bf16.gmra.mxu3 %v1699_v22  ;;  %v1195_v22 = vcvt.s32.f32 %v683_v14  ;;  %v1227_v14 = vcvt.s32.f32 %v715_v6  ;;  %v587_v18 = vunpack.c.3.s8 %v363_v48  ;;  %v1475_v19 = vcvt.s32.f32 %v963_v10 }
  0x74   : > { %v1659_v30 = vpack.c.bf16 %v1323_v24, %v1315_v23  ;;  %v1723_v33 = vpack.c.bf16 %v1451_v28, %v1443_v27  ;;  %v1091_v23 = vcvt.s32.f32 %v579_v17  ;;  %v340_v27 = vld [vmem:[%s5468_s6 + $0x8] sm:$0xff]  ;;  %v341_v28 = vld [vmem:[%s5468_s6 + $0x10] sm:$0xff] }
  0x75   : > { %v1595_v29 = vpack.c.bf16 %v1195_v22, %v1187_v21  ;;  %v1099_v24 = vcvt.s32.f32 %v587_v18  ;;  %v1739_v25 = vpack.c.bf16 %v1483_v20, %v1475_v19  ;;  %v476_v31 = vunpack.c.1.s8 %v340_v27  ;;  %v349_v18 = vld [vmem:[%s5468_s6 + $0x50] sm:$0xff]  ;;  %v350_v19 = vld [vmem:[%s5468_s6 + $0x58] sm:$0xff] }
  0x76   : > { %v469_v32 = vunpack.c.0.s8 %v341_v28  ;;  %v484_v54 = vunpack.c.2.s8 %v340_v27  ;;  %v492_v55 = vunpack.c.3.s8 %v340_v27  ;;  %v493_v58 = vunpack.c.3.s8 %v341_v28 }
  0x77   : > { %v1547_v26 = vpack.c.bf16 %v1099_v24, %v1091_v23  ;;  %v988_v38 = vcvt.s32.f32 %v476_v31  ;;  %v501_v24 = vunpack.c.0.s8 %v349_v18 }
  0x78   : > { %v981_v39 = vcvt.s32.f32 %v469_v32  ;;  %v996_v62 = vcvt.s32.f32 %v484_v54 }
  0x79   : > { %v1013_v32 = vcvt.s32.f32 %v501_v24 }
  0x80   : > { %2391 = vmatmul.bf16.gmra.mxu1 %v1579_v41  ;;  %2431 = vmatmul.bf16.gmra.mxu2 %v1643_v42  ;;  %v4775_v41 = vld [vmem:[#allocation6 + $0x40] sm:$0xff]  ;;  %v691_v42 = vunpack.c.0.s8 %v395_v35 }
  0x81   : > { %2504 = vmatpush.bf16.msrb.mxu1 %v4775_v41 }
  0x82   : > { %2351 = vmatmul.bf16.gmra.mxu0 %v1515_v46  ;;  %v947_v46 = vunpack.c.0.s8 %v459_v40  ;;  %v1203_v50 = vcvt.s32.f32 %v691_v42 }
  0x83   : > { %2471 = vmatmul.bf16.gmra.mxu3 %v1707_v45  ;;  %v827_v45 = vunpack.c.1.s8 %v427_v36 }
  0x84   : > { %v1459_v56 = vcvt.s32.f32 %v947_v46  ;;  %v1603_v59 = vpack.c.bf16 %v1211_v51, %v1203_v50 }
  0x85   : > { %v1339_v53 = vcvt.s32.f32 %v827_v45 }
  0x86   : > { %v1731_v63 = vpack.c.bf16 %v1467_v57, %v1459_v56  ;;  %v485_v57 = vunpack.c.2.s8 %v341_v28 }
  0x87   : > { %v1667_v60 = vpack.c.bf16 %v1339_v53, %v1331_v52 }
  0x88   : > { %v997_v0 = vcvt.s32.f32 %v485_v57 }
  0x90   : > { %2396 = vmatmul.bf16.gmra.mxu1 %v1587_v4  ;;  %2436 = vmatmul.bf16.gmra.mxu2 %v1651_v5  ;;  %v4800_v4 = vld [vmem:[#allocation6 + $0x108] sm:$0xff]  ;;  %v707_v5 = vunpack.c.2.s8 %v395_v35 }
  0x91   : > { %3010 = vmatpush.bf16.msrb.mxu0 %v4800_v4 }
  0x92   : > { %2356 = vmatmul.bf16.gmra.mxu0 %v1523_v9  ;;  %v4814_v9 = vld [vmem:[#allocation6 + $0x178] sm:$0xff]  ;;  %v1219_v13 = vcvt.s32.f32 %v707_v5 }
  0x93   : > { %2476 = vmatmul.bf16.gmra.mxu3 %v1715_v8  ;;  %v843_v8 = vunpack.c.3.s8 %v427_v36  ;;  %3173 = vmatpush.bf16.msra.mxu1 %v4814_v9  ;;  %v343_v36 = vld [vmem:[%s5468_s6 + $0x20] sm:$0xff] }
  0x94   : > { %v1611_v21 = vpack.c.bf16 %v1227_v14, %v1219_v13  ;;  %v471_v41 = vunpack.c.0.s8 %v343_v36  ;;  %v479_v42 = vunpack.c.1.s8 %v343_v36  ;;  %v487_v2 = vunpack.c.2.s8 %v343_v36 }
  0x95   : > { %v1355_v16 = vcvt.s32.f32 %v843_v8  ;;  %3011 = vmatpush.bf16.msrb.mxu0 %v4799_v12  ;;  %v495_v3 = vunpack.c.3.s8 %v343_v36 }
  0x96   : > { %v983_v47 = vcvt.s32.f32 %v471_v41  ;;  %v991_v48 = vcvt.s32.f32 %v479_v42  ;;  %v999_v11 = vcvt.s32.f32 %v487_v2 }
  0x97   : > { %v1675_v22 = vpack.c.bf16 %v1355_v16, %v1347_v15  ;;  %v1007_v12 = vcvt.s32.f32 %v495_v3  ;;  %v348_v16 = vld [vmem:[%s5468_s6 + $0x48] sm:$0xff] }
  0x98   : > { %v1495_v51 = vpack.c.bf16 %v991_v48, %v983_v47  ;;  %v524_v57 = vunpack.c.3.s8 %v348_v16 }
  0x99   : > { %v1503_v15 = vpack.c.bf16 %v1007_v12, %v999_v11 }
  0x9a   : > { %v1036_v3 = vcvt.s32.f32 %v524_v57 }
  0xa0   : > { %2401 = vmatmul.bf16.gmra.mxu1 %v1595_v29  ;;  %2441 = vmatmul.bf16.gmra.mxu2 %v1659_v30  ;;  %v342_v29 = vld [vmem:[%s5468_s6 + $0x18] sm:$0xff]  ;;  %v468_v30 = vunpack.c.0.s8 %v340_v27  ;;  %v502_v27 = vunpack.c.0.s8 %v350_v19 }
  0xa1   : > { %v478_v35 = vunpack.c.1.s8 %v342_v29  ;;  %v494_v61 = vunpack.c.3.s8 %v342_v29 }
  0xa2   : > { %2361 = vmatmul.bf16.gmra.mxu0 %v1531_v34  ;;  %v470_v34 = vunpack.c.0.s8 %v342_v29  ;;  %v980_v37 = vcvt.s32.f32 %v468_v30 }
  0xa3   : > { %2481 = vmatmul.bf16.gmra.mxu3 %v1723_v33  ;;  %v477_v33 = vunpack.c.1.s8 %v341_v28  ;;  %v990_v44 = vcvt.s32.f32 %v478_v35  ;;  %v1006_v6 = vcvt.s32.f32 %v494_v61  ;;  %v510_v28 = vunpack.c.1.s8 %v350_v19 }
  0xa4   : > { %v982_v43 = vcvt.s32.f32 %v470_v34  ;;  %v1492_v45 = vpack.c.bf16 %v988_v38, %v980_v37  ;;  %v1014_v37 = vcvt.s32.f32 %v502_v27  ;;  %v525_v61 = vunpack.c.3.s8 %v349_v18 }
  0xa5   : > { %v989_v40 = vcvt.s32.f32 %v477_v33  ;;  %v1022_v38 = vcvt.s32.f32 %v510_v28  ;;  %v356_v28 = vld [vmem:[%s5468_s6 + $0x88] sm:$0xff] }
  0xa6   : > { %v1494_v50 = vpack.c.bf16 %v990_v44, %v982_v43 }
  0xa7   : > { %v1493_v46 = vpack.c.bf16 %v989_v40, %v981_v39 }
  0xb0   : > { %2406 = vmatmul.bf16.gmra.mxu1 %v1603_v59  ;;  %2446 = vmatmul.bf16.gmra.mxu2 %v1667_v60  ;;  %v486_v60 = vunpack.c.2.s8 %v342_v29  ;;  %v351_v29 = vld [vmem:[%s5468_s6 + $0x60] sm:$0xff] }
  0xb1   : > { %v503_v34 = vunpack.c.0.s8 %v351_v29  ;;  %v511_v35 = vunpack.c.1.s8 %v351_v29 }
  0xb2   : > { %2366 = vmatmul.bf16.gmra.mxu0 %v1539_v1  ;;  %v1005_v1 = vcvt.s32.f32 %v493_v58  ;;  %v998_v5 = vcvt.s32.f32 %v486_v60  ;;  %v517_v60 = vunpack.c.2.s8 %v349_v18 }
  0xb3   : > { %2486 = vmatmul.bf16.gmra.mxu3 %v1731_v63  ;;  %v1004_v63 = vcvt.s32.f32 %v492_v55  ;;  %v1015_v43 = vcvt.s32.f32 %v503_v34  ;;  %v1023_v44 = vcvt.s32.f32 %v511_v35  ;;  %v516_v55 = vunpack.c.2.s8 %v348_v16 }
  0xb4   : > { %v1501_v10 = vpack.c.bf16 %v1005_v1, %v997_v0  ;;  %v1502_v14 = vpack.c.bf16 %v1006_v6, %v998_v5  ;;  %v518_v0 = vunpack.c.2.s8 %v350_v19  ;;  %v526_v1 = vunpack.c.3.s8 %v350_v19 }
  0xb5   : > { %v1500_v9 = vpack.c.bf16 %v1004_v63, %v996_v62  ;;  %v1511_v47 = vpack.c.bf16 %v1023_v44, %v1015_v43  ;;  %v4813_v62 = vld [vmem:[#allocation6 + $0x170] sm:$0xff]  ;;  %v1028_v2 = vcvt.s32.f32 %v516_v55  ;;  %v1029_v5 = vcvt.s32.f32 %v517_v60  ;;  %v359_v44 = vld [vmem:[%s5468_s6 + $0xa0] sm:$0xff] }
  0xb6   : > { %3174 = vmatpush.bf16.msra.mxu1 %v4813_v62  ;;  %v1037_v6 = vcvt.s32.f32 %v525_v61  ;;  %v1030_v12 = vcvt.s32.f32 %v518_v0  ;;  %v540_v34 = vunpack.c.1.s8 %v356_v28  ;;  %v535_v55 = vunpack.c.0.s8 %v359_v44 }
  0xb7   : > { %v543_v57 = vunpack.c.1.s8 %v359_v44 }
  0xb8   : > { %v1517_v19 = vpack.c.bf16 %v1037_v6, %v1029_v5  ;;  %v1047_v5 = vcvt.s32.f32 %v535_v55 }
  0xb9   : > { %v1055_v6 = vcvt.s32.f32 %v543_v57 }
  0xc0   : > { %2411 = vmatmul.bf16.gmra.mxu1 %v1611_v21  ;;  %2451 = vmatmul.bf16.gmra.mxu2 %v1675_v22  ;;  %v500_v21 = vunpack.c.0.s8 %v348_v16  ;;  %v508_v22 = vunpack.c.1.s8 %v348_v16 }
  0xc2   : > { %2371 = vmatmul.bf16.gmra.mxu0 %v1547_v26  ;;  %v1012_v30 = vcvt.s32.f32 %v500_v21  ;;  %v1020_v31 = vcvt.s32.f32 %v508_v22 }
  0xc3   : > { %2491 = vmatmul.bf16.gmra.mxu3 %v1739_v25  ;;  %v509_v25 = vunpack.c.1.s8 %v349_v18  ;;  %v1516_v18 = vpack.c.bf16 %v1036_v3, %v1028_v2 }
  0xc4   : > { %v1508_v41 = vpack.c.bf16 %v1020_v31, %v1012_v30  ;;  %v357_v30 = vld [vmem:[%s5468_s6 + $0x90] sm:$0xff]  ;;  %v358_v31 = vld [vmem:[%s5468_s6 + $0x98] sm:$0xff] }
  0xc5   : > { %v1021_v33 = vcvt.s32.f32 %v509_v25  ;;  %v542_v43 = vunpack.c.1.s8 %v358_v31 }
  0xc7   : > { %v1509_v42 = vpack.c.bf16 %v1021_v33, %v1013_v32  ;;  %v532_v33 = vunpack.c.0.s8 %v356_v28  ;;  %v1054_v62 = vcvt.s32.f32 %v542_v43 }
  0xcd   : > { %v5522_v49 = vpop.f32.mrf.mxu1 }
  0xcf   : > { %v5524_v52 = vpop.f32.mrf.mxu0 }
  0xd0   : > { %2505 = vmatmul.bf16.vlgmr.msrb.gmra.mxu1 %v1492_v45  ;;  %2674 = vmatmul.bf16.vlgmr.msrb.gmra.mxu2 %v1493_v46  ;;  %v1510_v46 = vpack.c.bf16 %v1022_v38, %v1014_v37  ;;  %v533_v37 = vunpack.c.0.s8 %v357_v30  ;;  %v541_v38 = vunpack.c.1.s8 %v357_v30 }
  0xd2   : > { %3012 = vmatmul.bf16.vlgmr.msrb.gmra.mxu0 %v1495_v51  ;;  %v4829_v51 = vld [vmem:[#allocation6 + $0x1f0] sm:$0xff] }
  0xd3   : > { %2843 = vmatmul.bf16.vlgmr.msrb.gmra.mxu3 %v1494_v50  ;;  %v5526_v53 = vpop.f32.mrf.mxu2  ;;  %v4821_v50 = vld [vmem:[#allocation6 + $0x1b0] sm:$0xff] }
  0xd4   : > { %3343 = vmatpush.bf16.msra.mxu2 %v4821_v50  ;;  %3512 = vmatpush.bf16.msra.mxu3 %v4829_v51  ;;  %v1045_v50 = vcvt.s32.f32 %v533_v37  ;;  %v1053_v51 = vcvt.s32.f32 %v541_v38  ;;  %v558_v37 = vunpack.c.3.s8 %v358_v31 }
  0xd5   : > { %v5530_v59 = vpop.f32.mrf.mxu1 }
  0xd6   : > { %v5528_v56 = vpop.f32.mrf.mxu3  ;;  %v1525_v3 = vpack.c.bf16 %v1053_v51, %v1045_v50  ;;  %v559_v50 = vunpack.c.3.s8 %v359_v44 }
  0xd7   : > { %6396 = vst [vmem:[#allocation13_spill] sm:$0xff] %v5528_v56  ;;  %v5532_v4 = vpop.f32.mrf.mxu0 }
  0xdb   : > { %v5534_v7 = vpop.f32.mrf.mxu2 }
  0xdd   : > { %v5538_v13 = vpop.f32.mrf.mxu1 }
  0xde   : > { %v5536_v8 = vpop.f32.mrf.mxu3 }
  0xdf   : > { %6397 = vst [vmem:[#allocation14_spill] sm:$0xff] %v5536_v8  ;;  %v5541_v17 = vpop.f32.mrf.mxu0  ;;  %v374_v8 = vld [vmem:[%s5468_s6 + $0x118] sm:$0xff] }
  0xe0   : > { %2510 = vmatmul.bf16.gmra.mxu1 %v1500_v9  ;;  %2679 = vmatmul.bf16.gmra.mxu2 %v1501_v10  ;;  %v519_v9 = vunpack.c.2.s8 %v351_v29  ;;  %v527_v10 = vunpack.c.3.s8 %v351_v29 }
  0xe2   : > { %3017 = vmatmul.bf16.gmra.mxu0 %v1503_v15  ;;  %v1031_v21 = vcvt.s32.f32 %v519_v9  ;;  %v1039_v22 = vcvt.s32.f32 %v527_v10 }
  0xe3   : > { %2848 = vmatmul.bf16.gmra.mxu3 %v1502_v14  ;;  %v5545_v20 = vpop.f32.mrf.mxu2  ;;  %v1038_v14 = vcvt.s32.f32 %v526_v1 }
  0xe4   : > { %v1519_v27 = vpack.c.bf16 %v1039_v22, %v1031_v21  ;;  %v556_v21 = vunpack.c.3.s8 %v356_v28 }
  0xe5   : > { %v5549_v26 = vpop.f32.mrf.mxu1  ;;  %v1518_v25 = vpack.c.bf16 %v1038_v14, %v1030_v12  ;;  %v1527_v12 = vpack.c.bf16 %v1055_v6, %v1047_v5  ;;  %v364_v6 = vld [vmem:[%s5468_s6 + $0xc8] sm:$0xff] }
  0xe6   : > { %v5547_v23 = vpop.f32.mrf.mxu3 }
  0xe7   : > { %6398 = vst [vmem:[#allocation15_spill] sm:$0xff] %v5547_v23  ;;  %v5552_v36 = vpop.f32.mrf.mxu0  ;;  %v588_v23 = vunpack.c.3.s8 %v364_v6 }
  0xeb   : > { %v5554_v39 = vpop.f32.mrf.mxu2 }
  0xed   : > { %v5558_v45 = vpop.f32.mrf.mxu1 }
  0xee   : > { %v5556_v40 = vpop.f32.mrf.mxu3 }
  0xef   : > { %6399 = vst [vmem:[#allocation16_spill] sm:$0xff] %v5556_v40  ;;  %v5560_v48 = vpop.f32.mrf.mxu0  ;;  %v580_v40 = vunpack.c.2.s8 %v364_v6 }
  0xf0   : > { %2515 = vmatmul.bf16.gmra.mxu1 %v1508_v41  ;;  %2684 = vmatmul.bf16.gmra.mxu2 %v1509_v42  ;;  %v534_v42 = vunpack.c.0.s8 %v358_v31 }
  0xf2   : > { %3022 = vmatmul.bf16.gmra.mxu0 %v1511_v47  ;;  %v1052_v47 = vcvt.s32.f32 %v540_v34  ;;  %v1046_v61 = vcvt.s32.f32 %v534_v42  ;;  %v550_v34 = vunpack.c.2.s8 %v358_v31  ;;  %v1068_v42 = vcvt.s32.f32 %v556_v21 }
  0xf3   : > { %2853 = vmatmul.bf16.gmra.mxu3 %v1510_v46  ;;  %v5562_v54 = vpop.f32.mrf.mxu2  ;;  %v1044_v46 = vcvt.s32.f32 %v532_v33 }
  0xf4   : > { %6400 = vst [vmem:[#allocation17_spill] sm:$0xff] %v5562_v54  ;;  %v1526_v10 = vpack.c.bf16 %v1054_v62, %v1046_v61  ;;  %v1062_v55 = vcvt.s32.f32 %v550_v34 }
  0xf5   : > { %v5566_v63 = vpop.f32.mrf.mxu1  ;;  %v1524_v2 = vpack.c.bf16 %v1052_v47, %v1044_v46  ;;  %v551_v47 = vunpack.c.2.s8 %v359_v44 }
  0xf6   : > { %v5564_v58 = vpop.f32.mrf.mxu3 }
  0xf7   : > { %6401 = vst [vmem:[#allocation18_spill] sm:$0xff] %v5564_v58  ;;  %v5568_v11 = vpop.f32.mrf.mxu0  ;;  %v1063_v31 = vcvt.s32.f32 %v551_v47  ;;  %v367_v47 = vld [vmem:[%s5468_s6 + $0xe0] sm:$0xff] }
  0xfb   : > { %v5570_v15 = vpop.f32.mrf.mxu2 }
  0xfc   : > { %6402 = vst [vmem:[#allocation19_spill] sm:$0xff] %v5570_v15 }
  0xfd   : > { %v5574_v24 = vpop.f32.mrf.mxu1 }
  0xfe   : > { %v5572_v16 = vpop.f32.mrf.mxu3 }
  0xff   : > { %6403 = vst [vmem:[#allocation20_spill] sm:$0xff] %v5572_v16  ;;  %v5577_v29 = vpop.f32.mrf.mxu0 }
 0x100   : > { %2520 = vmatmul.bf16.gmra.mxu1 %v1516_v18  ;;  %2689 = vmatmul.bf16.gmra.mxu2 %v1517_v19  ;;  %v548_v19 = vunpack.c.2.s8 %v356_v28  ;;  %v1070_v28 = vcvt.s32.f32 %v558_v37 }
 0x102   : > { %3027 = vmatmul.bf16.gmra.mxu0 %v1519_v27  ;;  %v557_v27 = vunpack.c.3.s8 %v357_v30  ;;  %v1060_v38 = vcvt.s32.f32 %v548_v19  ;;  %v1534_v5 = vpack.c.bf16 %v1070_v28, %v1062_v55  ;;  %v366_v19 = vld [vmem:[%s5468_s6 + $0xd8] sm:$0xff] }
 0x103   : > { %2858 = vmatmul.bf16.gmra.mxu3 %v1518_v25  ;;  %v5581_v32 = vpop.f32.mrf.mxu2  ;;  %v549_v25 = vunpack.c.2.s8 %v357_v30 }
 0x104   : > { %6404 = vst [vmem:[#allocation21_spill] sm:$0xff] %v5581_v32  ;;  %v1069_v46 = vcvt.s32.f32 %v557_v27  ;;  %v1532_v61 = vpack.c.bf16 %v1068_v42, %v1060_v38  ;;  %v572_v27 = vunpack.c.1.s8 %v364_v6 }
 0x105   : > { %v5585_v41 = vpop.f32.mrf.mxu1  ;;  %v1061_v43 = vcvt.s32.f32 %v549_v25  ;;  %v564_v25 = vunpack.c.0.s8 %v364_v6 }
 0x106   : > { %v5583_v35 = vpop.f32.mrf.mxu3  ;;  %v1084_v55 = vcvt.s32.f32 %v572_v27 }
 0x107   : > { %6405 = vst [vmem:[#allocation22_spill] sm:$0xff] %v5583_v35  ;;  %v5588_v60 = vpop.f32.mrf.mxu0  ;;  %v1533_v62 = vpack.c.bf16 %v1069_v46, %v1061_v43  ;;  %v566_v43 = vunpack.c.0.s8 %v366_v19  ;;  %v574_v46 = vunpack.c.1.s8 %v366_v19 }
 0x10b   : > { %v5590_v0 = vpop.f32.mrf.mxu2 }
 0x10c   : > { %6406 = vst [vmem:[#allocation23_spill] sm:$0xff] %v5590_v0 }
 0x10d   : > { %v5594_v9 = vpop.f32.mrf.mxu1 }
 0x10e   : > { %v5592_v1 = vpop.f32.mrf.mxu3 }
 0x10f   : > { %6407 = vst [vmem:[#allocation24_spill] sm:$0xff] %v5592_v1  ;;  %v5596_v14 = vpop.f32.mrf.mxu0 }
 0x110   : > { %2525 = vmatmul.bf16.gmra.mxu1 %v1524_v2  ;;  %2694 = vmatmul.bf16.gmra.mxu2 %v1525_v3  ;;  %v1071_v2 = vcvt.s32.f32 %v559_v50  ;;  %v1076_v50 = vcvt.s32.f32 %v564_v25 }
 0x112   : > { %3032 = vmatmul.bf16.gmra.mxu0 %v1527_v12  ;;  %v1535_v44 = vpack.c.bf16 %v1071_v2, %v1063_v31  ;;  %v365_v12 = vld [vmem:[%s5468_s6 + $0xd0] sm:$0xff]  ;;  %v575_v31 = vunpack.c.1.s8 %v367_v47 }
 0x113   : > { %2863 = vmatmul.bf16.gmra.mxu3 %v1526_v10  ;;  %v5598_v18 = vpop.f32.mrf.mxu2  ;;  %v565_v37 = vunpack.c.0.s8 %v365_v12  ;;  %v573_v38 = vunpack.c.1.s8 %v365_v12 }
 0x114   : > { %6408 = vst [vmem:[#allocation25_spill] sm:$0xff] %v5598_v18  ;;  %v1087_v16 = vcvt.s32.f32 %v575_v31 }
 0x115   : > { %v5602_v33 = vpop.f32.mrf.mxu1  ;;  %v1077_v28 = vcvt.s32.f32 %v565_v37 }
 0x116   : > { %v5600_v22 = vpop.f32.mrf.mxu3 }
 0x117   : > { %6409 = vst [vmem:[#allocation26_spill] sm:$0xff] %v5600_v22  ;;  %v5604_v51 = vpop.f32.mrf.mxu0 }
 0x11b   : > { %v5606_v57 = vpop.f32.mrf.mxu2 }
 0x11c   : > { %6410 = vst [vmem:[#allocation27_spill] sm:$0xff] %v5606_v57 }
 0x11d   : > { %v5610_v3 = vpop.f32.mrf.mxu1 }
 0x11e   : > { %v5608_v30 = vpop.f32.mrf.mxu3 }
 0x11f   : > { %6411 = vst [vmem:[#allocation28_spill] sm:$0xff] %v5608_v30  ;;  %v5613_v10 = vpop.f32.mrf.mxu0  ;;  %v1086_v30 = vcvt.s32.f32 %v574_v46 }
 0x120   : > { %2530 = vmatmul.bf16.gmra.mxu1 %v1532_v61  ;;  %2699 = vmatmul.bf16.gmra.mxu2 %v1533_v62  ;;  %v1085_v61 = vcvt.s32.f32 %v573_v38  ;;  %v567_v62 = vunpack.c.0.s8 %v367_v47  ;;  %v4820_v38 = vld [vmem:[#allocation6 + $0x1a8] sm:$0xff] }
 0x121   : > { %3344 = vmatpush.bf16.msra.mxu2 %v4820_v38 }
 0x122   : > { %3037 = vmatmul.bf16.gmra.mxu0 %v1535_v44  ;;  %v1541_v1 = vpack.c.bf16 %v1085_v61, %v1077_v28  ;;  %v1079_v35 = vcvt.s32.f32 %v567_v62  ;;  %v589_v28 = vunpack.c.3.s8 %v365_v12  ;;  %v1100_v61 = vcvt.s32.f32 %v588_v23 }
 0x123   : > { %2868 = vmatmul.bf16.gmra.mxu3 %v1534_v5  ;;  %v5617_v21 = vpop.f32.mrf.mxu2  ;;  %v1078_v5 = vcvt.s32.f32 %v566_v43  ;;  %v4828_v43 = vld [vmem:[#allocation6 + $0x1e8] sm:$0xff] }
 0x124   : > { %6412 = vst [vmem:[#allocation29_spill] sm:$0xff] %v5617_v21  ;;  %v1543_v27 = vpack.c.bf16 %v1087_v16, %v1079_v35  ;;  %3513 = vmatpush.bf16.msra.mxu3 %v4828_v43  ;;  %v590_v16 = vunpack.c.3.s8 %v366_v19  ;;  %v4812_v35 = vld [vmem:[#allocation6 + $0x168] sm:$0xff]  ;;  %v1101_v31 = vcvt.s32.f32 %v589_v28 }
 0x125   : > { %v5621_v42 = vpop.f32.mrf.mxu1  ;;  %v1542_v25 = vpack.c.bf16 %v1086_v30, %v1078_v5  ;;  %v583_v5 = vunpack.c.2.s8 %v367_v47  ;;  %3175 = vmatpush.bf16.msra.mxu1 %v4812_v35  ;;  %v372_v35 = vld [vmem:[%s5468_s6 + $0x108] sm:$0xff] }
 0x126   : > { %v5619_v34 = vpop.f32.mrf.mxu3 }
 0x127   : > { %6413 = vst [vmem:[#allocation30_spill] sm:$0xff] %v5619_v34  ;;  %v5624_v2 = vpop.f32.mrf.mxu0  ;;  %v1540_v34 = vpack.c.bf16 %v1084_v55, %v1076_v50  ;;  %v581_v55 = vunpack.c.2.s8 %v365_v12 }
 0x129   : > { %v1093_v62 = vcvt.s32.f32 %v581_v55 }
 0x12b   : > { %v5626_v22 = vpop.f32.mrf.mxu2 }
 0x12c   : > { %6414 = vst [vmem:[#allocation31_spill] sm:$0xff] %v5626_v22 }
 0x12d   : > { %v5630_v58 = vpop.f32.mrf.mxu1 }
 0x12e   : > { %v5628_v44 = vpop.f32.mrf.mxu3 }
 0x12f   : > { %6415 = vst [vmem:[#allocation32_spill] sm:$0xff] %v5628_v44  ;;  %v5632_v37 = vpop.f32.mrf.mxu0  ;;  %v4838_v44 = vld [vmem:[#allocation8 + $0x38] sm:$0xff] }
 0x130   : > { %2535 = vmatmul.bf16.gmra.mxu1 %v1540_v34  ;;  %2704 = vmatmul.bf16.gmra.mxu2 %v1541_v1  ;;  %v582_v1 = vunpack.c.2.s8 %v366_v19  ;;  %v1092_v34 = vcvt.s32.f32 %v580_v40  ;;  %v1095_v40 = vcvt.s32.f32 %v583_v5 }
 0x131   : > { %3975 = vmatpush.bf16.msra.mxu0 %v4838_v44 }
 0x132   : > { %3042 = vmatmul.bf16.gmra.mxu0 %v1543_v27  ;;  %v1094_v38 = vcvt.s32.f32 %v582_v1  ;;  %v1102_v27 = vcvt.s32.f32 %v590_v16  ;;  %v1548_v19 = vpack.c.bf16 %v1100_v61, %v1092_v34  ;;  %v373_v16 = vld [vmem:[%s5468_s6 + $0x110] sm:$0xff]  ;;  %v596_v34 = vunpack.c.0.s8 %v372_v35 }
 0x133   : > { %2873 = vmatmul.bf16.gmra.mxu3 %v1542_v25  ;;  %v5634_v46 = vpop.f32.mrf.mxu2  ;;  %v591_v25 = vunpack.c.3.s8 %v367_v47  ;;  %v604_v61 = vunpack.c.1.s8 %v372_v35  ;;  %v605_v5 = vunpack.c.1.s8 %v373_v16  ;;  %v613_v15 = vunpack.c.2.s8 %v373_v16 }
 0x134   : > { %6416 = vst [vmem:[#allocation33_spill] sm:$0xff] %v5634_v46  ;;  %v1550_v28 = vpack.c.bf16 %v1102_v27, %v1094_v38  ;;  %v606_v38 = vunpack.c.1.s8 %v374_v8  ;;  %v375_v27 = vld [vmem:[%s5468_s6 + $0x120] sm:$0xff] }
 0x135   : > { %v5638_v30 = vpop.f32.mrf.mxu1  ;;  %v1103_v23 = vcvt.s32.f32 %v591_v25  ;;  %v598_v25 = vunpack.c.0.s8 %v374_v8 }
 0x136   : > { %v5636_v50 = vpop.f32.mrf.mxu3  ;;  %v1118_v44 = vcvt.s32.f32 %v606_v38  ;;  %v620_v38 = vunpack.c.3.s8 %v372_v35 }
 0x137   : > { %6417 = vst [vmem:[#allocation34_spill] sm:$0xff] %v5636_v50  ;;  %v5640_v6 = vpop.f32.mrf.mxu0  ;;  %v1549_v50 = vpack.c.bf16 %v1101_v31, %v1093_v62  ;;  %v1551_v47 = vpack.c.bf16 %v1103_v23, %v1095_v40  ;;  %v597_v31 = vunpack.c.0.s8 %v373_v16  ;;  %v1116_v40 = vcvt.s32.f32 %v604_v61 }
 0x138   : > { %v1110_v46 = vcvt.s32.f32 %v598_v25  ;;  %v612_v25 = vunpack.c.2.s8 %v372_v35 }
 0x139   : > { %v1109_v23 = vcvt.s32.f32 %v597_v31 }
 0x13a   : > { %v1558_v32 = vpack.c.bf16 %v1118_v44, %v1110_v46  ;;  %v1124_v46 = vcvt.s32.f32 %v612_v25 }
 0x13b   : > { %v5642_v43 = vpop.f32.mrf.mxu2 }
 0x13c   : > { %6418 = vst [vmem:[#allocation35_spill] sm:$0xff] %v5642_v43  ;;  %v607_v43 = vunpack.c.1.s8 %v375_v27 }
 0x13d   : > { %v5646_v55 = vpop.f32.mrf.mxu1 }
 0x13e   : > { %v5644_v12 = vpop.f32.mrf.mxu3  ;;  %v1119_v18 = vcvt.s32.f32 %v607_v43  ;;  %v622_v43 = vunpack.c.3.s8 %v374_v8 }
 0x13f   : > { %6419 = vst [vmem:[#allocation36_spill] sm:$0xff] %v5644_v12  ;;  %v5649_v1 = vpop.f32.mrf.mxu0  ;;  %v599_v12 = vunpack.c.0.s8 %v375_v27 }
 0x140   : > { %2540 = vmatmul.bf16.gmra.mxu1 %v1548_v19  ;;  %2709 = vmatmul.bf16.gmra.mxu2 %v1549_v50  ;;  %v1108_v19 = vcvt.s32.f32 %v596_v34  ;;  %v1134_v35 = vcvt.s32.f32 %v622_v43  ;;  %v5680_v43 = vld [vmem:[%s5468_s6 + $0x158] sm:$0xff] }
 0x141   : > { %v1111_v57 = vcvt.s32.f32 %v599_v12  ;;  %v614_v12 = vunpack.c.2.s8 %v374_v8 }
 0x142   : > { %3047 = vmatmul.bf16.gmra.mxu0 %v1551_v47 }
 0x143   : > { %2878 = vmatmul.bf16.gmra.mxu3 %v1550_v28  ;;  %v5653_v56 = vpop.f32.mrf.mxu2  ;;  %v1117_v28 = vcvt.s32.f32 %v605_v5  ;;  %v1559_v61 = vpack.c.bf16 %v1119_v18, %v1111_v57  ;;  %v623_v57 = vunpack.c.3.s8 %v375_v27 }
 0x144   : > { %6420 = vst [vmem:[#allocation37_spill] sm:$0xff] %v5653_v56 }
 0x145   : > { %v5657_v50 = vpop.f32.mrf.mxu1  ;;  %v1557_v21 = vpack.c.bf16 %v1117_v28, %v1109_v23  ;;  %v1132_v28 = vcvt.s32.f32 %v620_v38 }
 0x146   : > { %v5655_v62 = vpop.f32.mrf.mxu3 }
 0x147   : > { %6421 = vst [vmem:[#allocation38_spill] sm:$0xff] %v5655_v62  ;;  %v5660_v56 = vpop.f32.mrf.mxu0  ;;  %v1556_v62 = vpack.c.bf16 %v1116_v40, %v1108_v19  ;;  %v621_v19 = vunpack.c.3.s8 %v373_v16  ;;  %v1564_v16 = vpack.c.bf16 %v1132_v28, %v1124_v46 }
 0x149   : > { %v1133_v18 = vcvt.s32.f32 %v621_v19  ;;  %v5674_v19 = vld [vmem:[%s5468_s6 + $0x148] sm:$0xff] }
 0x14a   : > { %v628_v46 = vunpack.c.0.s8 %v5674_v19  ;;  %v636_v28 = vunpack.c.1.s8 %v5674_v19 }
 0x14b   : > { %v5662_v22 = vpop.f32.mrf.mxu2 }
 0x14c   : > { %6422 = vst [vmem:[#allocation39_spill] sm:$0xff] %v5662_v22 }
 0x14d   : > { %v2506_v0 = vpop.f32.mrf.mxu1 }
 0x14e   : > { %v5664_v47 = vpop.f32.mrf.mxu3  ;;  %v2507_v34 = vadd.f32 %v2506_v0, %v5524_v52  ;;  %v1125_v52 = vcvt.s32.f32 %v613_v15  ;;  %v1135_v15 = vcvt.s32.f32 %v623_v57 }
 0x14f   : > { %v3013_v31 = vpop.f32.mrf.mxu0 }
 0x150   : > { %2545 = vmatmul.bf16.gmra.mxu1 %v1556_v62  ;;  %2714 = vmatmul.bf16.gmra.mxu2 %v1557_v21  ;;  %v1126_v62 = vcvt.s32.f32 %v614_v12 }
 0x152   : > { %3052 = vmatmul.bf16.gmra.mxu0 %v1559_v61 }
 0x153   : > { %2883 = vmatmul.bf16.gmra.mxu3 %v1558_v32  ;;  %v2675_v5 = vpop.f32.mrf.mxu2  ;;  %v615_v32 = vunpack.c.2.s8 %v375_v27 }
 0x154   : > { %v2676_v22 = vadd.f32 %v2675_v5, %v2507_v34  ;;  %v1566_v5 = vpack.c.bf16 %v1134_v35, %v1126_v62  ;;  %v638_v62 = vunpack.c.1.s8 %v5680_v43  ;;  %v5689_v35 = vld [vmem:[%s5468_s6 + $0x160] sm:$0xff] }
 0x155   : > { %v2508_v40 = vpop.f32.mrf.mxu1 }
 0x156   : > { %v2844_v54 = vpop.f32.mrf.mxu3  ;;  %v2509_v44 = vadd.f32 %v2508_v40, %v5532_v4  ;;  %v5677_v40 = vld [vmem:[%s5468_s6 + $0x150] sm:$0xff] }
 0x157   : > { %v2845_v23 = vadd.f32 %v2844_v54, %v2676_v22  ;;  %v3015_v21 = vpop.f32.mrf.mxu0  ;;  %v1565_v54 = vpack.c.bf16 %v1133_v18, %v1125_v52  ;;  %v1127_v22 = vcvt.s32.f32 %v615_v32  ;;  %v637_v32 = vunpack.c.1.s8 %v5677_v40 }
 0x159   : > { %v5667_v0 = vadd.f32 %v3013_v31, %v2845_v23  ;;  %v1567_v4 = vpack.c.bf16 %v1135_v15, %v1127_v22  ;;  %v631_v22 = vunpack.c.0.s8 %v5689_v35  ;;  %v639_v15 = vunpack.c.1.s8 %v5689_v35 }
 0x15b   : > { %6423 = vst [vmem:[#allocation40_spill] sm:$0xff] %v5667_v0  ;;  %v2677_v34 = vpop.f32.mrf.mxu2 }
 0x15c   : > { %v2678_v61 = vadd.f32 %v2677_v34, %v2509_v44  ;;  %v1140_v34 = vcvt.s32.f32 %v628_v46  ;;  %v1143_v46 = vcvt.s32.f32 %v631_v22 }
 0x15d   : > { %v2511_v31 = vpop.f32.mrf.mxu1 }
 0x15e   : > { %v2846_v8 = vpop.f32.mrf.mxu3  ;;  %v2512_v27 = vadd.f32 %v2511_v31, %v5541_v17  ;;  %v629_v17 = vunpack.c.0.s8 %v5677_v40 }
 0x15f   : > { %v2847_v25 = vadd.f32 %v2846_v8, %v2678_v61  ;;  %v3018_v12 = vpop.f32.mrf.mxu0 }
 0x160   : > { %2550 = vmatmul.bf16.gmra.mxu1 %v1564_v16  ;;  %2719 = vmatmul.bf16.gmra.mxu2 %v1565_v54  ;;  %v1148_v16 = vcvt.s32.f32 %v636_v28  ;;  %v1141_v61 = vcvt.s32.f32 %v629_v17  ;;  %v1149_v54 = vcvt.s32.f32 %v637_v32  ;;  %v1151_v28 = vcvt.s32.f32 %v639_v15 }
 0x161   : > { %v5671_v38 = vadd.f32 %v3015_v21, %v2847_v25  ;;  %v630_v21 = vunpack.c.0.s8 %v5680_v43  ;;  %v1150_v25 = vcvt.s32.f32 %v638_v62  ;;  %v646_v15 = vunpack.c.2.s8 %v5680_v43 }
 0x162   : > { %3057 = vmatmul.bf16.gmra.mxu0 %v1567_v4 }
 0x163   : > { %6424 = vst [vmem:[#allocation41_spill] sm:$0xff] %v5671_v38  ;;  %2888 = vmatmul.bf16.gmra.mxu3 %v1566_v5  ;;  %v2680_v23 = vpop.f32.mrf.mxu2  ;;  %v1142_v5 = vcvt.s32.f32 %v630_v21  ;;  %v1575_v21 = vpack.c.bf16 %v1151_v28, %v1143_v46  ;;  %v647_v46 = vunpack.c.2.s8 %v5689_v35  ;;  %v655_v28 = vunpack.c.3.s8 %v5689_v35 }
 0x164   : > { %v2681_v52 = vadd.f32 %v2680_v23, %v2512_v27  ;;  %v1572_v23 = vpack.c.bf16 %v1148_v16, %v1140_v34  ;;  %v644_v16 = vunpack.c.2.s8 %v5674_v19 }
 0x165   : > { %v2513_v57 = vpop.f32.mrf.mxu1 }
 0x166   : > { %v2849_v18 = vpop.f32.mrf.mxu3  ;;  %v2514_v27 = vadd.f32 %v2513_v57, %v5552_v36  ;;  %v4819_v36 = vld [vmem:[#allocation6 + $0x1a0] sm:$0xff] }
 0x167   : > { %v2850_v44 = vadd.f32 %v2849_v18, %v2681_v52  ;;  %v3020_v31 = vpop.f32.mrf.mxu0  ;;  %v1573_v52 = vpack.c.bf16 %v1149_v54, %v1141_v61  ;;  %v4827_v57 = vld [vmem:[#allocation6 + $0x1e0] sm:$0xff]  ;;  %v652_v61 = vunpack.c.3.s8 %v5674_v19  ;;  %v645_v54 = vunpack.c.2.s8 %v5677_v40  ;;  %3345 = vmatpush.bf16.msra.mxu2 %v4819_v36 }
 0x168   : > { %3514 = vmatpush.bf16.msra.mxu3 %v4827_v57 }
 0x169   : > { %v5691_v8 = vadd.f32 %v3018_v12, %v2850_v44  ;;  %v1574_v12 = vpack.c.bf16 %v1150_v25, %v1142_v5  ;;  %v4811_v25 = vld [vmem:[#allocation6 + $0x160] sm:$0xff] }
 0x16a   : > { %3176 = vmatpush.bf16.msra.mxu1 %v4811_v25 }
 0x16b   : > { %v2682_v4 = vpop.f32.mrf.mxu2 }
 0x16c   : > { %v2683_v38 = vadd.f32 %v2682_v4, %v2514_v27  ;;  %v1156_v27 = vcvt.s32.f32 %v644_v16  ;;  %v1164_v4 = vcvt.s32.f32 %v652_v61 }
 0x16d   : > { %v2516_v17 = vpop.f32.mrf.mxu1 }
 0x16e   : > { %v2851_v0 = vpop.f32.mrf.mxu3  ;;  %v2517_v32 = vadd.f32 %v2516_v17, %v5560_v48 }
 0x16f   : > { %v2852_v18 = vadd.f32 %v2851_v0, %v2683_v38  ;;  %v3023_v62 = vpop.f32.mrf.mxu0  ;;  %v653_v38 = vunpack.c.3.s8 %v5677_v40  ;;  %v1158_v40 = vcvt.s32.f32 %v646_v15  ;;  %v4837_v15 = vld [vmem:[#allocation8 + $0x30] sm:$0xff] }
 0x170   : > { %2555 = vmatmul.bf16.gmra.mxu1 %v1572_v23  ;;  %2724 = vmatmul.bf16.gmra.mxu2 %v1573_v52  ;;  %v1157_v23 = vcvt.s32.f32 %v645_v54 }
 0x171   : > { %v5697_v44 = vadd.f32 %v3020_v31, %v2852_v18  ;;  %v654_v31 = vunpack.c.3.s8 %v5680_v43  ;;  %v1165_v52 = vcvt.s32.f32 %v653_v38  ;;  %v5715_v38 = vld [vmem:[%s5468_s6 + $0x190] sm:$0xff]  ;;  %3976 = vmatpush.bf16.msra.mxu0 %v4837_v15 }
 0x172   : > { %3062 = vmatmul.bf16.gmra.mxu0 %v1575_v21 }
 0x173   : > { %2893 = vmatmul.bf16.gmra.mxu3 %v1574_v12  ;;  %v2685_v34 = vpop.f32.mrf.mxu2  ;;  %v1166_v12 = vcvt.s32.f32 %v654_v31  ;;  %v1581_v57 = vpack.c.bf16 %v1165_v52, %v1157_v23  ;;  %v5718_v31 = vld [vmem:[%s5468_s6 + $0x198] sm:$0xff]  ;;  %v669_v52 = vunpack.c.1.s8 %v5715_v38 }
 0x174   : > { %v2686_v0 = vadd.f32 %v2685_v34, %v2517_v32  ;;  %v1580_v32 = vpack.c.bf16 %v1164_v4, %v1156_v27  ;;  %v1167_v34 = vcvt.s32.f32 %v655_v28  ;;  %v661_v4 = vunpack.c.0.s8 %v5715_v38 }
 0x175   : > { %v2518_v22 = vpop.f32.mrf.mxu1  ;;  %v1582_v61 = vpack.c.bf16 %v1166_v12, %v1158_v40  ;;  %v662_v28 = vunpack.c.0.s8 %v5718_v31  ;;  %v391_v40 = vld [vmem:[%s5468_s6 + $0x1a0] sm:$0xff] }
 0x176   : > { %v2854_v48 = vpop.f32.mrf.mxu3  ;;  %v2519_v18 = vadd.f32 %v2518_v22, %v5568_v11 }
 0x177   : > { %v2855_v5 = vadd.f32 %v2854_v48, %v2686_v0  ;;  %v3025_v17 = vpop.f32.mrf.mxu0  ;;  %v388_v48 = vld [vmem:[%s5468_s6 + $0x188] sm:$0xff] }
 0x178   : > { %v660_v25 = vunpack.c.0.s8 %v388_v48  ;;  %v668_v27 = vunpack.c.1.s8 %v388_v48 }
 0x179   : > { %v5705_v19 = vadd.f32 %v3023_v62, %v2855_v5  ;;  %v1159_v62 = vcvt.s32.f32 %v647_v46 }
 0x17b   : > { %6425 = vst [vmem:[#allocation42_spill] sm:$0xff] %v5705_v19  ;;  %v2687_v43 = vpop.f32.mrf.mxu2  ;;  %v1583_v11 = vpack.c.bf16 %v1167_v34, %v1159_v62  ;;  %v671_v62 = vunpack.c.1.s8 %v391_v40 }
 0x17c   : > { %v2688_v21 = vadd.f32 %v2687_v43, %v2519_v18  ;;  %v1172_v18 = vcvt.s32.f32 %v660_v25  ;;  %v1180_v43 = vcvt.s32.f32 %v668_v27 }
 0x17d   : > { %v2521_v16 = vpop.f32.mrf.mxu1 }
 0x17e   : > { %v2856_v36 = vpop.f32.mrf.mxu3  ;;  %v2522_v35 = vadd.f32 %v2521_v16, %v5577_v29  ;;  %v1174_v16 = vcvt.s32.f32 %v662_v28 }
 0x17f   : > { %v2857_v54 = vadd.f32 %v2856_v36, %v2688_v21  ;;  %v3028_v22 = vpop.f32.mrf.mxu0  ;;  %v1181_v36 = vcvt.s32.f32 %v669_v52 }
 0x180   : > { %2560 = vmatmul.bf16.gmra.mxu1 %v1580_v32  ;;  %2729 = vmatmul.bf16.gmra.mxu2 %v1581_v57  ;;  %v1173_v32 = vcvt.s32.f32 %v661_v4  ;;  %v663_v57 = vunpack.c.0.s8 %v391_v40 }
 0x181   : > { %v5711_v0 = vadd.f32 %v3025_v17, %v2857_v54  ;;  %v670_v17 = vunpack.c.1.s8 %v5718_v31 }
 0x182   : > { %3067 = vmatmul.bf16.gmra.mxu0 %v1583_v11  ;;  %v1588_v11 = vpack.c.bf16 %v1180_v43, %v1172_v18  ;;  %v1175_v19 = vcvt.s32.f32 %v663_v57  ;;  %v686_v57 = vunpack.c.3.s8 %v5718_v31 }
 0x183   : > { %6426 = vst [vmem:[#allocation43_spill] sm:$0xff] %v5711_v0  ;;  %2898 = vmatmul.bf16.gmra.mxu3 %v1582_v61  ;;  %v2690_v5 = vpop.f32.mrf.mxu2  ;;  %v1182_v61 = vcvt.s32.f32 %v670_v17  ;;  %v1589_v0 = vpack.c.bf16 %v1181_v36, %v1173_v32  ;;  %v684_v17 = vunpack.c.3.s8 %v388_v48  ;;  %v685_v32 = vunpack.c.3.s8 %v5715_v38 }
 0x184   : > { %v2691_v29 = vadd.f32 %v2690_v5, %v2522_v35 }
 0x185   : > { %v2523_v46 = vpop.f32.mrf.mxu1  ;;  %v1590_v27 = vpack.c.bf16 %v1182_v61, %v1174_v16  ;;  %v1197_v61 = vcvt.s32.f32 %v685_v32 }
 0x186   : > { %v2859_v23 = vpop.f32.mrf.mxu3  ;;  %v2524_v54 = vadd.f32 %v2523_v46, %v5588_v60  ;;  %v676_v46 = vunpack.c.2.s8 %v388_v48  ;;  %v679_v48 = vunpack.c.2.s8 %v391_v40 }
 0x187   : > { %v2860_v12 = vadd.f32 %v2859_v23, %v2691_v29  ;;  %v3030_v34 = vpop.f32.mrf.mxu0  ;;  %v1183_v29 = vcvt.s32.f32 %v671_v62 }
 0x189   : > { %v5725_v21 = vadd.f32 %v3028_v22, %v2860_v12  ;;  %v1591_v52 = vpack.c.bf16 %v1183_v29, %v1175_v19  ;;  %v677_v12 = vunpack.c.2.s8 %v5715_v38  ;;  %v1196_v19 = vcvt.s32.f32 %v684_v17  ;;  %v5742_v17 = vld [vmem:[%s5468_s6 + $0x1c8] sm:$0xff] }
 0x18b   : > { %v2692_v35 = vpop.f32.mrf.mxu2 }
 0x18c   : > { %v2693_v15 = vadd.f32 %v2692_v35, %v2524_v54  ;;  %v687_v54 = vunpack.c.3.s8 %v391_v40 }
 0x18d   : > { %v2526_v25 = vpop.f32.mrf.mxu1 }
 0x18e   : > { %v2861_v5 = vpop.f32.mrf.mxu3  ;;  %v2527_v22 = vadd.f32 %v2526_v25, %v5596_v14  ;;  %v678_v14 = vunpack.c.2.s8 %v5718_v31 }
 0x18f   : > { %v2862_v4 = vadd.f32 %v2861_v5, %v2693_v15  ;;  %v3033_v28 = vpop.f32.mrf.mxu0  ;;  %v1198_v15 = vcvt.s32.f32 %v686_v57 }
 0x190   : > { %2565 = vmatmul.bf16.gmra.mxu1 %v1588_v11  ;;  %2734 = vmatmul.bf16.gmra.mxu2 %v1589_v0  ;;  %v1188_v0 = vcvt.s32.f32 %v676_v46  ;;  %v1190_v11 = vcvt.s32.f32 %v678_v14  ;;  %v700_v14 = vunpack.c.1.s8 %v5742_v17 }
 0x191   : > { %v5729_v23 = vadd.f32 %v3030_v34, %v2862_v4  ;;  %v1189_v34 = vcvt.s32.f32 %v677_v12  ;;  %v1191_v4 = vcvt.s32.f32 %v679_v48  ;;  %v5745_v12 = vld [vmem:[%s5468_s6 + $0x1d0] sm:$0xff]  ;;  %v5757_v48 = vld [vmem:[%s5468_s6 + $0x1e0] sm:$0xff] }
 0x192   : > { %3072 = vmatmul.bf16.gmra.mxu0 %v1591_v52  ;;  %v1596_v29 = vpack.c.bf16 %v1196_v19, %v1188_v0  ;;  %v701_v0 = vunpack.c.1.s8 %v5745_v12 }
 0x193   : > { %2903 = vmatmul.bf16.gmra.mxu3 %v1590_v27  ;;  %v2695_v60 = vpop.f32.mrf.mxu2  ;;  %v1597_v27 = vpack.c.bf16 %v1197_v61, %v1189_v34 }
 0x194   : > { %v2696_v18 = vadd.f32 %v2695_v60, %v2527_v22  ;;  %v1199_v22 = vcvt.s32.f32 %v687_v54 }
 0x195   : > { %v2528_v36 = vpop.f32.mrf.mxu1 }
 0x196   : > { %v2864_v43 = vpop.f32.mrf.mxu3  ;;  %v2529_v5 = vadd.f32 %v2528_v36, %v5604_v51  ;;  %v1599_v51 = vpack.c.bf16 %v1199_v22, %v1191_v4  ;;  %v692_v36 = vunpack.c.0.s8 %v5742_v17 }
 0x197   : > { %v2865_v62 = vadd.f32 %v2864_v43, %v2696_v18  ;;  %v3035_v35 = vpop.f32.mrf.mxu0  ;;  %v5748_v43 = vld [vmem:[%s5468_s6 + $0x1d8] sm:$0xff] }
 0x198   : > { %v694_v34 = vunpack.c.0.s8 %v5748_v43  ;;  %v702_v61 = vunpack.c.1.s8 %v5748_v43 }
 0x199   : > { %v5735_v16 = vadd.f32 %v3033_v28, %v2865_v62  ;;  %v1598_v28 = vpack.c.bf16 %v1198_v15, %v1190_v11  ;;  %v1212_v11 = vcvt.s32.f32 %v700_v14 }
 0x19a   : > { %v1214_v4 = vcvt.s32.f32 %v702_v61 }
 0x19b   : > { %v2697_v38 = vpop.f32.mrf.mxu2 }
 0x19c   : > { %v2698_v25 = vadd.f32 %v2697_v38, %v2529_v5  ;;  %v1213_v38 = vcvt.s32.f32 %v701_v0 }
 0x19d   : > { %v2531_v52 = vpop.f32.mrf.mxu1 }
 0x19e   : > { %v2866_v31 = vpop.f32.mrf.mxu3  ;;  %v2532_v40 = vadd.f32 %v2531_v52, %v5613_v10  ;;  %v693_v10 = vunpack.c.0.s8 %v5745_v12 }
 0x19f   : > { %v2867_v60 = vadd.f32 %v2866_v31, %v2698_v25  ;;  %v3038_v18 = vpop.f32.mrf.mxu0  ;;  %v703_v25 = vunpack.c.1.s8 %v5757_v48 }
 0x1a0   : > { %2570 = vmatmul.bf16.gmra.mxu1 %v1596_v29  ;;  %2739 = vmatmul.bf16.gmra.mxu2 %v1597_v27  ;;  %v1205_v15 = vcvt.s32.f32 %v693_v10  ;;  %v695_v29 = vunpack.c.0.s8 %v5757_v48  ;;  %v1206_v27 = vcvt.s32.f32 %v694_v34 }
 0x1a1   : > { %v5739_v46 = vadd.f32 %v3035_v35, %v2867_v60  ;;  %v1204_v35 = vcvt.s32.f32 %v692_v36  ;;  %v1215_v36 = vcvt.s32.f32 %v703_v25  ;;  %v710_v25 = vunpack.c.2.s8 %v5748_v43 }
 0x1a2   : > { %3077 = vmatmul.bf16.gmra.mxu0 %v1599_v51  ;;  %v1605_v51 = vpack.c.bf16 %v1213_v38, %v1205_v15  ;;  %v717_v38 = vunpack.c.3.s8 %v5745_v12 }
 0x1a3   : > { %2908 = vmatmul.bf16.gmra.mxu3 %v1598_v28  ;;  %v2700_v32 = vpop.f32.mrf.mxu2  ;;  %v1604_v28 = vpack.c.bf16 %v1212_v11, %v1204_v35  ;;  %v716_v35 = vunpack.c.3.s8 %v5742_v17  ;;  %v709_v11 = vunpack.c.2.s8 %v5745_v12  ;;  %v1222_v12 = vcvt.s32.f32 %v710_v25 }
 0x1a4   : > { %v2701_v57 = vadd.f32 %v2700_v32, %v2532_v40  ;;  %v1207_v32 = vcvt.s32.f32 %v695_v29 }
 0x1a5   : > { %v2533_v19 = vpop.f32.mrf.mxu1 }
 0x1a6   : > { %v2869_v62 = vpop.f32.mrf.mxu3  ;;  %v2534_v22 = vadd.f32 %v2533_v19, %v5624_v2  ;;  %v1607_v0 = vpack.c.bf16 %v1215_v36, %v1207_v32  ;;  %v4818_v2 = vld [vmem:[#allocation6 + $0x198] sm:$0xff] }
 0x1a7   : > { %v2870_v54 = vadd.f32 %v2869_v62, %v2701_v57  ;;  %v3040_v31 = vpop.f32.mrf.mxu0  ;;  %v4826_v19 = vld [vmem:[#allocation6 + $0x1d8] sm:$0xff]  ;;  %3346 = vmatpush.bf16.msra.mxu2 %v4818_v2 }
 0x1a8   : > { %3515 = vmatpush.bf16.msra.mxu3 %v4826_v19 }
 0x1a9   : > { %v5759_v5 = vadd.f32 %v3038_v18, %v2870_v54  ;;  %v1606_v18 = vpack.c.bf16 %v1214_v4, %v1206_v27  ;;  %v708_v54 = vunpack.c.2.s8 %v5742_v17  ;;  %v4810_v4 = vld [vmem:[#allocation6 + $0x158] sm:$0xff] }
 0x1aa   : > { %3177 = vmatpush.bf16.msra.mxu1 %v4810_v4 }
 0x1ab   : > { %v2702_v52 = vpop.f32.mrf.mxu2 }
 0x1ac   : > { %v2703_v60 = vadd.f32 %v2702_v52, %v2534_v22  ;;  %v1220_v22 = vcvt.s32.f32 %v708_v54  ;;  %v1228_v52 = vcvt.s32.f32 %v716_v35 }
 0x1ad   : > { %v2536_v14 = vpop.f32.mrf.mxu1 }
 0x1ae   : > { %v2871_v40 = vpop.f32.mrf.mxu3  ;;  %v2537_v57 = vadd.f32 %v2536_v14, %v5632_v37 }
 0x1af   : > { %v2872_v10 = vadd.f32 %v2871_v40, %v2703_v60  ;;  %v3043_v34 = vpop.f32.mrf.mxu0  ;;  %v1229_v60 = vcvt.s32.f32 %v717_v38  ;;  %v711_v40 = vunpack.c.2.s8 %v5757_v48  ;;  %v4836_v38 = vld [vmem:[#allocation8 + $0x28] sm:$0xff] }
 0x1b0   : > { %2575 = vmatmul.bf16.gmra.mxu1 %v1604_v28  ;;  %2744 = vmatmul.bf16.gmra.mxu2 %v1605_v51  ;;  %v1221_v28 = vcvt.s32.f32 %v709_v11  ;;  %v719_v51 = vunpack.c.3.s8 %v5757_v48  ;;  %v404_v11 = vld [vmem:[%s5468_s6 + $0x208] sm:$0xff] }
 0x1b1   : > { %v5765_v62 = vadd.f32 %v3040_v31, %v2872_v10  ;;  %v718_v31 = vunpack.c.3.s8 %v5748_v43  ;;  %3977 = vmatpush.bf16.msra.mxu0 %v4836_v38 }
 0x1b2   : > { %3082 = vmatmul.bf16.gmra.mxu0 %v1607_v0  ;;  %v1613_v0 = vpack.c.bf16 %v1229_v60, %v1221_v28  ;;  %v1231_v2 = vcvt.s32.f32 %v719_v51  ;;  %v407_v51 = vld [vmem:[%s5468_s6 + $0x220] sm:$0xff] }
 0x1b3   : > { %2913 = vmatmul.bf16.gmra.mxu3 %v1606_v18  ;;  %v2705_v61 = vpop.f32.mrf.mxu2  ;;  %v1230_v36 = vcvt.s32.f32 %v718_v31  ;;  %v1612_v18 = vpack.c.bf16 %v1228_v52, %v1220_v22  ;;  %v724_v31 = vunpack.c.0.s8 %v404_v11 }
 0x1b4   : > { %v2706_v15 = vadd.f32 %v2705_v61, %v2537_v57 }
 0x1b5   : > { %v2538_v29 = vpop.f32.mrf.mxu1  ;;  %v1614_v61 = vpack.c.bf16 %v1230_v36, %v1222_v12  ;;  %v1236_v12 = vcvt.s32.f32 %v724_v31 }
 0x1b6   : > { %v2874_v37 = vpop.f32.mrf.mxu3  ;;  %v2539_v14 = vadd.f32 %v2538_v29, %v5640_v6  ;;  %v5786_v29 = vld [vmem:[%s5468_s6 + $0x218] sm:$0xff] }
 0x1b7   : > { %v2875_v27 = vadd.f32 %v2874_v37, %v2706_v15  ;;  %v3045_v32 = vpop.f32.mrf.mxu0  ;;  %v5783_v15 = vld [vmem:[%s5468_s6 + $0x210] sm:$0xff]  ;;  %v726_v60 = vunpack.c.0.s8 %v5786_v29 }
 0x1b8   : > { %v725_v4 = vunpack.c.0.s8 %v5783_v15  ;;  %v733_v52 = vunpack.c.1.s8 %v5783_v15 }
 0x1b9   : > { %v5773_v17 = vadd.f32 %v3043_v34, %v2875_v27  ;;  %v1223_v34 = vcvt.s32.f32 %v711_v40  ;;  %v732_v27 = vunpack.c.1.s8 %v404_v11  ;;  %v734_v40 = vunpack.c.1.s8 %v5786_v29 }
 0x1bb   : > { %v2707_v43 = vpop.f32.mrf.mxu2  ;;  %v1615_v6 = vpack.c.bf16 %v1231_v2, %v1223_v34  ;;  %v1244_v36 = vcvt.s32.f32 %v732_v27  ;;  %v1238_v34 = vcvt.s32.f32 %v726_v60  ;;  %v1246_v2 = vcvt.s32.f32 %v734_v40 }
 0x1bc   : > { %v2708_v10 = vadd.f32 %v2707_v43, %v2539_v14  ;;  %v1237_v14 = vcvt.s32.f32 %v725_v4  ;;  %v748_v40 = vunpack.c.3.s8 %v404_v11 }
 0x1bd   : > { %v2541_v19 = vpop.f32.mrf.mxu1  ;;  %v1622_v27 = vpack.c.bf16 %v1246_v2, %v1238_v34 }
 0x1be   : > { %v2876_v57 = vpop.f32.mrf.mxu3  ;;  %v2542_v48 = vadd.f32 %v2541_v19, %v5649_v1  ;;  %v1260_v2 = vcvt.s32.f32 %v748_v40  ;;  %v5809_v40 = vld [vmem:[%s5468_s6 + $0x248] sm:$0xff] }
 0x1bf   : > { %v2877_v54 = vadd.f32 %v2876_v57, %v2708_v10  ;;  %v3048_v37 = vpop.f32.mrf.mxu0  ;;  %v727_v10 = vunpack.c.0.s8 %v407_v51  ;;  %v735_v57 = vunpack.c.1.s8 %v407_v51 }
 0x1c0   : > { %2580 = vmatmul.bf16.gmra.mxu1 %v1612_v18  ;;  %2749 = vmatmul.bf16.gmra.mxu2 %v1613_v0  ;;  %v1245_v18 = vcvt.s32.f32 %v733_v52 }
 0x1c1   : > { %v5779_v35 = vadd.f32 %v3045_v32, %v2877_v54  ;;  %v1620_v54 = vpack.c.bf16 %v1244_v36, %v1236_v12 }
 0x1c2   : > { %3087 = vmatmul.bf16.gmra.mxu0 %v1615_v6  ;;  %v1621_v38 = vpack.c.bf16 %v1245_v18, %v1237_v14  ;;  %v749_v14 = vunpack.c.3.s8 %v5783_v15 }
 0x1c3   : > { %2918 = vmatmul.bf16.gmra.mxu3 %v1614_v61  ;;  %v2710_v25 = vpop.f32.mrf.mxu2 }
 0x1c4   : > { %v2711_v1 = vadd.f32 %v2710_v25, %v2542_v48  ;;  %v1239_v25 = vcvt.s32.f32 %v727_v10  ;;  %v742_v10 = vunpack.c.2.s8 %v5786_v29 }
 0x1c5   : > { %v2543_v28 = vpop.f32.mrf.mxu1 }
 0x1c6   : > { %v2879_v22 = vpop.f32.mrf.mxu3  ;;  %v2544_v19 = vadd.f32 %v2543_v28, %v5660_v56  ;;  %v740_v28 = vunpack.c.2.s8 %v404_v11  ;;  %v743_v11 = vunpack.c.2.s8 %v407_v51 }
 0x1c7   : > { %v2880_v32 = vadd.f32 %v2879_v22, %v2711_v1  ;;  %v3050_v0 = vpop.f32.mrf.mxu0  ;;  %v1247_v1 = vcvt.s32.f32 %v735_v57  ;;  %v750_v57 = vunpack.c.3.s8 %v5786_v29 }
 0x1c8   : > { %v1252_v34 = vcvt.s32.f32 %v740_v28 }
 0x1c9   : > { %v5793_v43 = vadd.f32 %v3048_v37, %v2880_v32  ;;  %v1623_v22 = vpack.c.bf16 %v1247_v1, %v1239_v25  ;;  %v741_v32 = vunpack.c.2.s8 %v5783_v15 }
 0x1ca   : > { %v1628_v1 = vpack.c.bf16 %v1260_v2, %v1252_v34 }
 0x1cb   : > { %v2712_v61 = vpop.f32.mrf.mxu2 }
 0x1cc   : > { %v2713_v48 = vadd.f32 %v2712_v61, %v2544_v19  ;;  %v1253_v19 = vcvt.s32.f32 %v741_v32  ;;  %v1261_v61 = vcvt.s32.f32 %v749_v14 }
 0x1cd   : > { %v2546_v31 = vpop.f32.mrf.mxu1 }
 0x1ce   : > { %v2881_v6 = vpop.f32.mrf.mxu3  ;;  %v2547_v60 = vadd.f32 %v2546_v31, %v5522_v49 }
 0x1cf   : > { %v2882_v4 = vadd.f32 %v2881_v6, %v2713_v48  ;;  %v3053_v52 = vpop.f32.mrf.mxu0  ;;  %v1254_v6 = vcvt.s32.f32 %v742_v10  ;;  %v764_v10 = vunpack.c.1.s8 %v5809_v40 }
 0x1d0   : > { %2585 = vmatmul.bf16.gmra.mxu1 %v1620_v54  ;;  %2754 = vmatmul.bf16.gmra.mxu2 %v1621_v38  ;;  %v751_v54 = vunpack.c.3.s8 %v407_v51  ;;  %v1262_v38 = vcvt.s32.f32 %v750_v57 }
 0x1d1   : > { %v5796_v37 = vadd.f32 %v3050_v0, %v2882_v4  ;;  %v1255_v4 = vcvt.s32.f32 %v743_v11 }
 0x1d2   : > { %3092 = vmatmul.bf16.gmra.mxu0 %v1623_v22  ;;  %v1263_v22 = vcvt.s32.f32 %v751_v54 }
 0x1d3   : > { %2923 = vmatmul.bf16.gmra.mxu3 %v1622_v27  ;;  %v2715_v56 = vpop.f32.mrf.mxu2  ;;  %v1629_v27 = vpack.c.bf16 %v1261_v61, %v1253_v19 }
 0x1d4   : > { %v2716_v12 = vadd.f32 %v2715_v56, %v2547_v60  ;;  %v1630_v60 = vpack.c.bf16 %v1262_v38, %v1254_v6  ;;  %v1631_v51 = vpack.c.bf16 %v1263_v22, %v1255_v4  ;;  %v1276_v6 = vcvt.s32.f32 %v764_v10 }
 0x1d5   : > { %v2548_v18 = vpop.f32.mrf.mxu1 }
 0x1d6   : > { %v2884_v36 = vpop.f32.mrf.mxu3  ;;  %v2549_v15 = vadd.f32 %v2548_v18, %v5530_v59  ;;  %v5812_v59 = vld [vmem:[%s5468_s6 + $0x250] sm:$0xff]  ;;  %v756_v18 = vunpack.c.0.s8 %v5809_v40 }
 0x1d7   : > { %v2885_v0 = vadd.f32 %v2884_v36, %v2716_v12  ;;  %v3055_v48 = vpop.f32.mrf.mxu0  ;;  %v5816_v36 = vld [vmem:[%s5468_s6 + $0x258] sm:$0xff]  ;;  %v757_v57 = vunpack.c.0.s8 %v5812_v59  ;;  %v765_v2 = vunpack.c.1.s8 %v5812_v59 }
 0x1d8   : > { %v758_v61 = vunpack.c.0.s8 %v5816_v36  ;;  %v766_v11 = vunpack.c.1.s8 %v5816_v36 }
 0x1d9   : > { %v5803_v49 = vadd.f32 %v3053_v52, %v2885_v0  ;;  %v1269_v38 = vcvt.s32.f32 %v757_v57 }
 0x1da   : > { %v1278_v4 = vcvt.s32.f32 %v766_v11  ;;  %v4825_v11 = vld [vmem:[#allocation6 + $0x1d0] sm:$0xff] }
 0x1db   : > { %v2717_v25 = vpop.f32.mrf.mxu2  ;;  %3516 = vmatpush.bf16.msra.mxu3 %v4825_v11 }
 0x1dc   : > { %v2718_v31 = vadd.f32 %v2717_v25, %v2549_v15  ;;  %v1277_v25 = vcvt.s32.f32 %v765_v2 }
 0x1dd   : > { %v2551_v52 = vpop.f32.mrf.mxu1 }
 0x1de   : > { %v2886_v29 = vpop.f32.mrf.mxu3  ;;  %v2552_v12 = vadd.f32 %v2551_v52, %v5538_v13  ;;  %v5825_v13 = vld [vmem:[%s5468_s6 + $0x260] sm:$0xff] }
 0x1df   : > { %v2887_v56 = vadd.f32 %v2886_v29, %v2718_v31  ;;  %v3058_v32 = vpop.f32.mrf.mxu0  ;;  %v767_v31 = vunpack.c.1.s8 %v5825_v13 }
 0x1e0   : > { %2590 = vmatmul.bf16.gmra.mxu1 %v1628_v1  ;;  %2759 = vmatmul.bf16.gmra.mxu2 %v1629_v27  ;;  %v759_v1 = vunpack.c.0.s8 %v5825_v13  ;;  %v1270_v27 = vcvt.s32.f32 %v758_v61  ;;  %v4817_v61 = vld [vmem:[#allocation6 + $0x190] sm:$0xff] }
 0x1e1   : > { %v5806_v28 = vadd.f32 %v3055_v48, %v2887_v56  ;;  %v1268_v48 = vcvt.s32.f32 %v756_v18  ;;  %v1279_v18 = vcvt.s32.f32 %v767_v31  ;;  %3347 = vmatpush.bf16.msra.mxu2 %v4817_v61 }
 0x1e2   : > { %3097 = vmatmul.bf16.gmra.mxu0 %v1631_v51 }
 0x1e3   : > { %2928 = vmatmul.bf16.gmra.mxu3 %v1630_v60  ;;  %v2720_v14 = vpop.f32.mrf.mxu2  ;;  %v1636_v60 = vpack.c.bf16 %v1276_v6, %v1268_v48  ;;  %v780_v48 = vunpack.c.3.s8 %v5809_v40  ;;  %v773_v6 = vunpack.c.2.s8 %v5812_v59 }
 0x1e4   : > { %v2721_v0 = vadd.f32 %v2720_v14, %v2552_v12  ;;  %v1637_v12 = vpack.c.bf16 %v1277_v25, %v1269_v38  ;;  %v1271_v14 = vcvt.s32.f32 %v759_v1  ;;  %v781_v1 = vunpack.c.3.s8 %v5812_v59 }
 0x1e5   : > { %v2553_v19 = vpop.f32.mrf.mxu1 }
 0x1e6   : > { %v2889_v34 = vpop.f32.mrf.mxu3  ;;  %v2554_v22 = vadd.f32 %v2553_v19, %v5549_v26 }
 0x1e7   : > { %v2890_v54 = vadd.f32 %v2889_v34, %v2721_v0  ;;  %v3060_v29 = vpop.f32.mrf.mxu0  ;;  %v1639_v34 = vpack.c.bf16 %v1279_v18, %v1271_v14 }
 0x1e9   : > { %v5827_v15 = vadd.f32 %v3058_v32, %v2890_v54  ;;  %v1638_v32 = vpack.c.bf16 %v1278_v4, %v1270_v27  ;;  %v772_v54 = vunpack.c.2.s8 %v5809_v40  ;;  %v782_v27 = vunpack.c.3.s8 %v5816_v36  ;;  %v4809_v4 = vld [vmem:[#allocation6 + $0x150] sm:$0xff] }
 0x1ea   : > { %3178 = vmatpush.bf16.msra.mxu1 %v4809_v4 }
 0x1eb   : > { %v2722_v52 = vpop.f32.mrf.mxu2  ;;  %v1294_v18 = vcvt.s32.f32 %v782_v27 }
 0x1ec   : > { %v2723_v56 = vadd.f32 %v2722_v52, %v2554_v22  ;;  %v1284_v22 = vcvt.s32.f32 %v772_v54  ;;  %v1292_v52 = vcvt.s32.f32 %v780_v48 }
 0x1ed   : > { %v2556_v10 = vpop.f32.mrf.mxu1 }
 0x1ee   : > { %v2891_v51 = vpop.f32.mrf.mxu3  ;;  %v2557_v26 = vadd.f32 %v2556_v10, %v5558_v45 }
 0x1ef   : > { %v2892_v57 = vadd.f32 %v2891_v51, %v2723_v56  ;;  %v3063_v2 = vpop.f32.mrf.mxu0  ;;  %v1293_v56 = vcvt.s32.f32 %v781_v1  ;;  %v775_v51 = vunpack.c.2.s8 %v5825_v13 }
 0x1f0   : > { %2595 = vmatmul.bf16.gmra.mxu1 %v1636_v60  ;;  %2764 = vmatmul.bf16.gmra.mxu2 %v1637_v12  ;;  %v1285_v60 = vcvt.s32.f32 %v773_v6  ;;  %v783_v12 = vunpack.c.3.s8 %v5825_v13  ;;  %v420_v6 = vld [vmem:[%s5468_s6 + $0x288] sm:$0xff] }
 0x1f1   : > { %v5832_v0 = vadd.f32 %v3060_v29, %v2892_v57  ;;  %v774_v29 = vunpack.c.2.s8 %v5816_v36  ;;  %v788_v27 = vunpack.c.0.s8 %v420_v6 }
 0x1f2   : > { %3102 = vmatmul.bf16.gmra.mxu0 %v1639_v34  ;;  %v1645_v61 = vpack.c.bf16 %v1293_v56, %v1285_v60  ;;  %v1295_v11 = vcvt.s32.f32 %v783_v12 }
 0x1f3   : > { %2933 = vmatmul.bf16.gmra.mxu3 %v1638_v32  ;;  %v2725_v19 = vpop.f32.mrf.mxu2  ;;  %v1286_v59 = vcvt.s32.f32 %v774_v29  ;;  %v1644_v32 = vpack.c.bf16 %v1292_v52, %v1284_v22 }
 0x1f4   : > { %v2726_v38 = vadd.f32 %v2725_v19, %v2557_v26 }
 0x1f5   : > { %v2558_v31 = vpop.f32.mrf.mxu1  ;;  %v1646_v19 = vpack.c.bf16 %v1294_v18, %v1286_v59  ;;  %v1300_v59 = vcvt.s32.f32 %v788_v27 }
 0x1f6   : > { %v2894_v25 = vpop.f32.mrf.mxu3  ;;  %v2559_v10 = vadd.f32 %v2558_v31, %v5566_v63  ;;  %v5854_v31 = vld [vmem:[%s5468_s6 + $0x298] sm:$0xff] }
 0x1f7   : > { %v2895_v45 = vadd.f32 %v2894_v25, %v2726_v38  ;;  %v3065_v14 = vpop.f32.mrf.mxu0  ;;  %v5850_v38 = vld [vmem:[%s5468_s6 + $0x290] sm:$0xff]  ;;  %v4835_v25 = vld [vmem:[#allocation8 + $0x20] sm:$0xff]  ;;  %v798_v12 = vunpack.c.1.s8 %v5854_v31 }
 0x1f8   : > { %v789_v4 = vunpack.c.0.s8 %v5850_v38  ;;  %3978 = vmatpush.bf16.msra.mxu0 %v4835_v25  ;;  %v797_v60 = vunpack.c.1.s8 %v5850_v38 }
 0x1f9   : > { %v5841_v40 = vadd.f32 %v3063_v2, %v2895_v45  ;;  %v1287_v2 = vcvt.s32.f32 %v775_v51  ;;  %v796_v45 = vunpack.c.1.s8 %v420_v6  ;;  %v790_v51 = vunpack.c.0.s8 %v5854_v31 }
 0x1fb   : > { %v2727_v36 = vpop.f32.mrf.mxu2  ;;  %v1647_v48 = vpack.c.bf16 %v1295_v11, %v1287_v2  ;;  %v1308_v18 = vcvt.s32.f32 %v796_v45  ;;  %v1302_v2 = vcvt.s32.f32 %v790_v51  ;;  %v1310_v11 = vcvt.s32.f32 %v798_v12 }
 0x1fc   : > { %v2728_v57 = vadd.f32 %v2727_v36, %v2559_v10  ;;  %v1301_v10 = vcvt.s32.f32 %v789_v4  ;;  %v812_v12 = vunpack.c.3.s8 %v420_v6 }
 0x1fd   : > { %v2561_v26 = vpop.f32.mrf.mxu1  ;;  %v1654_v45 = vpack.c.bf16 %v1310_v11, %v1302_v2 }
 0x1fe   : > { %v2896_v34 = vpop.f32.mrf.mxu3  ;;  %v2562_v1 = vadd.f32 %v2561_v26, %v5574_v24  ;;  %v1324_v11 = vcvt.s32.f32 %v812_v12  ;;  %v5877_v12 = vld [vmem:[%s5468_s6 + $0x2c8] sm:$0xff] }
 0x1ff   : > { %v2897_v54 = vadd.f32 %v2896_v34, %v2728_v57  ;;  %v3068_v63 = vpop.f32.mrf.mxu0 }
 0x200   : > { %2600 = vmatmul.bf16.gmra.mxu1 %v1644_v32  ;;  %2769 = vmatmul.bf16.gmra.mxu2 %v1645_v61  ;;  %v1309_v32 = vcvt.s32.f32 %v797_v60 }
 0x201   : > { %v5846_v13 = vadd.f32 %v3065_v14, %v2897_v54  ;;  %v423_v14 = vld [vmem:[%s5468_s6 + $0x2a0] sm:$0xff]  ;;  %v1652_v54 = vpack.c.bf16 %v1308_v18, %v1300_v59 }
 0x202   : > { %3107 = vmatmul.bf16.gmra.mxu0 %v1647_v48  ;;  %v791_v57 = vunpack.c.0.s8 %v423_v14  ;;  %v799_v34 = vunpack.c.1.s8 %v423_v14 }
 0x203   : > { %2938 = vmatmul.bf16.gmra.mxu3 %v1646_v19  ;;  %v2730_v29 = vpop.f32.mrf.mxu2 }
 0x204   : > { %v2731_v22 = vadd.f32 %v2730_v29, %v2562_v1  ;;  %v1653_v1 = vpack.c.bf16 %v1309_v32, %v1301_v10  ;;  %v1303_v29 = vcvt.s32.f32 %v791_v57  ;;  %v813_v10 = vunpack.c.3.s8 %v5850_v38 }
 0x205   : > { %v2563_v56 = vpop.f32.mrf.mxu1  ;;  %v806_v57 = vunpack.c.2.s8 %v5854_v31 }
 0x206   : > { %v2899_v52 = vpop.f32.mrf.mxu3  ;;  %v2564_v26 = vadd.f32 %v2563_v56, %v5585_v41  ;;  %v804_v56 = vunpack.c.2.s8 %v420_v6  ;;  %v807_v6 = vunpack.c.2.s8 %v423_v14 }
 0x207   : > { %v2900_v24 = vadd.f32 %v2899_v52, %v2731_v22  ;;  %v3070_v61 = vpop.f32.mrf.mxu0  ;;  %v1311_v22 = vcvt.s32.f32 %v799_v34  ;;  %v814_v34 = vunpack.c.3.s8 %v5854_v31 }
 0x208   : > { %v1316_v2 = vcvt.s32.f32 %v804_v56 }
 0x209   : > { %v5861_v36 = vadd.f32 %v3068_v63, %v2900_v24  ;;  %v1655_v52 = vpack.c.bf16 %v1311_v22, %v1303_v29  ;;  %v805_v24 = vunpack.c.2.s8 %v5850_v38 }
 0x20a   : > { %v1660_v22 = vpack.c.bf16 %v1324_v11, %v1316_v2 }
 0x20b   : > { %v2732_v19 = vpop.f32.mrf.mxu2 }
 0x20c   : > { %v2733_v48 = vadd.f32 %v2732_v19, %v2564_v26  ;;  %v1317_v26 = vcvt.s32.f32 %v805_v24  ;;  %v1325_v19 = vcvt.s32.f32 %v813_v10 }
 0x20d   : > { %v2566_v27 = vpop.f32.mrf.mxu1 }
 0x20e   : > { %v2901_v25 = vpop.f32.mrf.mxu3  ;;  %v2567_v51 = vadd.f32 %v2566_v27, %v5594_v9 }
 0x20f   : > { %v2902_v4 = vadd.f32 %v2901_v25, %v2733_v48  ;;  %v3073_v60 = vpop.f32.mrf.mxu0  ;;  %v1318_v25 = vcvt.s32.f32 %v806_v57  ;;  %v828_v57 = vunpack.c.1.s8 %v5877_v12 }
 0x210   : > { %2605 = vmatmul.bf16.gmra.mxu1 %v1652_v54  ;;  %2774 = vmatmul.bf16.gmra.mxu2 %v1653_v1  ;;  %v815_v54 = vunpack.c.3.s8 %v423_v14  ;;  %v1326_v1 = vcvt.s32.f32 %v814_v34 }
 0x211   : > { %v5864_v63 = vadd.f32 %v3070_v61, %v2902_v4  ;;  %v1319_v4 = vcvt.s32.f32 %v807_v6 }
 0x212   : > { %3112 = vmatmul.bf16.gmra.mxu0 %v1655_v52  ;;  %v1327_v52 = vcvt.s32.f32 %v815_v54 }
 0x213   : > { %2943 = vmatmul.bf16.gmra.mxu3 %v1654_v45  ;;  %v2735_v41 = vpop.f32.mrf.mxu2  ;;  %v1661_v45 = vpack.c.bf16 %v1325_v19, %v1317_v26 }
 0x214   : > { %v2736_v59 = vadd.f32 %v2735_v41, %v2567_v51  ;;  %v1662_v51 = vpack.c.bf16 %v1326_v1, %v1318_v25  ;;  %v1663_v14 = vpack.c.bf16 %v1327_v52, %v1319_v4  ;;  %v1340_v25 = vcvt.s32.f32 %v828_v57 }
 0x215   : > { %v2568_v32 = vpop.f32.mrf.mxu1 }
 0x216   : > { %v2904_v18 = vpop.f32.mrf.mxu3  ;;  %v2569_v38 = vadd.f32 %v2568_v32, %v5602_v33  ;;  %v5880_v33 = vld [vmem:[%s5468_s6 + $0x2d0] sm:$0xff]  ;;  %v820_v32 = vunpack.c.0.s8 %v5877_v12 }
 0x217   : > { %v2905_v61 = vadd.f32 %v2904_v18, %v2736_v59  ;;  %v3075_v48 = vpop.f32.mrf.mxu0  ;;  %v5884_v18 = vld [vmem:[%s5468_s6 + $0x2d8] sm:$0xff]  ;;  %v821_v34 = vunpack.c.0.s8 %v5880_v33  ;;  %v829_v11 = vunpack.c.1.s8 %v5880_v33 }
 0x218   : > { %v822_v19 = vunpack.c.0.s8 %v5884_v18  ;;  %v830_v6 = vunpack.c.1.s8 %v5884_v18 }
 0x219   : > { %v5871_v9 = vadd.f32 %v3073_v60, %v2905_v61  ;;  %v1333_v1 = vcvt.s32.f32 %v821_v34 }
 0x21a   : > { %v1342_v4 = vcvt.s32.f32 %v830_v6  ;;  %v4824_v6 = vld [vmem:[#allocation6 + $0x1c8] sm:$0xff] }
 0x21b   : > { %v2737_v29 = vpop.f32.mrf.mxu2  ;;  %3517 = vmatpush.bf16.msra.mxu3 %v4824_v6 }
 0x21c   : > { %v2738_v27 = vadd.f32 %v2737_v29, %v2569_v38  ;;  %v1341_v29 = vcvt.s32.f32 %v829_v11 }
 0x21d   : > { %v2571_v60 = vpop.f32.mrf.mxu1 }
 0x21e   : > { %v2906_v31 = vpop.f32.mrf.mxu3  ;;  %v2572_v59 = vadd.f32 %v2571_v60, %v5610_v3  ;;  %v5893_v3 = vld [vmem:[%s5468_s6 + $0x2e0] sm:$0xff] }
 0x21f   : > { %v2907_v41 = vadd.f32 %v2906_v31, %v2738_v27  ;;  %v3078_v24 = vpop.f32.mrf.mxu0  ;;  %v831_v27 = vunpack.c.1.s8 %v5893_v3 }
 0x220   : > { %2610 = vmatmul.bf16.gmra.mxu1 %v1660_v22  ;;  %2779 = vmatmul.bf16.gmra.mxu2 %v1661_v45  ;;  %v823_v22 = vunpack.c.0.s8 %v5893_v3  ;;  %v1334_v45 = vcvt.s32.f32 %v822_v19  ;;  %v4816_v19 = vld [vmem:[#allocation6 + $0x188] sm:$0xff] }
 0x221   : > { %v5874_v56 = vadd.f32 %v3075_v48, %v2907_v41  ;;  %v1332_v48 = vcvt.s32.f32 %v820_v32  ;;  %v1343_v32 = vcvt.s32.f32 %v831_v27  ;;  %3348 = vmatpush.bf16.msra.mxu2 %v4816_v19 }
 0x222   : > { %3117 = vmatmul.bf16.gmra.mxu0 %v1663_v14 }
 0x223   : > { %2948 = vmatmul.bf16.gmra.mxu3 %v1662_v51  ;;  %v2740_v10 = vpop.f32.mrf.mxu2  ;;  %v1668_v51 = vpack.c.bf16 %v1340_v25, %v1332_v48  ;;  %v844_v48 = vunpack.c.3.s8 %v5877_v12  ;;  %v837_v25 = vunpack.c.2.s8 %v5880_v33 }
 0x224   : > { %v2741_v61 = vadd.f32 %v2740_v10, %v2572_v59  ;;  %v1669_v59 = vpack.c.bf16 %v1341_v29, %v1333_v1  ;;  %v1335_v10 = vcvt.s32.f32 %v823_v22  ;;  %v845_v22 = vunpack.c.3.s8 %v5880_v33 }
 0x225   : > { %v2573_v26 = vpop.f32.mrf.mxu1 }
 0x226   : > { %v2909_v2 = vpop.f32.mrf.mxu3  ;;  %v2574_v52 = vadd.f32 %v2573_v26, %v5621_v42 }
 0x227   : > { %v2910_v54 = vadd.f32 %v2909_v2, %v2741_v61  ;;  %v3080_v31 = vpop.f32.mrf.mxu0  ;;  %v1671_v2 = vpack.c.bf16 %v1343_v32, %v1335_v10 }
 0x229   : > { %v5895_v38 = vadd.f32 %v3078_v24, %v2910_v54  ;;  %v1670_v24 = vpack.c.bf16 %v1342_v4, %v1334_v45  ;;  %v836_v54 = vunpack.c.2.s8 %v5877_v12  ;;  %v846_v45 = vunpack.c.3.s8 %v5884_v18  ;;  %v4808_v4 = vld [vmem:[#allocation6 + $0x148] sm:$0xff] }
 0x22a   : > { %3179 = vmatpush.bf16.msra.mxu1 %v4808_v4 }
 0x22b   : > { %v2742_v60 = vpop.f32.mrf.mxu2  ;;  %v1358_v32 = vcvt.s32.f32 %v846_v45 }
 0x22c   : > { %v2743_v41 = vadd.f32 %v2742_v60, %v2574_v52  ;;  %v1348_v52 = vcvt.s32.f32 %v836_v54  ;;  %v1356_v60 = vcvt.s32.f32 %v844_v48 }
 0x22d   : > { %v2576_v57 = vpop.f32.mrf.mxu1 }
 0x22e   : > { %v2911_v14 = vpop.f32.mrf.mxu3  ;;  %v2577_v42 = vadd.f32 %v2576_v57, %v5630_v58 }
 0x22f   : > { %v2912_v34 = vadd.f32 %v2911_v14, %v2743_v41  ;;  %v3083_v11 = vpop.f32.mrf.mxu0  ;;  %v1357_v41 = vcvt.s32.f32 %v845_v22  ;;  %v839_v14 = vunpack.c.2.s8 %v5893_v3 }
 0x230   : > { %2615 = vmatmul.bf16.gmra.mxu1 %v1668_v51  ;;  %2784 = vmatmul.bf16.gmra.mxu2 %v1669_v59  ;;  %v1349_v51 = vcvt.s32.f32 %v837_v25  ;;  %v847_v59 = vunpack.c.3.s8 %v5893_v3  ;;  %v436_v25 = vld [vmem:[%s5468_s6 + $0x308] sm:$0xff] }
 0x231   : > { %v5900_v61 = vadd.f32 %v3080_v31, %v2912_v34  ;;  %v838_v31 = vunpack.c.2.s8 %v5884_v18  ;;  %v852_v45 = vunpack.c.0.s8 %v436_v25 }
 0x232   : > { %3122 = vmatmul.bf16.gmra.mxu0 %v1671_v2  ;;  %v1677_v19 = vpack.c.bf16 %v1357_v41, %v1349_v51  ;;  %v1359_v6 = vcvt.s32.f32 %v847_v59 }
 0x233   : > { %2953 = vmatmul.bf16.gmra.mxu3 %v1670_v24  ;;  %v2745_v26 = vpop.f32.mrf.mxu2  ;;  %v1350_v33 = vcvt.s32.f32 %v838_v31  ;;  %v1676_v24 = vpack.c.bf16 %v1356_v60, %v1348_v52 }
 0x234   : > { %v2746_v1 = vadd.f32 %v2745_v26, %v2577_v42 }
 0x235   : > { %v2578_v27 = vpop.f32.mrf.mxu1  ;;  %v1678_v26 = vpack.c.bf16 %v1358_v32, %v1350_v33  ;;  %v1364_v33 = vcvt.s32.f32 %v852_v45 }
 0x236   : > { %v2914_v29 = vpop.f32.mrf.mxu3  ;;  %v2579_v57 = vadd.f32 %v2578_v27, %v5638_v30  ;;  %v5922_v27 = vld [vmem:[%s5468_s6 + $0x318] sm:$0xff] }
 0x237   : > { %v2915_v58 = vadd.f32 %v2914_v29, %v2746_v1  ;;  %v3085_v10 = vpop.f32.mrf.mxu0  ;;  %v5918_v1 = vld [vmem:[%s5468_s6 + $0x310] sm:$0xff]  ;;  %v4834_v29 = vld [vmem:[#allocation8 + $0x18] sm:$0xff]  ;;  %v862_v59 = vunpack.c.1.s8 %v5922_v27 }
 0x238   : > { %v853_v4 = vunpack.c.0.s8 %v5918_v1  ;;  %3979 = vmatpush.bf16.msra.mxu0 %v4834_v29  ;;  %v861_v51 = vunpack.c.1.s8 %v5918_v1 }
 0x239   : > { %v5909_v12 = vadd.f32 %v3083_v11, %v2915_v58  ;;  %v1351_v11 = vcvt.s32.f32 %v839_v14  ;;  %v860_v58 = vunpack.c.1.s8 %v436_v25  ;;  %v854_v14 = vunpack.c.0.s8 %v5922_v27 }
 0x23b   : > { %v2747_v18 = vpop.f32.mrf.mxu2  ;;  %v1679_v48 = vpack.c.bf16 %v1359_v6, %v1351_v11  ;;  %v1372_v32 = vcvt.s32.f32 %v860_v58  ;;  %v1366_v11 = vcvt.s32.f32 %v854_v14  ;;  %v1374_v6 = vcvt.s32.f32 %v862_v59 }
 0x23c   : > { %v2748_v34 = vadd.f32 %v2747_v18, %v2579_v57  ;;  %v1365_v57 = vcvt.s32.f32 %v853_v4  ;;  %v876_v59 = vunpack.c.3.s8 %v436_v25 }
 0x23d   : > { %v2581_v42 = vpop.f32.mrf.mxu1  ;;  %v1686_v58 = vpack.c.bf16 %v1374_v6, %v1366_v11 }
 0x23e   : > { %v2916_v2 = vpop.f32.mrf.mxu3  ;;  %v2582_v22 = vadd.f32 %v2581_v42, %v5646_v55  ;;  %v1388_v6 = vcvt.s32.f32 %v876_v59  ;;  %v5945_v59 = vld [vmem:[%s5468_s6 + $0x348] sm:$0xff] }
 0x23f   : > { %v2917_v54 = vadd.f32 %v2916_v2, %v2748_v34  ;;  %v3088_v30 = vpop.f32.mrf.mxu0 }
 0x240   : > { %2620 = vmatmul.bf16.gmra.mxu1 %v1676_v24  ;;  %2789 = vmatmul.bf16.gmra.mxu2 %v1677_v19  ;;  %v1373_v24 = vcvt.s32.f32 %v861_v51 }
 0x241   : > { %v5914_v3 = vadd.f32 %v3085_v10, %v2917_v54  ;;  %v439_v10 = vld [vmem:[%s5468_s6 + $0x320] sm:$0xff]  ;;  %v1684_v54 = vpack.c.bf16 %v1372_v32, %v1364_v33 }
 0x242   : > { %3127 = vmatmul.bf16.gmra.mxu0 %v1679_v48  ;;  %v855_v34 = vunpack.c.0.s8 %v439_v10  ;;  %v863_v2 = vunpack.c.1.s8 %v439_v10 }
 0x243   : > { %2958 = vmatmul.bf16.gmra.mxu3 %v1678_v26  ;;  %v2750_v31 = vpop.f32.mrf.mxu2 }
 0x244   : > { %v2751_v52 = vadd.f32 %v2750_v31, %v2582_v22  ;;  %v1685_v22 = vpack.c.bf16 %v1373_v24, %v1365_v57  ;;  %v1367_v31 = vcvt.s32.f32 %v855_v34  ;;  %v877_v57 = vunpack.c.3.s8 %v5918_v1 }
 0x245   : > { %v2583_v41 = vpop.f32.mrf.mxu1  ;;  %v870_v34 = vunpack.c.2.s8 %v5922_v27 }
 0x246   : > { %v2919_v60 = vpop.f32.mrf.mxu3  ;;  %v2584_v42 = vadd.f32 %v2583_v41, %v5657_v50  ;;  %v868_v41 = vunpack.c.2.s8 %v436_v25  ;;  %v871_v25 = vunpack.c.2.s8 %v439_v10 }
 0x247   : > { %v2920_v55 = vadd.f32 %v2919_v60, %v2751_v52  ;;  %v3090_v19 = vpop.f32.mrf.mxu0  ;;  %v1375_v52 = vcvt.s32.f32 %v863_v2  ;;  %v878_v2 = vunpack.c.3.s8 %v5922_v27 }
 0x248   : > { %v1380_v11 = vcvt.s32.f32 %v868_v41 }
 0x249   : > { %v5929_v18 = vadd.f32 %v3088_v30, %v2920_v55  ;;  %v1687_v60 = vpack.c.bf16 %v1375_v52, %v1367_v31  ;;  %v869_v55 = vunpack.c.2.s8 %v5918_v1 }
 0x24a   : > { %v1692_v52 = vpack.c.bf16 %v1388_v6, %v1380_v11 }
 0x24b   : > { %v2752_v26 = vpop.f32.mrf.mxu2 }
 0x24c   : > { %v2753_v48 = vadd.f32 %v2752_v26, %v2584_v42  ;;  %v1381_v42 = vcvt.s32.f32 %v869_v55  ;;  %v1389_v26 = vcvt.s32.f32 %v877_v57 }
 0x24d   : > { %v2586_v45 = vpop.f32.mrf.mxu1 }
 0x24e   : > { %v2921_v29 = vpop.f32.mrf.mxu3  ;;  %v2587_v14 = vadd.f32 %v2586_v45, %v5526_v53 }
 0x24f   : > { %v2922_v4 = vadd.f32 %v2921_v29, %v2753_v48  ;;  %v3093_v51 = vpop.f32.mrf.mxu0  ;;  %v1382_v29 = vcvt.s32.f32 %v870_v34  ;;  %v892_v34 = vunpack.c.1.s8 %v5945_v59 }
 0x250   : > { %2625 = vmatmul.bf16.gmra.mxu1 %v1684_v54  ;;  %2794 = vmatmul.bf16.gmra.mxu2 %v1685_v22  ;;  %v879_v54 = vunpack.c.3.s8 %v439_v10  ;;  %v1390_v22 = vcvt.s32.f32 %v878_v2 }
 0x251   : > { %v5932_v30 = vadd.f32 %v3090_v19, %v2922_v4  ;;  %v1383_v4 = vcvt.s32.f32 %v871_v25 }
 0x252   : > { %3132 = vmatmul.bf16.gmra.mxu0 %v1687_v60  ;;  %v1391_v60 = vcvt.s32.f32 %v879_v54 }
 0x253   : > { %2963 = vmatmul.bf16.gmra.mxu3 %v1686_v58  ;;  %v2755_v50 = vpop.f32.mrf.mxu2  ;;  %v1693_v58 = vpack.c.bf16 %v1389_v26, %v1381_v42 }
 0x254   : > { %v2756_v33 = vadd.f32 %v2755_v50, %v2587_v14  ;;  %v1694_v14 = vpack.c.bf16 %v1390_v22, %v1382_v29  ;;  %v1695_v10 = vpack.c.bf16 %v1391_v60, %v1383_v4  ;;  %v1404_v29 = vcvt.s32.f32 %v892_v34 }
 0x255   : > { %v2588_v24 = vpop.f32.mrf.mxu1 }
 0x256   : > { %v2924_v32 = vpop.f32.mrf.mxu3  ;;  %v2589_v1 = vadd.f32 %v2588_v24, %v5534_v7  ;;  %v5948_v7 = vld [vmem:[%s5468_s6 + $0x350] sm:$0xff]  ;;  %v884_v24 = vunpack.c.0.s8 %v5945_v59 }
 0x257   : > { %v2925_v19 = vadd.f32 %v2924_v32, %v2756_v33  ;;  %v3095_v48 = vpop.f32.mrf.mxu0  ;;  %v5952_v32 = vld [vmem:[%s5468_s6 + $0x358] sm:$0xff]  ;;  %v885_v2 = vunpack.c.0.s8 %v5948_v7  ;;  %v893_v6 = vunpack.c.1.s8 %v5948_v7 }
 0x258   : > { %v886_v26 = vunpack.c.0.s8 %v5952_v32  ;;  %v894_v25 = vunpack.c.1.s8 %v5952_v32 }
 0x259   : > { %v5939_v53 = vadd.f32 %v3093_v51, %v2925_v19  ;;  %v1397_v22 = vcvt.s32.f32 %v885_v2 }
 0x25a   : > { %v1406_v4 = vcvt.s32.f32 %v894_v25  ;;  %v4823_v25 = vld [vmem:[#allocation6 + $0x1c0] sm:$0xff] }
 0x25b   : > { %v2757_v31 = vpop.f32.mrf.mxu2  ;;  %3518 = vmatpush.bf16.msra.mxu3 %v4823_v25 }
 0x25c   : > { %v2758_v45 = vadd.f32 %v2757_v31, %v2589_v1  ;;  %v1405_v31 = vcvt.s32.f32 %v893_v6 }
 0x25d   : > { %v2591_v51 = vpop.f32.mrf.mxu1 }
 0x25e   : > { %v2926_v27 = vpop.f32.mrf.mxu3  ;;  %v2592_v33 = vadd.f32 %v2591_v51, %v5545_v20  ;;  %v5961_v20 = vld [vmem:[%s5468_s6 + $0x360] sm:$0xff] }
 0x25f   : > { %v2927_v50 = vadd.f32 %v2926_v27, %v2758_v45  ;;  %v3098_v55 = vpop.f32.mrf.mxu0  ;;  %v895_v45 = vunpack.c.1.s8 %v5961_v20 }
 0x260   : > { %2630 = vmatmul.bf16.gmra.mxu1 %v1692_v52  ;;  %2799 = vmatmul.bf16.gmra.mxu2 %v1693_v58  ;;  %v887_v52 = vunpack.c.0.s8 %v5961_v20  ;;  %v1398_v58 = vcvt.s32.f32 %v886_v26  ;;  %v4815_v26 = vld [vmem:[#allocation6 + $0x180] sm:$0xff] }
 0x261   : > { %v5942_v41 = vadd.f32 %v3095_v48, %v2927_v50  ;;  %v1396_v48 = vcvt.s32.f32 %v884_v24  ;;  %v1407_v24 = vcvt.s32.f32 %v895_v45  ;;  %3349 = vmatpush.bf16.msra.mxu2 %v4815_v26  ;;  %v909_v45 = vunpack.c.3.s8 %v5948_v7 }
 0x262   : > { %3137 = vmatmul.bf16.gmra.mxu0 %v1695_v10 }
 0x263   : > { %2968 = vmatmul.bf16.gmra.mxu3 %v1694_v14  ;;  %v2760_v57 = vpop.f32.mrf.mxu2  ;;  %v1700_v14 = vpack.c.bf16 %v1404_v29, %v1396_v48  ;;  %v900_v48 = vunpack.c.2.s8 %v5945_v59  ;;  %v908_v29 = vunpack.c.3.s8 %v5945_v59 }
 0x264   : > { %v2761_v19 = vadd.f32 %v2760_v57, %v2592_v33  ;;  %v1701_v33 = vpack.c.bf16 %v1405_v31, %v1397_v22  ;;  %v1399_v57 = vcvt.s32.f32 %v887_v52  ;;  %v901_v22 = vunpack.c.2.s8 %v5948_v7 }
 0x265   : > { %v2593_v42 = vpop.f32.mrf.mxu1 }
 0x266   : > { %v2929_v11 = vpop.f32.mrf.mxu3  ;;  %v2594_v60 = vadd.f32 %v2593_v42, %v5554_v39  ;;  %v6429_v39 = vld [vmem:[#allocation17_spill] sm:$0xff] }
 0x267   : > { %v2930_v54 = vadd.f32 %v2929_v11, %v2761_v19  ;;  %v3100_v27 = vpop.f32.mrf.mxu0  ;;  %v1703_v11 = vpack.c.bf16 %v1407_v24, %v1399_v57  ;;  %v903_v57 = vunpack.c.2.s8 %v5961_v20  ;;  %v911_v24 = vunpack.c.3.s8 %v5961_v20 }
 0x269   : > { %v5963_v1 = vadd.f32 %v3098_v55, %v2930_v54  ;;  %v1702_v55 = vpack.c.bf16 %v1406_v4, %v1398_v58  ;;  %v902_v58 = vunpack.c.2.s8 %v5952_v32  ;;  %v910_v4 = vunpack.c.3.s8 %v5952_v32 }
 0x26b   : > { %6427 = vst [vmem:[#allocation44_spill] sm:$0xff] %v5963_v1  ;;  %v2762_v51 = vpop.f32.mrf.mxu2  ;;  %v1414_v7 = vcvt.s32.f32 %v902_v58  ;;  %v4833_v58 = vld [vmem:[#allocation8 + $0x10] sm:$0xff] }
 0x26c   : > { %v2763_v50 = vadd.f32 %v2762_v51, %v2594_v60  ;;  %v4807_v51 = vld [vmem:[#allocation6 + $0x140] sm:$0xff]  ;;  %3980 = vmatpush.bf16.msra.mxu0 %v4833_v58  ;;  %v6434_v58 = vld [vmem:[#allocation23_spill] sm:$0xff] }
 0x26d   : > { %v2596_v34 = vpop.f32.mrf.mxu1  ;;  %3180 = vmatpush.bf16.msra.mxu1 %v4807_v51  ;;  %v5990_v51 = vld [vmem:[%s5468_s6 + $0x398] sm:$0xff] }
 0x26e   : > { %v2931_v10 = vpop.f32.mrf.mxu3  ;;  %v2597_v42 = vadd.f32 %v2596_v34, %v6429_v39 }
 0x26f   : > { %v2932_v2 = vadd.f32 %v2931_v10, %v2763_v50  ;;  %v3103_v6 = vpop.f32.mrf.mxu0  ;;  %v1420_v50 = vcvt.s32.f32 %v908_v29  ;;  %v1413_v10 = vcvt.s32.f32 %v901_v22 }
 0x270   : > { %2635 = vmatmul.bf16.gmra.mxu1 %v1700_v14  ;;  %2804 = vmatmul.bf16.gmra.mxu2 %v1701_v33  ;;  %v1412_v14 = vcvt.s32.f32 %v900_v48  ;;  %v1421_v33 = vcvt.s32.f32 %v909_v45  ;;  %v5986_v45 = vld [vmem:[%s5468_s6 + $0x390] sm:$0xff] }
 0x271   : > { %v5968_v19 = vadd.f32 %v3100_v27, %v2932_v2  ;;  %v6431_v2 = vld [vmem:[#allocation19_spill] sm:$0xff] }
 0x272   : > { %3142 = vmatmul.bf16.gmra.mxu0 %v1703_v11  ;;  %v1708_v26 = vpack.c.bf16 %v1420_v50, %v1412_v14 }
 0x273   : > { %6428 = vst [vmem:[#allocation45_spill] sm:$0xff] %v5968_v19  ;;  %2973 = vmatmul.bf16.gmra.mxu3 %v1702_v55  ;;  %v2765_v54 = vpop.f32.mrf.mxu2  ;;  %v1422_v55 = vcvt.s32.f32 %v910_v4  ;;  %v6433_v4 = vld [vmem:[#allocation21_spill] sm:$0xff] }
 0x274   : > { %v2766_v31 = vadd.f32 %v2765_v54, %v2597_v42  ;;  %v1709_v42 = vpack.c.bf16 %v1421_v33, %v1413_v10  ;;  %v1423_v54 = vcvt.s32.f32 %v911_v24  ;;  %v917_v33 = vunpack.c.0.s8 %v5986_v45 }
 0x275   : > { %v2598_v27 = vpop.f32.mrf.mxu1  ;;  %v1710_v29 = vpack.c.bf16 %v1422_v55, %v1414_v7  ;;  %v918_v55 = vunpack.c.0.s8 %v5990_v51 }
 0x276   : > { %v2934_v52 = vpop.f32.mrf.mxu3  ;;  %v2599_v11 = vadd.f32 %v2598_v27, %v6431_v2  ;;  %v926_v2 = vunpack.c.1.s8 %v5990_v51 }
 0x277   : > { %v2935_v60 = vadd.f32 %v2934_v52, %v2766_v31  ;;  %v3105_v34 = vpop.f32.mrf.mxu0  ;;  %v452_v52 = vld [vmem:[%s5468_s6 + $0x388] sm:$0xff] }
 0x278   : > { %v916_v50 = vunpack.c.0.s8 %v452_v52  ;;  %v924_v10 = vunpack.c.1.s8 %v452_v52 }
 0x279   : > { %v5977_v59 = vadd.f32 %v3103_v6, %v2935_v60  ;;  %v1415_v6 = vcvt.s32.f32 %v903_v57 }
 0x27b   : > { %6430 = vst [vmem:[#allocation17_spill] sm:$0xff] %v5977_v59  ;;  %v2767_v32 = vpop.f32.mrf.mxu2  ;;  %v1711_v31 = vpack.c.bf16 %v1423_v54, %v1415_v6 }
 0x27c   : > { %v2768_v25 = vadd.f32 %v2767_v32, %v2599_v11  ;;  %v455_v11 = vld [vmem:[%s5468_s6 + $0x3a0] sm:$0xff] }
 0x27d   : > { %v2601_v48 = vpop.f32.mrf.mxu1  ;;  %v919_v54 = vunpack.c.0.s8 %v455_v11 }
 0x27e   : > { %v2936_v39 = vpop.f32.mrf.mxu3  ;;  %v2602_v60 = vadd.f32 %v2601_v48, %v6433_v4  ;;  %v927_v48 = vunpack.c.1.s8 %v455_v11 }
 0x27f   : > { %v2937_v22 = vadd.f32 %v2936_v39, %v2768_v25  ;;  %v3108_v27 = vpop.f32.mrf.mxu0  ;;  %v1436_v25 = vcvt.s32.f32 %v924_v10  ;;  %v1429_v39 = vcvt.s32.f32 %v917_v33  ;;  %v1431_v1 = vcvt.s32.f32 %v919_v54 }
 0x280   : > { %2640 = vmatmul.bf16.gmra.mxu1 %v1708_v26  ;;  %2809 = vmatmul.bf16.gmra.mxu2 %v1709_v42  ;;  %v1428_v26 = vcvt.s32.f32 %v916_v50  ;;  %v941_v54 = vunpack.c.3.s8 %v5986_v45 }
 0x281   : > { %v5982_v20 = vadd.f32 %v3105_v34, %v2937_v22  ;;  %v925_v34 = vunpack.c.1.s8 %v5986_v45  ;;  %v1430_v22 = vcvt.s32.f32 %v918_v55  ;;  %v6436_v55 = vld [vmem:[#allocation25_spill] sm:$0xff] }
 0x282   : > { %3147 = vmatmul.bf16.gmra.mxu0 %v1711_v31  ;;  %v1438_v31 = vcvt.s32.f32 %v926_v2 }
 0x283   : > { %6432 = vst [vmem:[#allocation19_spill] sm:$0xff] %v5982_v20  ;;  %2978 = vmatmul.bf16.gmra.mxu3 %v1710_v29  ;;  %v2770_v14 = vpop.f32.mrf.mxu2  ;;  %v1437_v6 = vcvt.s32.f32 %v925_v34 }
 0x284   : > { %v2771_v57 = vadd.f32 %v2770_v14, %v2602_v60  ;;  %v1716_v14 = vpack.c.bf16 %v1436_v25, %v1428_v26  ;;  %v1718_v10 = vpack.c.bf16 %v1438_v31, %v1430_v22  ;;  %v940_v26 = vunpack.c.3.s8 %v452_v52 }
 0x285   : > { %v2603_v7 = vpop.f32.mrf.mxu1  ;;  %v1717_v19 = vpack.c.bf16 %v1437_v6, %v1429_v39  ;;  %v933_v25 = vunpack.c.2.s8 %v5986_v45  ;;  %v6439_v45 = vld [vmem:[#allocation27_spill] sm:$0xff] }
 0x286   : > { %v2939_v24 = vpop.f32.mrf.mxu3  ;;  %v2604_v4 = vadd.f32 %v2603_v7, %v6434_v58  ;;  %v1453_v58 = vcvt.s32.f32 %v941_v54  ;;  %v6441_v54 = vld [vmem:[#allocation29_spill] sm:$0xff] }
 0x287   : > { %v2940_v32 = vadd.f32 %v2939_v24, %v2771_v57  ;;  %v3110_v29 = vpop.f32.mrf.mxu0  ;;  %v1439_v57 = vcvt.s32.f32 %v927_v48  ;;  %v1445_v22 = vcvt.s32.f32 %v933_v25  ;;  %v460_v25 = vld [vmem:[%s5468_s6 + $0x3c8] sm:$0xff] }
 0x289   : > { %v5997_v42 = vadd.f32 %v3108_v27, %v2940_v32  ;;  %v1719_v24 = vpack.c.bf16 %v1439_v57, %v1431_v1  ;;  %v932_v32 = vunpack.c.2.s8 %v452_v52  ;;  %v935_v52 = vunpack.c.2.s8 %v455_v11 }
 0x28b   : > { %v2772_v60 = vpop.f32.mrf.mxu2  ;;  %v1444_v48 = vcvt.s32.f32 %v932_v32 }
 0x28c   : > { %v2773_v20 = vadd.f32 %v2772_v60, %v2604_v4  ;;  %v943_v4 = vunpack.c.3.s8 %v455_v11 }
 0x28d   : > { %v2606_v50 = vpop.f32.mrf.mxu1 }
 0x28e   : > { %v2941_v59 = vpop.f32.mrf.mxu3  ;;  %v2607_v2 = vadd.f32 %v2606_v50, %v6436_v55  ;;  %v1725_v55 = vpack.c.bf16 %v1453_v58, %v1445_v22 }
 0x28f   : > { %v2942_v33 = vadd.f32 %v2941_v59, %v2773_v20  ;;  %v3113_v34 = vpop.f32.mrf.mxu0  ;;  %v934_v20 = vunpack.c.2.s8 %v5990_v51 }
 0x290   : > { %2645 = vmatmul.bf16.gmra.mxu1 %v1716_v14  ;;  %2814 = vmatmul.bf16.gmra.mxu2 %v1717_v19  ;;  %v942_v19 = vunpack.c.3.s8 %v5990_v51 }
 0x291   : > { %v6000_v27 = vadd.f32 %v3110_v29, %v2942_v33  ;;  %v1452_v29 = vcvt.s32.f32 %v940_v26  ;;  %v1446_v14 = vcvt.s32.f32 %v934_v20  ;;  %v462_v20 = vld [vmem:[%s5468_s6 + $0x3d8] sm:$0xff] }
 0x292   : > { %3152 = vmatmul.bf16.gmra.mxu0 %v1719_v24  ;;  %v1454_v57 = vcvt.s32.f32 %v942_v19 }
 0x293   : > { %6435 = vst [vmem:[#allocation21_spill] sm:$0xff] %v6000_v27  ;;  %2983 = vmatmul.bf16.gmra.mxu3 %v1718_v10  ;;  %v2775_v7 = vpop.f32.mrf.mxu2  ;;  %v1724_v33 = vpack.c.bf16 %v1452_v29, %v1444_v48  ;;  %v956_v48 = vunpack.c.1.s8 %v460_v25 }
 0x294   : > { %v2776_v39 = vadd.f32 %v2775_v7, %v2607_v2  ;;  %v1447_v2 = vcvt.s32.f32 %v935_v52  ;;  %v1726_v32 = vpack.c.bf16 %v1454_v57, %v1446_v14  ;;  %v950_v14 = vunpack.c.0.s8 %v462_v20 }
 0x295   : > { %v2608_v59 = vpop.f32.mrf.mxu1  ;;  %v958_v57 = vunpack.c.1.s8 %v462_v20 }
 0x296   : > { %v2944_v6 = vpop.f32.mrf.mxu3  ;;  %v2609_v50 = vadd.f32 %v2608_v59, %v6439_v45  ;;  %v463_v45 = vld [vmem:[%s5468_s6 + $0x3e0] sm:$0xff] }
 0x297   : > { %v2945_v1 = vadd.f32 %v2944_v6, %v2776_v39  ;;  %v6009_v60 = vpop.f32.mrf.mxu0  ;;  %v461_v39 = vld [vmem:[%s5468_s6 + $0x3d0] sm:$0xff] }
 0x298   : > { %6438 = vst [vmem:[#allocation25_spill] sm:$0xff] %v6009_v60  ;;  %v949_v29 = vunpack.c.0.s8 %v461_v39  ;;  %v957_v52 = vunpack.c.1.s8 %v461_v39 }
 0x299   : > { %v6007_v31 = vadd.f32 %v3113_v34, %v2945_v1  ;;  %v1455_v34 = vcvt.s32.f32 %v943_v4  ;;  %v948_v1 = vunpack.c.0.s8 %v460_v25 }
 0x29b   : > { %6437 = vst [vmem:[#allocation23_spill] sm:$0xff] %v6007_v31  ;;  %v2777_v10 = vpop.f32.mrf.mxu2  ;;  %v1727_v11 = vpack.c.bf16 %v1455_v34, %v1447_v2  ;;  %v951_v2 = vunpack.c.0.s8 %v463_v45  ;;  %v959_v34 = vunpack.c.1.s8 %v463_v45 }
 0x29c   : > { %v2778_v51 = vadd.f32 %v2777_v10, %v2609_v50  ;;  %v1460_v10 = vcvt.s32.f32 %v948_v1 }
 0x29d   : > { %v2611_v7 = vpop.f32.mrf.mxu1  ;;  %v1471_v1 = vcvt.s32.f32 %v959_v34  ;;  %v974_v34 = vunpack.c.3.s8 %v462_v20 }
 0x29e   : > { %v2946_v24 = vpop.f32.mrf.mxu3  ;;  %v2612_v59 = vadd.f32 %v2611_v7, %v6441_v54  ;;  %v1470_v54 = vcvt.s32.f32 %v958_v57 }
 0x29f   : > { %v6012_v26 = vadd.f32 %v2946_v24, %v2778_v51  ;;  %v3118_v6 = vpop.f32.mrf.mxu0  ;;  %v1461_v51 = vcvt.s32.f32 %v949_v29 }
 0x2a0   : > { %2650 = vmatmul.bf16.gmra.mxu1 %v1724_v33  ;;  %2819 = vmatmul.bf16.gmra.mxu2 %v1725_v55  ;;  %v1468_v33 = vcvt.s32.f32 %v956_v48  ;;  %v1469_v55 = vcvt.s32.f32 %v957_v52 }
 0x2a1   : > { %6440 = vst [vmem:[#allocation27_spill] sm:$0xff] %v6012_v26 }
 0x2a2   : > { %3157 = vmatmul.bf16.gmra.mxu0 %v1727_v11  ;;  %v1732_v31 = vpack.c.bf16 %v1468_v33, %v1460_v10  ;;  %v1733_v27 = vpack.c.bf16 %v1469_v55, %v1461_v51  ;;  %v965_v10 = vunpack.c.2.s8 %v461_v39  ;;  %v973_v51 = vunpack.c.3.s8 %v461_v39 }
 0x2a3   : > { %2988 = vmatmul.bf16.gmra.mxu3 %v1726_v32  ;;  %v2780_v19 = vpop.f32.mrf.mxu2  ;;  %v1462_v32 = vcvt.s32.f32 %v950_v14  ;;  %v6445_v14 = vld [vmem:[#allocation33_spill] sm:$0xff] }
 0x2a4   : > { %v2781_v22 = vadd.f32 %v2780_v19, %v2612_v59  ;;  %v6444_v59 = vld [vmem:[#allocation31_spill] sm:$0xff] }
 0x2a5   : > { %v2613_v4 = vpop.f32.mrf.mxu1  ;;  %v1734_v29 = vpack.c.bf16 %v1470_v54, %v1462_v32  ;;  %v1485_v54 = vcvt.s32.f32 %v973_v51 }
 0x2a6   : > { %v2949_v58 = vpop.f32.mrf.mxu3  ;;  %v2614_v11 = vadd.f32 %v2613_v4, %v6444_v59  ;;  %v964_v4 = vunpack.c.2.s8 %v460_v25  ;;  %v972_v59 = vunpack.c.3.s8 %v460_v25 }
 0x2a7   : > { %v2950_v50 = vadd.f32 %v2949_v58, %v2781_v22  ;;  %v6021_v7 = vpop.f32.mrf.mxu0  ;;  %v1463_v22 = vcvt.s32.f32 %v951_v2  ;;  %v966_v2 = vunpack.c.2.s8 %v462_v20 }
 0x2a8   : > { %6443 = vst [vmem:[#allocation46_spill] sm:$0xff] %v6021_v7 }
 0x2a9   : > { %v6019_v24 = vadd.f32 %v3118_v6, %v2950_v50  ;;  %v1735_v58 = vpack.c.bf16 %v1471_v1, %v1463_v22  ;;  %v975_v22 = vunpack.c.3.s8 %v463_v45  ;;  %v1478_v25 = vcvt.s32.f32 %v966_v2  ;;  %v4832_v2 = vld [vmem:[#allocation8 + $0x8] sm:$0xff] }
 0x2aa   : > { %3981 = vmatpush.bf16.msra.mxu0 %v4832_v2 }
 0x2ab   : > { %6442 = vst [vmem:[#allocation29_spill] sm:$0xff] %v6019_v24  ;;  %v2782_v19 = vpop.f32.mrf.mxu2 }
 0x2ac   : > { %v2783_v60 = vadd.f32 %v2782_v19, %v2614_v11  ;;  %v967_v19 = vunpack.c.2.s8 %v463_v45 }
 0x2ad   : > { %v2616_v48 = vpop.f32.mrf.mxu1 }
 0x2ae   : > { %v2951_v26 = vpop.f32.mrf.mxu3  ;;  %v2617_v57 = vadd.f32 %v2616_v48, %v6445_v14  ;;  %v1486_v48 = vcvt.s32.f32 %v974_v34  ;;  %v6450_v34 = vld [vmem:[#allocation37_spill] sm:$0xff] }
 0x2af   : > { %v6024_v6 = vadd.f32 %v2951_v26, %v2783_v60  ;;  %v3123_v52 = vpop.f32.mrf.mxu0  ;;  %v1476_v26 = vcvt.s32.f32 %v964_v4  ;;  %v1479_v4 = vcvt.s32.f32 %v967_v19 }
 0x2b0   : > { %2655 = vmatmul.bf16.gmra.mxu1 %v1732_v31  ;;  %2824 = vmatmul.bf16.gmra.mxu2 %v1733_v27  ;;  %v1484_v31 = vcvt.s32.f32 %v972_v59  ;;  %v1477_v27 = vcvt.s32.f32 %v965_v10  ;;  %v1742_v10 = vpack.c.bf16 %v1486_v48, %v1478_v25 }
 0x2b2   : > { %3162 = vmatmul.bf16.gmra.mxu0 %v1735_v58  ;;  %v1740_v14 = vpack.c.bf16 %v1484_v31, %v1476_v26  ;;  %v346_v26 = vld [vmem:[%s5468_s6 + $0x38] sm:$0xff] }
 0x2b3   : > { %2993 = vmatmul.bf16.gmra.mxu3 %v1734_v29  ;;  %v2785_v50 = vpop.f32.mrf.mxu2  ;;  %v6448_v29 = vld [vmem:[#allocation35_spill] sm:$0xff] }
 0x2b4   : > { %v2786_v33 = vadd.f32 %v2785_v50, %v2617_v57  ;;  %v1741_v50 = vpack.c.bf16 %v1485_v54, %v1477_v27 }
 0x2b5   : > { %v2618_v55 = vpop.f32.mrf.mxu1 }
 0x2b6   : > { %v2954_v11 = vpop.f32.mrf.mxu3  ;;  %v2619_v58 = vadd.f32 %v2618_v55, %v6448_v29  ;;  %v345_v55 = vld [vmem:[%s5468_s6 + $0x30] sm:$0xff] }
 0x2b7   : > { %v2955_v60 = vadd.f32 %v2954_v11, %v2786_v33  ;;  %v6029_v1 = vpop.f32.mrf.mxu0  ;;  %v344_v11 = vld [vmem:[%s5468_s6 + $0x28] sm:$0xff]  ;;  %v481_v25 = vunpack.c.1.s8 %v345_v55 }
 0x2b8   : > { %6447 = vst [vmem:[#allocation33_spill] sm:$0xff] %v6029_v1  ;;  %v472_v29 = vunpack.c.0.s8 %v344_v11  ;;  %v480_v19 = vunpack.c.1.s8 %v344_v11 }
 0x2b9   : > { %v6027_v32 = vadd.f32 %v3123_v52, %v2955_v60  ;;  %v1487_v52 = vcvt.s32.f32 %v975_v22  ;;  %v473_v22 = vunpack.c.0.s8 %v345_v55 }
 0x2bb   : > { %6446 = vst [vmem:[#allocation31_spill] sm:$0xff] %v6027_v32  ;;  %v2787_v39 = vpop.f32.mrf.mxu2  ;;  %v1743_v45 = vpack.c.bf16 %v1487_v52, %v1479_v4  ;;  %v985_v4 = vcvt.s32.f32 %v473_v22  ;;  %v993_v52 = vcvt.s32.f32 %v481_v25  ;;  %v488_v22 = vunpack.c.2.s8 %v344_v11 }
 0x2bc   : > { %v2788_v20 = vadd.f32 %v2787_v39, %v2619_v58  ;;  %v474_v58 = vunpack.c.0.s8 %v346_v26  ;;  %v482_v39 = vunpack.c.1.s8 %v346_v26 }
 0x2bd   : > { %v2621_v59 = vpop.f32.mrf.mxu1 }
 0x2be   : > { %v2956_v57 = vpop.f32.mrf.mxu3  ;;  %v2622_v60 = vadd.f32 %v2621_v59, %v6450_v34  ;;  %v994_v2 = vcvt.s32.f32 %v482_v39  ;;  %v6453_v34 = vld [vmem:[#allocation39_spill] sm:$0xff]  ;;  %v489_v39 = vunpack.c.2.s8 %v345_v55 }
 0x2bf   : > { %v6032_v33 = vadd.f32 %v2956_v57, %v2788_v20  ;;  %v3128_v51 = vpop.f32.mrf.mxu0  ;;  %v984_v20 = vcvt.s32.f32 %v472_v29  ;;  %v6455_v29 = vld [vmem:[#allocation13_spill] sm:$0xff] }
 0x2c0   : > { %2660 = vmatmul.bf16.gmra.mxu1 %v1740_v14  ;;  %2829 = vmatmul.bf16.gmra.mxu2 %v1741_v50  ;;  %v992_v50 = vcvt.s32.f32 %v480_v19 }
 0x2c1   : > { %6449 = vst [vmem:[#allocation35_spill] sm:$0xff] %v6032_v33  ;;  %v1497_v33 = vpack.c.bf16 %v993_v52, %v985_v4  ;;  %v1000_v52 = vcvt.s32.f32 %v488_v22  ;;  %v352_v22 = vld [vmem:[%s5468_s6 + $0x68] sm:$0xff] }
 0x2c2   : > { %3167 = vmatmul.bf16.gmra.mxu0 %v1743_v45  ;;  %v1496_v1 = vpack.c.bf16 %v992_v50, %v984_v20  ;;  %v490_v20 = vunpack.c.2.s8 %v346_v26  ;;  %v498_v50 = vunpack.c.3.s8 %v346_v26 }
 0x2c3   : > { %2998 = vmatmul.bf16.gmra.mxu3 %v1742_v10  ;;  %v2790_v31 = vpop.f32.mrf.mxu2  ;;  %v986_v10 = vcvt.s32.f32 %v474_v58 }
 0x2c4   : > { %v2791_v27 = vadd.f32 %v2790_v31, %v2622_v60 }
 0x2c5   : > { %v2623_v48 = vpop.f32.mrf.mxu1  ;;  %v1498_v7 = vpack.c.bf16 %v994_v2, %v986_v10  ;;  %v1010_v2 = vcvt.s32.f32 %v498_v50 }
 0x2c6   : > { %v2959_v54 = vpop.f32.mrf.mxu3  ;;  %v2624_v60 = vadd.f32 %v2623_v48, %v6453_v34  ;;  %v496_v48 = vunpack.c.3.s8 %v344_v11 }
 0x2c7   : > { %v2960_v14 = vadd.f32 %v2959_v54, %v2791_v27  ;;  %v6040_v59 = vpop.f32.mrf.mxu0 }
 0x2c8   : > { %6452 = vst [vmem:[#allocation47_spill] sm:$0xff] %v6040_v59 }
 0x2c9   : > { %v6038_v57 = vadd.f32 %v3128_v51, %v2960_v14  ;;  %v497_v14 = vunpack.c.3.s8 %v345_v55 }
 0x2cb   : > { %6451 = vst [vmem:[#allocation37_spill] sm:$0xff] %v6038_v57  ;;  %v2792_v45 = vpop.f32.mrf.mxu2 }
 0x2cc   : > { %v2793_v31 = vadd.f32 %v2792_v45, %v2624_v60  ;;  %v6458_v60 = vld [vmem:[#allocation14_spill] sm:$0xff] }
 0x2cd   : > { %v2626_v24 = vpop.f32.mrf.mxu1 }
 0x2ce   : > { %v2961_v32 = vpop.f32.mrf.mxu3  ;;  %v2627_v54 = vadd.f32 %v2626_v24, %v6455_v29  ;;  %v1002_v24 = vcvt.s32.f32 %v490_v20  ;;  %v504_v20 = vunpack.c.0.s8 %v352_v22 }
 0x2cf   : > { %v6043_v27 = vadd.f32 %v2961_v32, %v2793_v31  ;;  %v3133_v51 = vpop.f32.mrf.mxu0 }
 0x2d0   : > { %3181 = vmatmul.bf16.vlgmr.msra.gmra.mxu1 %v1496_v1  ;;  %3350 = vmatmul.bf16.vlgmr.msra.gmra.mxu2 %v1497_v33  ;;  %v1008_v1 = vcvt.s32.f32 %v496_v48  ;;  %v1001_v33 = vcvt.s32.f32 %v489_v39  ;;  %v6460_v48 = vld [vmem:[#allocation15_spill] sm:$0xff] }
 0x2d1   : > { %6454 = vst [vmem:[#allocation39_spill] sm:$0xff] %v6043_v27 }
 0x2d2   : > { %v1504_v26 = vpack.c.bf16 %v1008_v1, %v1000_v52 }
 0x2d3   : > { %3519 = vmatmul.bf16.vlgmr.msra.gmra.mxu3 %v1498_v7  ;;  %v2795_v19 = vpop.f32.mrf.mxu2  ;;  %v1009_v7 = vcvt.s32.f32 %v497_v14  ;;  %v354_v14 = vld [vmem:[%s5468_s6 + $0x78] sm:$0xff] }
 0x2d4   : > { %v2796_v25 = vadd.f32 %v2795_v19, %v2627_v54 }
 0x2d5   : > { %v2628_v34 = vpop.f32.mrf.mxu1  ;;  %v1505_v29 = vpack.c.bf16 %v1009_v7, %v1001_v33  ;;  %v506_v7 = vunpack.c.0.s8 %v354_v14 }
 0x2d6   : > { %v2964_v58 = vpop.f32.mrf.mxu3  ;;  %v2629_v11 = vadd.f32 %v2628_v34, %v6458_v60  ;;  %v512_v60 = vunpack.c.1.s8 %v352_v22 }
 0x2d7   : > { %v2965_v4 = vadd.f32 %v2964_v58, %v2796_v25  ;;  %v6048_v10 = vpop.f32.mrf.mxu0  ;;  %v353_v58 = vld [vmem:[%s5468_s6 + $0x70] sm:$0xff] }
 0x2d8   : > { %6457 = vst [vmem:[#allocation48_spill] sm:$0xff] %v6048_v10  ;;  %v505_v52 = vunpack.c.0.s8 %v353_v58  ;;  %v513_v1 = vunpack.c.1.s8 %v353_v58 }
 0x2d9   : > { %v6046_v32 = vadd.f32 %v3133_v51, %v2965_v4  ;;  %v1506_v51 = vpack.c.bf16 %v1010_v2, %v1002_v24  ;;  %v514_v24 = vunpack.c.1.s8 %v354_v14 }
 0x2db   : > { %6456 = vst [vmem:[#allocation13_spill] sm:$0xff] %v6046_v32  ;;  %v2797_v55 = vpop.f32.mrf.mxu2 }
 0x2dc   : > { %v2798_v45 = vadd.f32 %v2797_v55, %v2629_v11  ;;  %v1016_v11 = vcvt.s32.f32 %v504_v20  ;;  %v6465_v20 = vld [vmem:[#allocation18_spill] sm:$0xff] }
 0x2dd   : > { %v2631_v54 = vpop.f32.mrf.mxu1 }
 0x2de   : > { %v2966_v31 = vpop.f32.mrf.mxu3  ;;  %v2632_v39 = vadd.f32 %v2631_v54, %v6460_v48  ;;  %v1018_v54 = vcvt.s32.f32 %v506_v7  ;;  %v6463_v48 = vld [vmem:[#allocation16_spill] sm:$0xff] }
 0x2df   : > { %v6051_v19 = vadd.f32 %v2966_v31, %v2798_v45  ;;  %v3138_v25 = vpop.f32.mrf.mxu0  ;;  %v1024_v45 = vcvt.s32.f32 %v512_v60  ;;  %v1017_v31 = vcvt.s32.f32 %v505_v52  ;;  %v520_v52 = vunpack.c.2.s8 %v352_v22 }
 0x2e0   : > { %3186 = vmatmul.bf16.gmra.mxu1 %v1504_v26  ;;  %3355 = vmatmul.bf16.gmra.mxu2 %v1505_v29  ;;  %v1025_v26 = vcvt.s32.f32 %v513_v1 }
 0x2e1   : > { %6459 = vst [vmem:[#allocation14_spill] sm:$0xff] %v6051_v19  ;;  %v1512_v19 = vpack.c.bf16 %v1024_v45, %v1016_v11  ;;  %v522_v11 = vunpack.c.2.s8 %v354_v14  ;;  %v530_v45 = vunpack.c.3.s8 %v354_v14 }
 0x2e2   : > { %v1513_v57 = vpack.c.bf16 %v1025_v26, %v1017_v31  ;;  %v1032_v26 = vcvt.s32.f32 %v520_v52  ;;  %v360_v52 = vld [vmem:[%s5468_s6 + $0xa8] sm:$0xff] }
 0x2e3   : > { %3524 = vmatmul.bf16.gmra.mxu3 %v1506_v51  ;;  %v2800_v34 = vpop.f32.mrf.mxu2  ;;  %v1026_v51 = vcvt.s32.f32 %v514_v24  ;;  %v521_v24 = vunpack.c.2.s8 %v353_v58 }
 0x2e4   : > { %v2801_v50 = vadd.f32 %v2800_v34, %v2632_v39 }
 0x2e5   : > { %v2633_v33 = vpop.f32.mrf.mxu1  ;;  %v1514_v27 = vpack.c.bf16 %v1026_v51, %v1018_v54  ;;  %v1042_v54 = vcvt.s32.f32 %v530_v45  ;;  %v6468_v51 = vld [vmem:[#allocation20_spill] sm:$0xff]  ;;  %v536_v45 = vunpack.c.0.s8 %v360_v52 }
 0x2e6   : > { %v2969_v4 = vpop.f32.mrf.mxu3  ;;  %v2634_v39 = vadd.f32 %v2633_v33, %v6463_v48  ;;  %v528_v33 = vunpack.c.3.s8 %v352_v22 }
 0x2e7   : > { %v2970_v2 = vadd.f32 %v2969_v4, %v2801_v50  ;;  %v6059_v29 = vpop.f32.mrf.mxu0 }
 0x2e8   : > { %6462 = vst [vmem:[#allocation49_spill] sm:$0xff] %v6059_v29 }
 0x2e9   : > { %v6057_v55 = vadd.f32 %v3138_v25, %v2970_v2  ;;  %v529_v2 = vunpack.c.3.s8 %v353_v58 }
 0x2eb   : > { %6461 = vst [vmem:[#allocation15_spill] sm:$0xff] %v6057_v55  ;;  %v2802_v34 = vpop.f32.mrf.mxu2 }
 0x2ec   : > { %v2803_v32 = vadd.f32 %v2802_v34, %v2634_v39 }
 0x2ed   : > { %v2636_v59 = vpop.f32.mrf.mxu1 }
 0x2ee   : > { %v2971_v10 = vpop.f32.mrf.mxu3  ;;  %v2637_v4 = vadd.f32 %v2636_v59, %v6465_v20  ;;  %v1034_v59 = vcvt.s32.f32 %v522_v11 }
 0x2ef   : > { %v6062_v50 = vadd.f32 %v2971_v10, %v2803_v32  ;;  %v3143_v25 = vpop.f32.mrf.mxu0  ;;  %v1040_v10 = vcvt.s32.f32 %v528_v33  ;;  %v4831_v33 = vld [vmem:[#allocation8] sm:$0xff] }
 0x2f0   : > { %3191 = vmatmul.bf16.gmra.mxu1 %v1512_v19  ;;  %3360 = vmatmul.bf16.gmra.mxu2 %v1513_v57  ;;  %v1033_v57 = vcvt.s32.f32 %v521_v24  ;;  %v6470_v24 = vld [vmem:[#allocation22_spill] sm:$0xff] }
 0x2f1   : > { %6464 = vst [vmem:[#allocation16_spill] sm:$0xff] %v6062_v50  ;;  %v1520_v14 = vpack.c.bf16 %v1040_v10, %v1032_v26  ;;  %3982 = vmatpush.bf16.msra.mxu0 %v4831_v33  ;;  %v544_v10 = vunpack.c.1.s8 %v360_v52  ;;  %v6473_v33 = vld [vmem:[#allocation24_spill] sm:$0xff] }
 0x2f3   : > { %3529 = vmatmul.bf16.gmra.mxu3 %v1514_v27  ;;  %v2805_v60 = vpop.f32.mrf.mxu2  ;;  %v1041_v27 = vcvt.s32.f32 %v529_v2 }
 0x2f4   : > { %v2806_v1 = vadd.f32 %v2805_v60, %v2637_v4 }
 0x2f5   : > { %v2638_v48 = vpop.f32.mrf.mxu1  ;;  %v1521_v20 = vpack.c.bf16 %v1041_v27, %v1033_v57 }
 0x2f6   : > { %v2974_v7 = vpop.f32.mrf.mxu3  ;;  %v2639_v22 = vadd.f32 %v2638_v48, %v6468_v51  ;;  %v362_v48 = vld [vmem:[%s5468_s6 + $0xb8] sm:$0xff] }
 0x2f7   : > { %v2975_v31 = vadd.f32 %v2974_v7, %v2806_v1  ;;  %v6067_v19 = vpop.f32.mrf.mxu0  ;;  %v361_v7 = vld [vmem:[%s5468_s6 + $0xb0] sm:$0xff]  ;;  %v546_v51 = vunpack.c.1.s8 %v362_v48 }
 0x2f8   : > { %6467 = vst [vmem:[#allocation50_spill] sm:$0xff] %v6067_v19  ;;  %v537_v57 = vunpack.c.0.s8 %v361_v7  ;;  %v545_v27 = vunpack.c.1.s8 %v361_v7 }
 0x2f9   : > { %v6065_v32 = vadd.f32 %v3143_v25, %v2975_v31  ;;  %v1522_v25 = vpack.c.bf16 %v1042_v54, %v1034_v59  ;;  %v538_v54 = vunpack.c.0.s8 %v362_v48 }
 0x2fb   : > { %6466 = vst [vmem:[#allocation18_spill] sm:$0xff] %v6065_v32  ;;  %v2807_v39 = vpop.f32.mrf.mxu2 }
 0x2fc   : > { %v2808_v58 = vadd.f32 %v2807_v39, %v2639_v22  ;;  %v1048_v39 = vcvt.s32.f32 %v536_v45  ;;  %v6475_v45 = vld [vmem:[#allocation26_spill] sm:$0xff] }
 0x2fd   : > { %v2641_v4 = vpop.f32.mrf.mxu1 }
 0x2fe   : > { %v2976_v34 = vpop.f32.mrf.mxu3  ;;  %v2642_v2 = vadd.f32 %v2641_v4, %v6470_v24  ;;  %v1058_v24 = vcvt.s32.f32 %v546_v51  ;;  %v553_v51 = vunpack.c.2.s8 %v361_v7 }
 0x2ff   : > { %v6070_v60 = vadd.f32 %v2976_v34, %v2808_v58  ;;  %v3148_v1 = vpop.f32.mrf.mxu0  ;;  %v1056_v34 = vcvt.s32.f32 %v544_v10 }
 0x300   : > { %3196 = vmatmul.bf16.gmra.mxu1 %v1520_v14  ;;  %3365 = vmatmul.bf16.gmra.mxu2 %v1521_v20  ;;  %v1049_v14 = vcvt.s32.f32 %v537_v57  ;;  %v1057_v20 = vcvt.s32.f32 %v545_v27  ;;  %v552_v57 = vunpack.c.2.s8 %v360_v52 }
 0x301   : > { %6469 = vst [vmem:[#allocation20_spill] sm:$0xff] %v6070_v60  ;;  %v1528_v60 = vpack.c.bf16 %v1056_v34, %v1048_v39  ;;  %v554_v39 = vunpack.c.2.s8 %v362_v48  ;;  %v562_v34 = vunpack.c.3.s8 %v362_v48 }
 0x302   : > { %v1529_v55 = vpack.c.bf16 %v1057_v20, %v1049_v14  ;;  %v1064_v20 = vcvt.s32.f32 %v552_v57  ;;  %v368_v57 = vld [vmem:[%s5468_s6 + $0xe8] sm:$0xff] }
 0x303   : > { %3534 = vmatmul.bf16.gmra.mxu3 %v1522_v25  ;;  %v2810_v11 = vpop.f32.mrf.mxu2  ;;  %v1050_v25 = vcvt.s32.f32 %v538_v54 }
 0x304   : > { %v2811_v31 = vadd.f32 %v2810_v11, %v2642_v2 }
 0x305   : > { %v2643_v59 = vpop.f32.mrf.mxu1  ;;  %v1530_v50 = vpack.c.bf16 %v1058_v24, %v1050_v25  ;;  %v1074_v25 = vcvt.s32.f32 %v562_v34  ;;  %v6478_v24 = vld [vmem:[#allocation28_spill] sm:$0xff] }
 0x306   : > { %v2979_v26 = vpop.f32.mrf.mxu3  ;;  %v2644_v2 = vadd.f32 %v2643_v59, %v6473_v33  ;;  %v560_v59 = vunpack.c.3.s8 %v360_v52 }
 0x307   : > { %v2980_v22 = vadd.f32 %v2979_v26, %v2811_v31  ;;  %v6078_v4 = vpop.f32.mrf.mxu0 }
 0x308   : > { %6472 = vst [vmem:[#allocation51_spill] sm:$0xff] %v6078_v4 }
 0x309   : > { %v6076_v58 = vadd.f32 %v3148_v1, %v2980_v22  ;;  %v561_v22 = vunpack.c.3.s8 %v361_v7 }
 0x30b   : > { %6471 = vst [vmem:[#allocation22_spill] sm:$0xff] %v6076_v58  ;;  %v2812_v11 = vpop.f32.mrf.mxu2 }
 0x30c   : > { %v2813_v32 = vadd.f32 %v2812_v11, %v2644_v2 }
 0x30d   : > { %v2646_v29 = vpop.f32.mrf.mxu1 }
 0x30e   : > { %v2981_v19 = vpop.f32.mrf.mxu3  ;;  %v2647_v26 = vadd.f32 %v2646_v29, %v6475_v45  ;;  %v1066_v29 = vcvt.s32.f32 %v554_v39  ;;  %v568_v39 = vunpack.c.0.s8 %v368_v57 }
 0x30f   : > { %v6081_v31 = vadd.f32 %v2981_v19, %v2813_v32  ;;  %v3153_v1 = vpop.f32.mrf.mxu0  ;;  %v1072_v19 = vcvt.s32.f32 %v560_v59  ;;  %v6480_v59 = vld [vmem:[#allocation30_spill] sm:$0xff] }
 0x310   : > { %3201 = vmatmul.bf16.gmra.mxu1 %v1528_v60  ;;  %3370 = vmatmul.bf16.gmra.mxu2 %v1529_v55  ;;  %v1065_v55 = vcvt.s32.f32 %v553_v51 }
 0x311   : > { %6474 = vst [vmem:[#allocation24_spill] sm:$0xff] %v6081_v31  ;;  %v1536_v48 = vpack.c.bf16 %v1072_v19, %v1064_v20 }
 0x313   : > { %3539 = vmatmul.bf16.gmra.mxu3 %v1530_v50  ;;  %v2815_v10 = vpop.f32.mrf.mxu2  ;;  %v1073_v50 = vcvt.s32.f32 %v561_v22  ;;  %v370_v22 = vld [vmem:[%s5468_s6 + $0xf8] sm:$0xff] }
 0x314   : > { %v2816_v27 = vadd.f32 %v2815_v10, %v2647_v26 }
 0x315   : > { %v2648_v33 = vpop.f32.mrf.mxu1  ;;  %v1537_v45 = vpack.c.bf16 %v1073_v50, %v1065_v55  ;;  %v570_v50 = vunpack.c.0.s8 %v370_v22 }
 0x316   : > { %v2984_v54 = vpop.f32.mrf.mxu3  ;;  %v2649_v52 = vadd.f32 %v2648_v33, %v6478_v24  ;;  %v576_v24 = vunpack.c.1.s8 %v368_v57 }
 0x317   : > { %v2985_v14 = vadd.f32 %v2984_v54, %v2816_v27  ;;  %v6086_v60 = vpop.f32.mrf.mxu0  ;;  %v369_v54 = vld [vmem:[%s5468_s6 + $0xf0] sm:$0xff] }
 0x318   : > { %6477 = vst [vmem:[#allocation52_spill] sm:$0xff] %v6086_v60  ;;  %v569_v20 = vunpack.c.0.s8 %v369_v54  ;;  %v577_v19 = vunpack.c.1.s8 %v369_v54 }
 0x319   : > { %v6084_v32 = vadd.f32 %v3153_v1, %v2985_v14  ;;  %v1538_v1 = vpack.c.bf16 %v1074_v25, %v1066_v29  ;;  %v578_v29 = vunpack.c.1.s8 %v370_v22 }
 0x31b   : > { %6476 = vst [vmem:[#allocation26_spill] sm:$0xff] %v6084_v32  ;;  %v2817_v7 = vpop.f32.mrf.mxu2 }
 0x31c   : > { %v2818_v2 = vadd.f32 %v2817_v7, %v2649_v52  ;;  %v1080_v52 = vcvt.s32.f32 %v568_v39  ;;  %v6484_v39 = vld [vmem:[#allocation34_spill] sm:$0xff] }
 0x31d   : > { %v2651_v26 = vpop.f32.mrf.mxu1 }
 0x31e   : > { %v2986_v11 = vpop.f32.mrf.mxu3  ;;  %v2652_v51 = vadd.f32 %v2651_v26, %v6480_v59  ;;  %v1082_v26 = vcvt.s32.f32 %v570_v50  ;;  %v6483_v59 = vld [vmem:[#allocation32_spill] sm:$0xff] }
 0x31f   : > { %v6089_v10 = vadd.f32 %v2986_v11, %v2818_v2  ;;  %v3158_v27 = vpop.f32.mrf.mxu0  ;;  %v1088_v2 = vcvt.s32.f32 %v576_v24  ;;  %v1081_v11 = vcvt.s32.f32 %v569_v20  ;;  %v584_v20 = vunpack.c.2.s8 %v368_v57 }
 0x320   : > { %3206 = vmatmul.bf16.gmra.mxu1 %v1536_v48  ;;  %3375 = vmatmul.bf16.gmra.mxu2 %v1537_v45  ;;  %v1089_v48 = vcvt.s32.f32 %v577_v19 }
 0x321   : > { %6479 = vst [vmem:[#allocation28_spill] sm:$0xff] %v6089_v10  ;;  %v1544_v10 = vpack.c.bf16 %v1088_v2, %v1080_v52  ;;  %v586_v52 = vunpack.c.2.s8 %v370_v22  ;;  %v594_v2 = vunpack.c.3.s8 %v370_v22 }
 0x322   : > { %v1545_v58 = vpack.c.bf16 %v1089_v48, %v1081_v11  ;;  %v1096_v48 = vcvt.s32.f32 %v584_v20  ;;  %v376_v20 = vld [vmem:[%s5468_s6 + $0x128] sm:$0xff] }
 0x323   : > { %3544 = vmatmul.bf16.gmra.mxu3 %v1538_v1  ;;  %v2820_v33 = vpop.f32.mrf.mxu2  ;;  %v1090_v1 = vcvt.s32.f32 %v578_v29  ;;  %v585_v29 = vunpack.c.2.s8 %v369_v54 }
 0x324   : > { %v2821_v34 = vadd.f32 %v2820_v33, %v2652_v51 }
 0x325   : > { %v2653_v55 = vpop.f32.mrf.mxu1  ;;  %v1546_v31 = vpack.c.bf16 %v1090_v1, %v1082_v26  ;;  %v6486_v26 = vld [vmem:[#allocation36_spill] sm:$0xff] }
 0x326   : > { %v2989_v14 = vpop.f32.mrf.mxu3  ;;  %v2654_v51 = vadd.f32 %v2653_v55, %v6483_v59  ;;  %v592_v55 = vunpack.c.3.s8 %v368_v57 }
 0x327   : > { %v2990_v25 = vadd.f32 %v2989_v14, %v2821_v34  ;;  %v6097_v45 = vpop.f32.mrf.mxu0 }
 0x328   : > { %6482 = vst [vmem:[#allocation53_spill] sm:$0xff] %v6097_v45 }
 0x329   : > { %v6095_v7 = vadd.f32 %v3158_v27, %v2990_v25  ;;  %v593_v25 = vunpack.c.3.s8 %v369_v54 }
 0x32b   : > { %6481 = vst [vmem:[#allocation30_spill] sm:$0xff] %v6095_v7  ;;  %v2822_v33 = vpop.f32.mrf.mxu2 }
 0x32c   : > { %v2823_v32 = vadd.f32 %v2822_v33, %v2654_v51 }
 0x32d   : > { %v2656_v4 = vpop.f32.mrf.mxu1 }
 0x32e   : > { %v2991_v60 = vpop.f32.mrf.mxu3  ;;  %v2657_v14 = vadd.f32 %v2656_v4, %v6484_v39  ;;  %v1106_v4 = vcvt.s32.f32 %v594_v2 }
 0x32f   : > { %v6100_v34 = vadd.f32 %v2991_v60, %v2823_v32  ;;  %v3163_v27 = vpop.f32.mrf.mxu0  ;;  %v1104_v60 = vcvt.s32.f32 %v592_v55 }
 0x330   : > { %3211 = vmatmul.bf16.gmra.mxu1 %v1544_v10  ;;  %3380 = vmatmul.bf16.gmra.mxu2 %v1545_v58  ;;  %v1097_v58 = vcvt.s32.f32 %v585_v29  ;;  %v1098_v10 = vcvt.s32.f32 %v586_v52  ;;  %v378_v29 = vld [vmem:[%s5468_s6 + $0x138] sm:$0xff] }
 0x331   : > { %v1552_v22 = vpack.c.bf16 %v1104_v60, %v1096_v48 }
 0x333   : > { %3549 = vmatmul.bf16.gmra.mxu3 %v1546_v31  ;;  %v2825_v24 = vpop.f32.mrf.mxu2  ;;  %v1105_v31 = vcvt.s32.f32 %v593_v25 }
 0x334   : > { %v2826_v19 = vadd.f32 %v2825_v24, %v2657_v14 }
 0x335   : > { %v2658_v59 = vpop.f32.mrf.mxu1  ;;  %v1553_v39 = vpack.c.bf16 %v1105_v31, %v1097_v58  ;;  %v602_v31 = vunpack.c.0.s8 %v378_v29 }
 0x336   : > { %v2994_v50 = vpop.f32.mrf.mxu3  ;;  %v2659_v1 = vadd.f32 %v2658_v59, %v6486_v26  ;;  %v600_v59 = vunpack.c.0.s8 %v376_v20 }
 0x337   : > { %v2995_v11 = vadd.f32 %v2994_v50, %v2826_v19  ;;  %v6106_v51 = vpop.f32.mrf.mxu0  ;;  %v377_v19 = vld [vmem:[%s5468_s6 + $0x130] sm:$0xff]  ;;  %v6489_v50 = vld [vmem:[#allocation38_spill] sm:$0xff] }
 0x338   : > { %6487 = vst [vmem:[#allocation34_spill] sm:$0xff] %v6106_v51  ;;  %v601_v26 = vunpack.c.0.s8 %v377_v19  ;;  %v609_v48 = vunpack.c.1.s8 %v377_v19 }
 0x339   : > { %v6103_v32 = vadd.f32 %v3163_v27, %v2995_v11  ;;  %v1554_v27 = vpack.c.bf16 %v1106_v4, %v1098_v10  ;;  %v608_v11 = vunpack.c.1.s8 %v376_v20  ;;  %v610_v10 = vunpack.c.1.s8 %v378_v29 }
 0x33b   : > { %6485 = vst [vmem:[#allocation32_spill] sm:$0xff] %v6103_v32  ;;  %v2827_v57 = vpop.f32.mrf.mxu2 }
 0x33c   : > { %v2828_v54 = vadd.f32 %v2827_v57, %v2659_v1  ;;  %v1112_v1 = vcvt.s32.f32 %v600_v59 }
 0x33d   : > { %v2661_v14 = vpop.f32.mrf.mxu1 }
 0x33e   : > { %v2996_v33 = vpop.f32.mrf.mxu3  ;;  %v2662_v55 = vadd.f32 %v2661_v14, %v6489_v50  ;;  %v1122_v14 = vcvt.s32.f32 %v610_v10  ;;  %v6492_v10 = vld [vmem:[#allocation40_spill] sm:$0xff] }
 0x33f   : > { %v6108_v24 = vadd.f32 %v2996_v33, %v2828_v54  ;;  %v3168_v58 = vpop.f32.mrf.mxu0  ;;  %v1120_v54 = vcvt.s32.f32 %v608_v11  ;;  %v1113_v33 = vcvt.s32.f32 %v601_v26  ;;  %v624_v11 = vunpack.c.3.s8 %v376_v20 }
 0x340   : > { %3216 = vmatmul.bf16.gmra.mxu1 %v1552_v22  ;;  %3385 = vmatmul.bf16.gmra.mxu2 %v1553_v39  ;;  %v1121_v22 = vcvt.s32.f32 %v609_v48  ;;  %v1114_v39 = vcvt.s32.f32 %v602_v31  ;;  %v617_v26 = vunpack.c.2.s8 %v377_v19  ;;  %v625_v48 = vunpack.c.3.s8 %v377_v19 }
 0x341   : > { %6488 = vst [vmem:[#allocation36_spill] sm:$0xff] %v6108_v24  ;;  %v1560_v32 = vpack.c.bf16 %v1120_v54, %v1112_v1  ;;  %v1136_v1 = vcvt.s32.f32 %v624_v11  ;;  %v384_v11 = vld [vmem:[%s5468_s6 + $0x168] sm:$0xff] }
 0x342   : > { %v1561_v51 = vpack.c.bf16 %v1121_v22, %v1113_v33  ;;  %v1562_v7 = vpack.c.bf16 %v1122_v14, %v1114_v39  ;;  %v1129_v54 = vcvt.s32.f32 %v617_v26  ;;  %v1137_v33 = vcvt.s32.f32 %v625_v48  ;;  %v385_v26 = vld [vmem:[%s5468_s6 + $0x170] sm:$0xff] }
 0x343   : > { %3554 = vmatmul.bf16.gmra.mxu3 %v1554_v27  ;;  %v2830_v25 = vpop.f32.mrf.mxu2 }
 0x344   : > { %v2831_v52 = vadd.f32 %v2830_v25, %v2662_v55 }
 0x345   : > { %v2663_v60 = vpop.f32.mrf.mxu1 }
 0x346   : > { %v2999_v2 = vpop.f32.mrf.mxu3  ;;  %v2664_v27 = vadd.f32 %v2663_v60, %v5664_v47  ;;  %v618_v47 = vunpack.c.2.s8 %v378_v29  ;;  %v626_v60 = vunpack.c.3.s8 %v378_v29 }
 0x347   : > { %v3000_v4 = vadd.f32 %v2999_v2, %v2831_v52  ;;  %v616_v52 = vunpack.c.2.s8 %v376_v20 }
 0x348   : > { %v1130_v22 = vcvt.s32.f32 %v618_v47 }
 0x349   : > { %v6114_v57 = vadd.f32 %v3168_v58, %v3000_v4  ;;  %v1128_v31 = vcvt.s32.f32 %v616_v52 }
 0x34b   : > { %6490 = vst [vmem:[#allocation38_spill] sm:$0xff] %v6114_v57  ;;  %v2832_v50 = vpop.f32.mrf.mxu2 }
 0x34c   : > { %v2833_v55 = vadd.f32 %v2832_v50, %v2664_v27  ;;  %v1568_v27 = vpack.c.bf16 %v1136_v1, %v1128_v31  ;;  %v1569_v50 = vpack.c.bf16 %v1137_v33, %v1129_v54 }
 0x34d   : > { %v3182_v24 = vpop.f32.mrf.mxu1 }
 0x34e   : > { %v3001_v25 = vpop.f32.mrf.mxu3  ;;  %v3183_v4 = vadd.f32 %v3182_v24, %v6492_v10  ;;  %v633_v10 = vunpack.c.0.s8 %v385_v26 }
 0x34f   : > { %v6117_v45 = vadd.f32 %v3001_v25, %v2833_v55 }
 0x350   : > { %3221 = vmatmul.bf16.gmra.mxu1 %v1560_v32  ;;  %3390 = vmatmul.bf16.gmra.mxu2 %v1561_v51  ;;  %v1138_v32 = vcvt.s32.f32 %v626_v60  ;;  %v640_v60 = vunpack.c.1.s8 %v384_v11 }
 0x351   : > { %6491 = vst [vmem:[#allocation54_spill] sm:$0xff] %v6117_v45 }
 0x352   : > { %v1570_v55 = vpack.c.bf16 %v1138_v32, %v1130_v22  ;;  %v1152_v22 = vcvt.s32.f32 %v640_v60  ;;  %v1145_v32 = vcvt.s32.f32 %v633_v10  ;;  %v649_v10 = vunpack.c.2.s8 %v385_v26 }
 0x353   : > { %3559 = vmatmul.bf16.gmra.mxu3 %v1562_v7  ;;  %v3351_v59 = vpop.f32.mrf.mxu2  ;;  %v6493_v7 = vld [vmem:[#allocation41_spill] sm:$0xff] }
 0x354   : > { %v3352_v51 = vadd.f32 %v3351_v59, %v3183_v4  ;;  %v386_v59 = vld [vmem:[%s5468_s6 + $0x178] sm:$0xff]  ;;  %v641_v4 = vunpack.c.1.s8 %v385_v26 }
 0x355   : > { %v3184_v58 = vpop.f32.mrf.mxu1  ;;  %v634_v1 = vunpack.c.0.s8 %v386_v59  ;;  %v642_v54 = vunpack.c.1.s8 %v386_v59 }
 0x356   : > { %v3520_v2 = vpop.f32.mrf.mxu3  ;;  %v3185_v39 = vadd.f32 %v3184_v58, %v6493_v7  ;;  %v632_v58 = vunpack.c.0.s8 %v384_v11 }
 0x357   : > { %v3521_v25 = vadd.f32 %v3520_v2, %v3352_v51  ;;  %v1153_v51 = vcvt.s32.f32 %v641_v4  ;;  %v1146_v7 = vcvt.s32.f32 %v634_v1  ;;  %v658_v1 = vunpack.c.3.s8 %v386_v59 }
 0x358   : > { %v1144_v33 = vcvt.s32.f32 %v632_v58 }
 0x35b   : > { %v3353_v14 = vpop.f32.mrf.mxu2 }
 0x35c   : > { %v3354_v20 = vadd.f32 %v3353_v14, %v3185_v39  ;;  %v1154_v39 = vcvt.s32.f32 %v642_v54 }
 0x35d   : > { %v3187_v29 = vpop.f32.mrf.mxu1 }
 0x35e   : > { %v3522_v19 = vpop.f32.mrf.mxu3  ;;  %v3188_v2 = vadd.f32 %v3187_v29, %v5691_v8  ;;  %v648_v29 = vunpack.c.2.s8 %v384_v11 }
 0x35f   : > { %v3523_v24 = vadd.f32 %v3522_v19, %v3354_v20 }
 0x360   : > { %3226 = vmatmul.bf16.gmra.mxu1 %v1568_v27  ;;  %3395 = vmatmul.bf16.gmra.mxu2 %v1569_v50  ;;  %v1160_v54 = vcvt.s32.f32 %v648_v29 }
 0x361   : > { %v3875_v52 = vpack.c.bf16 %v3523_v24, %v3521_v25  ;;  %v1577_v25 = vpack.c.bf16 %v1153_v51, %v1145_v32 }
 0x363   : > { %3564 = vmatmul.bf16.gmra.mxu3 %v1570_v55  ;;  %3983 = vmatmul.bf16.vlgmr.msra.gmra.mxu0 %v3875_v52  ;;  %v3356_v48 = vpop.f32.mrf.mxu2  ;;  %v1576_v55 = vpack.c.bf16 %v1152_v22, %v1144_v33  ;;  %v1578_v52 = vpack.c.bf16 %v1154_v39, %v1146_v7  ;;  %v6494_v33 = vld [vmem:[#allocation42_spill] sm:$0xff]  ;;  %v6495_v7 = vld [vmem:[#allocation43_spill] sm:$0xff] }
 0x364   : > { %v3357_v14 = vadd.f32 %v3356_v48, %v3188_v2  ;;  %v656_v48 = vunpack.c.3.s8 %v384_v11 }
 0x365   : > { %v3189_v31 = vpop.f32.mrf.mxu1 }
 0x366   : > { %v3525_v47 = vpop.f32.mrf.mxu3  ;;  %v3190_v20 = vadd.f32 %v3189_v31, %v5697_v44  ;;  %v657_v44 = vunpack.c.3.s8 %v385_v26  ;;  %v650_v31 = vunpack.c.2.s8 %v386_v59  ;;  %v1168_v22 = vcvt.s32.f32 %v656_v48 }
 0x367   : > { %v3526_v57 = vadd.f32 %v3525_v47, %v3357_v14  ;;  %v1161_v47 = vcvt.s32.f32 %v649_v10 }
 0x368   : > { %v1169_v32 = vcvt.s32.f32 %v657_v44 }
 0x36b   : > { %v3358_v19 = vpop.f32.mrf.mxu2 }
 0x36c   : > { %v3359_v27 = vadd.f32 %v3358_v19, %v3190_v20  ;;  %v1584_v20 = vpack.c.bf16 %v1168_v22, %v1160_v54  ;;  %v1585_v19 = vpack.c.bf16 %v1169_v32, %v1161_v47 }
 0x36d   : > { %v3192_v24 = vpop.f32.mrf.mxu1 }
 0x36e   : > { %v3527_v50 = vpop.f32.mrf.mxu3  ;;  %v3193_v2 = vadd.f32 %v3192_v24, %v6494_v33  ;;  %v392_v24 = vld [vmem:[%s5468_s6 + $0x1a8] sm:$0xff] }
 0x36f   : > { %v3528_v45 = vadd.f32 %v3527_v50, %v3359_v27  ;;  %v664_v29 = vunpack.c.0.s8 %v392_v24  ;;  %v672_v10 = vunpack.c.1.s8 %v392_v24 }
 0x370   : > { %3231 = vmatmul.bf16.gmra.mxu1 %v1576_v55  ;;  %3400 = vmatmul.bf16.gmra.mxu2 %v1577_v25 }
 0x371   : > { %v3876_v58 = vpack.c.bf16 %v3528_v45, %v3526_v57  ;;  %v1162_v45 = vcvt.s32.f32 %v650_v31  ;;  %v1170_v57 = vcvt.s32.f32 %v658_v1  ;;  %v1176_v33 = vcvt.s32.f32 %v664_v29 }
 0x373   : > { %3569 = vmatmul.bf16.gmra.mxu3 %v1578_v52  ;;  %3988 = vmatmul.bf16.gmra.mxu0 %v3876_v58  ;;  %v3361_v8 = vpop.f32.mrf.mxu2  ;;  %v1586_v27 = vpack.c.bf16 %v1170_v57, %v1162_v45  ;;  %v393_v52 = vld [vmem:[%s5468_s6 + $0x1b0] sm:$0xff]  ;;  %v394_v58 = vld [vmem:[%s5468_s6 + $0x1b8] sm:$0xff] }
 0x374   : > { %v3362_v51 = vadd.f32 %v3361_v8, %v3193_v2  ;;  %v665_v44 = vunpack.c.0.s8 %v393_v52  ;;  %v666_v1 = vunpack.c.0.s8 %v394_v58  ;;  %v674_v54 = vunpack.c.1.s8 %v394_v58 }
 0x375   : > { %v3194_v4 = vpop.f32.mrf.mxu1  ;;  %v1184_v2 = vcvt.s32.f32 %v672_v10  ;;  %v681_v29 = vunpack.c.2.s8 %v393_v52 }
 0x376   : > { %v3530_v60 = vpop.f32.mrf.mxu3  ;;  %v3195_v39 = vadd.f32 %v3194_v4, %v6495_v7  ;;  %v673_v4 = vunpack.c.1.s8 %v393_v52  ;;  %v1177_v22 = vcvt.s32.f32 %v665_v44  ;;  %v1178_v32 = vcvt.s32.f32 %v666_v1 }
 0x377   : > { %v3531_v50 = vadd.f32 %v3530_v60, %v3362_v51  ;;  %v1186_v45 = vcvt.s32.f32 %v674_v54  ;;  %v682_v44 = vunpack.c.2.s8 %v394_v58 }
 0x378   : > { %v1185_v47 = vcvt.s32.f32 %v673_v4  ;;  %v690_v4 = vunpack.c.3.s8 %v394_v58 }
 0x37b   : > { %v3363_v14 = vpop.f32.mrf.mxu2 }
 0x37c   : > { %v3364_v11 = vadd.f32 %v3363_v14, %v3195_v39 }
 0x37d   : > { %v3197_v59 = vpop.f32.mrf.mxu1 }
 0x37e   : > { %v3532_v26 = vpop.f32.mrf.mxu3  ;;  %v3198_v60 = vadd.f32 %v3197_v59, %v5725_v21  ;;  %v680_v59 = vunpack.c.2.s8 %v392_v24 }
 0x37f   : > { %v3533_v55 = vadd.f32 %v3532_v26, %v3364_v11  ;;  %v1592_v11 = vpack.c.bf16 %v1184_v2, %v1176_v33  ;;  %v1593_v26 = vpack.c.bf16 %v1185_v47, %v1177_v22  ;;  %v1202_v2 = vcvt.s32.f32 %v690_v4 }
 0x380   : > { %3236 = vmatmul.bf16.gmra.mxu1 %v1584_v20  ;;  %3405 = vmatmul.bf16.gmra.mxu2 %v1585_v19  ;;  %v1594_v19 = vpack.c.bf16 %v1186_v45, %v1178_v32 }
 0x381   : > { %v3877_v25 = vpack.c.bf16 %v3533_v55, %v3531_v50 }
 0x383   : > { %3574 = vmatmul.bf16.gmra.mxu3 %v1586_v27  ;;  %3993 = vmatmul.bf16.gmra.mxu0 %v3877_v25  ;;  %v3366_v8 = vpop.f32.mrf.mxu2 }
 0x384   : > { %v3367_v57 = vadd.f32 %v3366_v8, %v3198_v60  ;;  %v688_v8 = vunpack.c.3.s8 %v392_v24  ;;  %v1194_v60 = vcvt.s32.f32 %v682_v44 }
 0x385   : > { %v3199_v31 = vpop.f32.mrf.mxu1 }
 0x386   : > { %v3535_v48 = vpop.f32.mrf.mxu3  ;;  %v3200_v51 = vadd.f32 %v3199_v31, %v5729_v23  ;;  %v689_v23 = vunpack.c.3.s8 %v393_v52  ;;  %v1192_v31 = vcvt.s32.f32 %v680_v59  ;;  %v1200_v54 = vcvt.s32.f32 %v688_v8 }
 0x387   : > { %v3536_v27 = vadd.f32 %v3535_v48, %v3367_v57  ;;  %v1193_v48 = vcvt.s32.f32 %v681_v29 }
 0x388   : > { %v1201_v33 = vcvt.s32.f32 %v689_v23  ;;  %v1600_v45 = vpack.c.bf16 %v1200_v54, %v1192_v31 }
 0x38a   : > { %v1601_v57 = vpack.c.bf16 %v1201_v33, %v1193_v48 }
 0x38b   : > { %v3368_v7 = vpop.f32.mrf.mxu2 }
 0x38c   : > { %v3369_v39 = vadd.f32 %v3368_v7, %v3200_v51  ;;  %v1602_v51 = vpack.c.bf16 %v1202_v2, %v1194_v60 }
 0x38d   : > { %v3202_v20 = vpop.f32.mrf.mxu1 }
 0x38e   : > { %v3537_v14 = vpop.f32.mrf.mxu3  ;;  %v3203_v1 = vadd.f32 %v3202_v20, %v5735_v16 }
 0x38f   : > { %v3538_v50 = vadd.f32 %v3537_v14, %v3369_v39  ;;  %v400_v14 = vld [vmem:[%s5468_s6 + $0x1e8] sm:$0xff] }
 0x390   : > { %3241 = vmatmul.bf16.gmra.mxu1 %v1592_v11  ;;  %3410 = vmatmul.bf16.gmra.mxu2 %v1593_v26  ;;  %v401_v11 = vld [vmem:[%s5468_s6 + $0x1f0] sm:$0xff]  ;;  %v402_v26 = vld [vmem:[%s5468_s6 + $0x1f8] sm:$0xff] }
 0x391   : > { %v3878_v55 = vpack.c.bf16 %v3538_v50, %v3536_v27  ;;  %v704_v27 = vunpack.c.1.s8 %v400_v14  ;;  %v697_v50 = vunpack.c.0.s8 %v401_v11  ;;  %v698_v59 = vunpack.c.0.s8 %v402_v26 }
 0x392   : > { %v706_v8 = vunpack.c.1.s8 %v402_v26 }
 0x393   : > { %3579 = vmatmul.bf16.gmra.mxu3 %v1594_v19  ;;  %3998 = vmatmul.bf16.gmra.mxu0 %v3878_v55  ;;  %v3371_v21 = vpop.f32.mrf.mxu2  ;;  %v705_v55 = vunpack.c.1.s8 %v401_v11  ;;  %v1216_v23 = vcvt.s32.f32 %v704_v27  ;;  %v1210_v4 = vcvt.s32.f32 %v698_v59 }
 0x394   : > { %v3372_v22 = vadd.f32 %v3371_v21, %v3203_v1  ;;  %v1218_v31 = vcvt.s32.f32 %v706_v8 }
 0x395   : > { %v3204_v10 = vpop.f32.mrf.mxu1  ;;  %v1217_v44 = vcvt.s32.f32 %v705_v55 }
 0x396   : > { %v3540_v25 = vpop.f32.mrf.mxu3  ;;  %v3205_v47 = vadd.f32 %v3204_v10, %v5739_v46  ;;  %v696_v46 = vunpack.c.0.s8 %v400_v14  ;;  %v1209_v10 = vcvt.s32.f32 %v697_v50 }
 0x397   : > { %v3541_v7 = vadd.f32 %v3540_v25, %v3372_v22 }
 0x398   : > { %v1208_v29 = vcvt.s32.f32 %v696_v46  ;;  %v1609_v22 = vpack.c.bf16 %v1217_v44, %v1209_v10 }
 0x39a   : > { %v1608_v2 = vpack.c.bf16 %v1216_v23, %v1208_v29 }
 0x39b   : > { %v3373_v32 = vpop.f32.mrf.mxu2 }
 0x39c   : > { %v3374_v24 = vadd.f32 %v3373_v32, %v3205_v47  ;;  %v1610_v32 = vpack.c.bf16 %v1218_v31, %v1210_v4 }
 0x39d   : > { %v3207_v58 = vpop.f32.mrf.mxu1 }
 0x39e   : > { %v3542_v52 = vpop.f32.mrf.mxu3  ;;  %v3208_v25 = vadd.f32 %v3207_v58, %v5759_v5 }
 0x39f   : > { %v3543_v16 = vadd.f32 %v3542_v52, %v3374_v24 }
 0x3a0   : > { %3246 = vmatmul.bf16.gmra.mxu1 %v1600_v45  ;;  %3415 = vmatmul.bf16.gmra.mxu2 %v1601_v57  ;;  %v712_v57 = vunpack.c.2.s8 %v400_v14 }
 0x3a1   : > { %v3879_v39 = vpack.c.bf16 %v3543_v16, %v3541_v7  ;;  %v713_v7 = vunpack.c.2.s8 %v401_v11 }
 0x3a2   : > { %v1224_v46 = vcvt.s32.f32 %v712_v57 }
 0x3a3   : > { %3584 = vmatmul.bf16.gmra.mxu3 %v1602_v51  ;;  %4003 = vmatmul.bf16.gmra.mxu0 %v3879_v39  ;;  %v3376_v20 = vpop.f32.mrf.mxu2  ;;  %v720_v51 = vunpack.c.3.s8 %v400_v14  ;;  %v714_v39 = vunpack.c.2.s8 %v402_v26 }
 0x3a4   : > { %v3377_v1 = vadd.f32 %v3376_v20, %v3208_v25  ;;  %v722_v20 = vunpack.c.3.s8 %v402_v26 }
 0x3a5   : > { %v3209_v21 = vpop.f32.mrf.mxu1  ;;  %v1232_v50 = vcvt.s32.f32 %v720_v51 }
 0x3a6   : > { %v3545_v19 = vpop.f32.mrf.mxu3  ;;  %v3210_v54 = vadd.f32 %v3209_v21, %v5765_v62  ;;  %v721_v62 = vunpack.c.3.s8 %v401_v11  ;;  %v1226_v21 = vcvt.s32.f32 %v714_v39  ;;  %v1234_v59 = vcvt.s32.f32 %v722_v20 }
 0x3a7   : > { %v3546_v24 = vadd.f32 %v3545_v19, %v3377_v1  ;;  %v1225_v19 = vcvt.s32.f32 %v713_v7  ;;  %v1616_v23 = vpack.c.bf16 %v1232_v50, %v1224_v46  ;;  %v408_v1 = vld [vmem:[%s5468_s6 + $0x228] sm:$0xff] }
 0x3a8   : > { %v1233_v55 = vcvt.s32.f32 %v721_v62  ;;  %v1618_v44 = vpack.c.bf16 %v1234_v59, %v1226_v21 }
 0x3aa   : > { %v1617_v10 = vpack.c.bf16 %v1233_v55, %v1225_v19 }
 0x3ab   : > { %v3378_v48 = vpop.f32.mrf.mxu2 }
 0x3ac   : > { %v3379_v33 = vadd.f32 %v3378_v48, %v3210_v54  ;;  %v409_v54 = vld [vmem:[%s5468_s6 + $0x230] sm:$0xff]  ;;  %v410_v48 = vld [vmem:[%s5468_s6 + $0x238] sm:$0xff] }
 0x3ad   : > { %v3212_v47 = vpop.f32.mrf.mxu1 }
 0x3ae   : > { %v3547_v60 = vpop.f32.mrf.mxu3  ;;  %v3213_v27 = vadd.f32 %v3212_v47, %v5773_v17  ;;  %v737_v47 = vunpack.c.1.s8 %v409_v54 }
 0x3af   : > { %v3548_v52 = vadd.f32 %v3547_v60, %v3379_v33 }
 0x3b0   : > { %3251 = vmatmul.bf16.gmra.mxu1 %v1608_v2  ;;  %3420 = vmatmul.bf16.gmra.mxu2 %v1609_v22  ;;  %v736_v2 = vunpack.c.1.s8 %v408_v1  ;;  %v729_v22 = vunpack.c.0.s8 %v409_v54  ;;  %v1249_v51 = vcvt.s32.f32 %v737_v47 }
 0x3b1   : > { %v3880_v45 = vpack.c.bf16 %v3548_v52, %v3546_v24  ;;  %v730_v24 = vunpack.c.0.s8 %v410_v48  ;;  %v738_v52 = vunpack.c.1.s8 %v410_v48 }
 0x3b2   : > { %v1248_v57 = vcvt.s32.f32 %v736_v2 }
 0x3b3   : > { %3589 = vmatmul.bf16.gmra.mxu3 %v1610_v32  ;;  %4008 = vmatmul.bf16.gmra.mxu0 %v3880_v45  ;;  %v3381_v5 = vpop.f32.mrf.mxu2  ;;  %v1242_v7 = vcvt.s32.f32 %v730_v24  ;;  %v1250_v62 = vcvt.s32.f32 %v738_v52 }
 0x3b4   : > { %v3382_v8 = vadd.f32 %v3381_v5, %v3213_v27 }
 0x3b5   : > { %v3214_v16 = vpop.f32.mrf.mxu1  ;;  %v1626_v21 = vpack.c.bf16 %v1250_v62, %v1242_v7  ;;  %v416_v7 = vld [vmem:[%s5468_s6 + $0x268] sm:$0xff]  ;;  %v417_v62 = vld [vmem:[%s5468_s6 + $0x270] sm:$0xff] }
 0x3b6   : > { %v3550_v58 = vpop.f32.mrf.mxu3  ;;  %v3215_v29 = vadd.f32 %v3214_v16, %v5779_v35  ;;  %v728_v35 = vunpack.c.0.s8 %v408_v1 }
 0x3b7   : > { %v3551_v4 = vadd.f32 %v3550_v58, %v3382_v8  ;;  %v1241_v58 = vcvt.s32.f32 %v729_v22 }
 0x3b8   : > { %v1240_v45 = vcvt.s32.f32 %v728_v35 }
 0x3b9   : > { %v1625_v19 = vpack.c.bf16 %v1249_v51, %v1241_v58 }
 0x3ba   : > { %v1624_v50 = vpack.c.bf16 %v1248_v57, %v1240_v45 }
 0x3bb   : > { %v3383_v25 = vpop.f32.mrf.mxu2 }
 0x3bc   : > { %v3384_v14 = vadd.f32 %v3383_v25, %v3215_v29  ;;  %v744_v25 = vunpack.c.2.s8 %v408_v1 }
 0x3bd   : > { %v3217_v26 = vpop.f32.mrf.mxu1 }
 0x3be   : > { %v3552_v11 = vpop.f32.mrf.mxu3  ;;  %v3218_v5 = vadd.f32 %v3217_v26, %v5793_v43  ;;  %v746_v26 = vunpack.c.2.s8 %v410_v48 }
 0x3bf   : > { %v3553_v17 = vadd.f32 %v3552_v11, %v3384_v14  ;;  %v752_v11 = vunpack.c.3.s8 %v408_v1 }
 0x3c0   : > { %3256 = vmatmul.bf16.gmra.mxu1 %v1616_v23  ;;  %3425 = vmatmul.bf16.gmra.mxu2 %v1617_v10  ;;  %v745_v23 = vunpack.c.2.s8 %v409_v54  ;;  %v1258_v2 = vcvt.s32.f32 %v746_v26 }
 0x3c1   : > { %v3881_v31 = vpack.c.bf16 %v3553_v17, %v3551_v4  ;;  %v6147_v4 = vpop.f32.mrf.mxu0  ;;  %v1256_v17 = vcvt.s32.f32 %v744_v25 }
 0x3c2   : > { %v1257_v35 = vcvt.s32.f32 %v745_v23 }
 0x3c3   : > { %3594 = vmatmul.bf16.gmra.mxu3 %v1618_v44  ;;  %4013 = vmatmul.bf16.gmra.mxu0 %v3881_v31  ;;  %v3386_v33 = vpop.f32.mrf.mxu2  ;;  %v754_v44 = vunpack.c.3.s8 %v410_v48 }
 0x3c4   : > { %v3387_v16 = vadd.f32 %v3386_v33, %v3218_v5  ;;  %v1264_v33 = vcvt.s32.f32 %v752_v11 }
 0x3c5   : > { %v3219_v32 = vpop.f32.mrf.mxu1  ;;  %v1266_v22 = vcvt.s32.f32 %v754_v44 }
 0x3c6   : > { %v3555_v60 = vpop.f32.mrf.mxu3  ;;  %v3220_v39 = vadd.f32 %v3219_v32, %v5796_v37  ;;  %v753_v37 = vunpack.c.3.s8 %v409_v54  ;;  %v1632_v48 = vpack.c.bf16 %v1264_v33, %v1256_v17 }
 0x3c7   : > { %v3556_v59 = vadd.f32 %v3555_v60, %v3387_v16  ;;  %v1634_v5 = vpack.c.bf16 %v1266_v22, %v1258_v2  ;;  %v418_v16 = vld [vmem:[%s5468_s6 + $0x278] sm:$0xff] }
 0x3c8   : > { %v1265_v60 = vcvt.s32.f32 %v753_v37 }
 0x3ca   : > { %v1633_v52 = vpack.c.bf16 %v1265_v60, %v1257_v35 }
 0x3cb   : > { %v3388_v20 = vpop.f32.mrf.mxu2 }
 0x3cc   : > { %v3389_v46 = vadd.f32 %v3388_v20, %v3220_v39  ;;  %v760_v20 = vunpack.c.0.s8 %v416_v7 }
 0x3cd   : > { %v3222_v55 = vpop.f32.mrf.mxu1 }
 0x3ce   : > { %v3557_v27 = vpop.f32.mrf.mxu3  ;;  %v3223_v31 = vadd.f32 %v3222_v55, %v5803_v49 }
 0x3cf   : > { %v3558_v8 = vadd.f32 %v3557_v27, %v3389_v46  ;;  %v768_v46 = vunpack.c.1.s8 %v416_v7 }
 0x3d0   : > { %3261 = vmatmul.bf16.gmra.mxu1 %v1624_v50  ;;  %3430 = vmatmul.bf16.gmra.mxu2 %v1625_v19  ;;  %v761_v50 = vunpack.c.0.s8 %v417_v62  ;;  %v769_v19 = vunpack.c.1.s8 %v417_v62 }
 0x3d1   : > { %v3882_v29 = vpack.c.bf16 %v3558_v8, %v3556_v59  ;;  %v770_v59 = vunpack.c.1.s8 %v418_v16  ;;  %v1280_v25 = vcvt.s32.f32 %v768_v46 }
 0x3d2   : > { %v1273_v23 = vcvt.s32.f32 %v761_v50  ;;  %v1281_v37 = vcvt.s32.f32 %v769_v19 }
 0x3d3   : > { %3599 = vmatmul.bf16.gmra.mxu3 %v1626_v21  ;;  %4018 = vmatmul.bf16.gmra.mxu0 %v3882_v29  ;;  %v3391_v43 = vpop.f32.mrf.mxu2  ;;  %v762_v21 = vunpack.c.0.s8 %v418_v16  ;;  %v1282_v26 = vcvt.s32.f32 %v770_v59 }
 0x3d4   : > { %v3392_v47 = vadd.f32 %v3391_v43, %v3223_v31  ;;  %v1272_v43 = vcvt.s32.f32 %v760_v20  ;;  %v786_v20 = vunpack.c.3.s8 %v418_v16 }
 0x3d5   : > { %v3224_v10 = vpop.f32.mrf.mxu1 }
 0x3d6   : > { %v3560_v14 = vpop.f32.mrf.mxu3  ;;  %v3225_v32 = vadd.f32 %v3224_v10, %v5806_v28  ;;  %v6156_v28 = vld [vmem:[%s6381_s3] ss:$0 sm:$0xff]  ;;  %v1274_v10 = vcvt.s32.f32 %v762_v21 }
 0x3d7   : > { %v3561_v57 = vadd.f32 %v3560_v14, %v3392_v47  ;;  %v1640_v47 = vpack.c.bf16 %v1280_v25, %v1272_v43 }
 0x3db   : > { %v3393_v1 = vpop.f32.mrf.mxu2 }
 0x3dc   : > { %v3394_v54 = vadd.f32 %v3393_v1, %v3225_v32  ;;  %v1641_v32 = vpack.c.bf16 %v1281_v37, %v1273_v23 }
 0x3dd   : > { %v3227_v45 = vpop.f32.mrf.mxu1 }
 0x3de   : > { %v3562_v24 = vpop.f32.mrf.mxu3  ;;  %v3228_v14 = vadd.f32 %v3227_v45, %v5827_v15  ;;  %v1642_v15 = vpack.c.bf16 %v1282_v26, %v1274_v10  ;;  %v776_v45 = vunpack.c.2.s8 %v416_v7 }
 0x3df   : > { %v3563_v49 = vadd.f32 %v3562_v24, %v3394_v54 }
 0x3e0   : > { %v3984_v58 = vpop.f32.mrf.mxu0  ;;  %3266 = vmatmul.bf16.gmra.mxu1 %v1632_v48  ;;  %3435 = vmatmul.bf16.gmra.mxu2 %v1633_v52  ;;  %v1288_v50 = vcvt.s32.f32 %v776_v45 }
 0x3e1   : > { %v3883_v51 = vpack.c.bf16 %v3563_v49, %v3561_v57  ;;  %v3985_v8 = vadd.f32 %v6156_v28, %v3984_v58  ;;  %v777_v49 = vunpack.c.2.s8 %v417_v62  ;;  %v785_v58 = vunpack.c.3.s8 %v417_v62 }
 0x3e3   : > { %3604 = vmatmul.bf16.gmra.mxu3 %v1634_v5  ;;  %4023 = vmatmul.bf16.gmra.mxu0 %v3883_v51  ;;  %v3396_v39 = vpop.f32.mrf.mxu2  ;;  %v4144_v44 = vmax.f32 %v3985_v8, 0.0  ;;  %v784_v5 = vunpack.c.3.s8 %v416_v7  ;;  %v1289_v59 = vcvt.s32.f32 %v777_v49  ;;  %v1297_v8 = vcvt.s32.f32 %v785_v58 }
 0x3e4   : > { %v3397_v17 = vadd.f32 %v3396_v39, %v3228_v14  ;;  %v778_v39 = vunpack.c.2.s8 %v418_v16  ;;  %v1298_v7 = vcvt.s32.f32 %v786_v20 }
 0x3e5   : > { %v3229_v55 = vpop.f32.mrf.mxu1  ;;  %v1296_v19 = vcvt.s32.f32 %v784_v5  ;;  %v1649_v10 = vpack.c.bf16 %v1297_v8, %v1289_v59 }
 0x3e6   : > { %v3565_v27 = vpop.f32.mrf.mxu3  ;;  %v3230_v31 = vadd.f32 %v3229_v55, %v5832_v0 }
 0x3e7   : > { %v3566_v54 = vadd.f32 %v3565_v27, %v3397_v17 }
 0x3e8   : > { %v3986_v29 = vpop.f32.mrf.mxu0 }
 0x3e9   : > { %v3987_v11 = vadd.f32 %v6156_v28, %v3986_v29  ;;  %v1290_v29 = vcvt.s32.f32 %v778_v39 }
 0x3eb   : > { %v4145_v33 = vmax.f32 %v3987_v11, 0.0  ;;  %v3398_v35 = vpop.f32.mrf.mxu2 }
 0x3ec   : > { %v3399_v2 = vadd.f32 %v3398_v35, %v3230_v31 }
 0x3ed   : > { %v4843_v60 = vpack.c.bf16 %v4145_v33, %v4144_v44  ;;  %v3232_v1 = vpop.f32.mrf.mxu1  ;;  %v1650_v44 = vpack.c.bf16 %v1298_v7, %v1290_v29 }
 0x3ee   : > { %v3567_v22 = vpop.f32.mrf.mxu3  ;;  %v3233_v55 = vadd.f32 %v3232_v1, %v5841_v40  ;;  %v1648_v40 = vpack.c.bf16 %v1296_v19, %v1288_v50 }
 0x3ef   : > { %4844 = vst [vmem:[%s6164_s25] sm:$0xff] %v4843_v60   ;;  %v3568_v24 = vadd.f32 %v3567_v22, %v3399_v2  ;;  %v425_v60 = vld [vmem:[%s5468_s6 + $0x2b0] sm:$0xff]  ;;  %v426_v2 = vld [vmem:[%s5468_s6 + $0x2b8] sm:$0xff] }
 0x3f0   : > { %v3989_v48 = vpop.f32.mrf.mxu0  ;;  %3271 = vmatmul.bf16.gmra.mxu1 %v1640_v47  ;;  %3440 = vmatmul.bf16.gmra.mxu2 %v1641_v32 }
 0x3f1   : > { %v3884_v52 = vpack.c.bf16 %v3568_v24, %v3566_v54  ;;  %v3990_v46 = vadd.f32 %v6156_v28, %v3989_v48  ;;  %v801_v54 = vunpack.c.1.s8 %v425_v60  ;;  %v794_v48 = vunpack.c.0.s8 %v426_v2 }
 0x3f3   : > { %3609 = vmatmul.bf16.gmra.mxu3 %v1642_v15  ;;  %4028 = vmatmul.bf16.gmra.mxu0 %v3884_v52  ;;  %v3401_v0 = vpop.f32.mrf.mxu2  ;;  %v4146_v43 = vmax.f32 %v3990_v46, 0.0  ;;  %v793_v15 = vunpack.c.0.s8 %v425_v60  ;;  %v802_v52 = vunpack.c.1.s8 %v426_v2  ;;  %v1313_v39 = vcvt.s32.f32 %v801_v54 }
 0x3f4   : > { %v3402_v25 = vadd.f32 %v3401_v0, %v3233_v55  ;;  %v1306_v20 = vcvt.s32.f32 %v794_v48 }
 0x3f5   : > { %v3234_v51 = vpop.f32.mrf.mxu1  ;;  %v1314_v46 = vcvt.s32.f32 %v802_v52 }
 0x3f6   : > { %v3570_v57 = vpop.f32.mrf.mxu3  ;;  %v3235_v62 = vadd.f32 %v3234_v51, %v5846_v13  ;;  %v424_v13 = vld [vmem:[%s5468_s6 + $0x2a8] sm:$0xff]  ;;  %v1305_v51 = vcvt.s32.f32 %v793_v15 }
 0x3f7   : > { %v3571_v17 = vadd.f32 %v3570_v57, %v3402_v25  ;;  %v792_v47 = vunpack.c.0.s8 %v424_v13  ;;  %v800_v32 = vunpack.c.1.s8 %v424_v13 }
 0x3f8   : > { %v3991_v27 = vpop.f32.mrf.mxu0 }
 0x3f9   : > { %v3992_v21 = vadd.f32 %v6156_v28, %v3991_v27  ;;  %v1304_v5 = vcvt.s32.f32 %v792_v47  ;;  %v1312_v57 = vcvt.s32.f32 %v800_v32 }
 0x3fb   : > { %v4147_v14 = vmax.f32 %v3992_v21, 0.0  ;;  %v3403_v16 = vpop.f32.mrf.mxu2  ;;  %v1656_v7 = vpack.c.bf16 %v1312_v57, %v1304_v5 }
 0x3fc   : > { %v3404_v23 = vadd.f32 %v3403_v16, %v3235_v62 }
 0x3fd   : > { %v4848_v11 = vpack.c.bf16 %v4147_v14, %v4146_v43  ;;  %v3237_v26 = vpop.f32.mrf.mxu1  ;;  %v1657_v43 = vpack.c.bf16 %v1313_v39, %v1305_v51 }
 0x3fe   : > { %v3572_v37 = vpop.f32.mrf.mxu3  ;;  %v3238_v49 = vadd.f32 %v3237_v26, %v5861_v36  ;;  %v1658_v36 = vpack.c.bf16 %v1314_v46, %v1306_v20  ;;  %v817_v26 = vunpack.c.3.s8 %v425_v60 }
 0x3ff   : > { %5000 = vst [vmem:[%s6164_s25 + $0x8] sm:$0xff] %v4848_v11   ;;  %v3573_v31 = vadd.f32 %v3572_v37, %v3404_v23  ;;  %v816_v37 = vunpack.c.3.s8 %v424_v13 }
 0x400   : > { %v3994_v33 = vpop.f32.mrf.mxu0  ;;  %3276 = vmatmul.bf16.gmra.mxu1 %v1648_v40  ;;  %3445 = vmatmul.bf16.gmra.mxu2 %v1649_v10  ;;  %v809_v10 = vunpack.c.2.s8 %v425_v60  ;;  %v1329_v54 = vcvt.s32.f32 %v817_v26 }
 0x401   : > { %v3885_v35 = vpack.c.bf16 %v3573_v31, %v3571_v17  ;;  %v3995_v0 = vadd.f32 %v6156_v28, %v3994_v33  ;;  %v810_v17 = vunpack.c.2.s8 %v426_v2  ;;  %v818_v31 = vunpack.c.3.s8 %v426_v2 }
 0x402   : > { %v1328_v47 = vcvt.s32.f32 %v816_v37  ;;  %v1321_v15 = vcvt.s32.f32 %v809_v10 }
 0x403   : > { %3614 = vmatmul.bf16.gmra.mxu3 %v1650_v44  ;;  %4033 = vmatmul.bf16.gmra.mxu0 %v3885_v35  ;;  %v3406_v22 = vpop.f32.mrf.mxu2  ;;  %v4148_v27 = vmax.f32 %v3995_v0, 0.0 }
 0x404   : > { %v3407_v50 = vadd.f32 %v3406_v22, %v3238_v49  ;;  %v1665_v49 = vpack.c.bf16 %v1329_v54, %v1321_v15 }
 0x405   : > { %v3239_v24 = vpop.f32.mrf.mxu1 }
 0x406   : > { %v3575_v1 = vpop.f32.mrf.mxu3  ;;  %v3240_v19 = vadd.f32 %v3239_v24, %v5864_v63  ;;  %v808_v63 = vunpack.c.2.s8 %v424_v13  ;;  %v1322_v24 = vcvt.s32.f32 %v810_v17  ;;  %v1330_v13 = vcvt.s32.f32 %v818_v31 }
 0x407   : > { %v3576_v62 = vadd.f32 %v3575_v1, %v3407_v50  ;;  %v433_v50 = vld [vmem:[%s5468_s6 + $0x2f0] sm:$0xff] }
 0x408   : > { %v3996_v45 = vpop.f32.mrf.mxu0  ;;  %v1320_v22 = vcvt.s32.f32 %v808_v63  ;;  %v1666_v51 = vpack.c.bf16 %v1330_v13, %v1322_v24 }
 0x409   : > { %v3997_v58 = vadd.f32 %v6156_v28, %v3996_v45 }
 0x40b   : > { %v4149_v55 = vmax.f32 %v3997_v58, 0.0  ;;  %v3408_v21 = vpop.f32.mrf.mxu2 }
 0x40c   : > { %v3409_v8 = vadd.f32 %v3408_v21, %v3240_v19  ;;  %v434_v19 = vld [vmem:[%s5468_s6 + $0x2f8] sm:$0xff] }
 0x40d   : > { %v4853_v59 = vpack.c.bf16 %v4149_v55, %v4148_v27  ;;  %v3242_v25 = vpop.f32.mrf.mxu1 }
 0x40e   : > { %v3577_v29 = vpop.f32.mrf.mxu3  ;;  %v3243_v32 = vadd.f32 %v3242_v25, %v5871_v9  ;;  %v1664_v9 = vpack.c.bf16 %v1328_v47, %v1320_v22  ;;  %v826_v25 = vunpack.c.0.s8 %v434_v19 }
 0x40f   : > { %5001 = vst [vmem:[%s6164_s25 + $0x10] sm:$0xff] %v4853_v59   ;;  %v3578_v14 = vadd.f32 %v3577_v29, %v3409_v8  ;;  %v825_v29 = vunpack.c.0.s8 %v433_v50 }
 0x410   : > { %v3999_v16 = vpop.f32.mrf.mxu0  ;;  %3281 = vmatmul.bf16.gmra.mxu1 %v1656_v7  ;;  %3450 = vmatmul.bf16.gmra.mxu2 %v1657_v43  ;;  %v833_v7 = vunpack.c.1.s8 %v433_v50  ;;  %v1338_v10 = vcvt.s32.f32 %v826_v25 }
 0x411   : > { %v3886_v11 = vpack.c.bf16 %v3578_v14, %v3576_v62  ;;  %v4000_v33 = vadd.f32 %v6156_v28, %v3999_v16  ;;  %v1337_v37 = vcvt.s32.f32 %v825_v29 }
 0x413   : > { %3619 = vmatmul.bf16.gmra.mxu3 %v1658_v36  ;;  %4038 = vmatmul.bf16.gmra.mxu0 %v3886_v11  ;;  %v3411_v23 = vpop.f32.mrf.mxu2  ;;  %v4150_v48 = vmax.f32 %v4000_v33, 0.0  ;;  %v834_v36 = vunpack.c.1.s8 %v434_v19 }
 0x414   : > { %v3412_v52 = vadd.f32 %v3411_v23, %v3243_v32 }
 0x415   : > { %v3244_v44 = vpop.f32.mrf.mxu1  ;;  %v1346_v26 = vcvt.s32.f32 %v834_v36 }
 0x416   : > { %v3580_v40 = vpop.f32.mrf.mxu3  ;;  %v3245_v60 = vadd.f32 %v3244_v44, %v5874_v56  ;;  %v432_v56 = vld [vmem:[%s5468_s6 + $0x2e8] sm:$0xff] }
 0x417   : > { %v3581_v39 = vadd.f32 %v3580_v40, %v3412_v52  ;;  %v824_v21 = vunpack.c.0.s8 %v432_v56  ;;  %v832_v59 = vunpack.c.1.s8 %v432_v56  ;;  %v1345_v40 = vcvt.s32.f32 %v833_v7 }
 0x418   : > { %v4001_v35 = vpop.f32.mrf.mxu0 }
 0x419   : > { %v4002_v1 = vadd.f32 %v6156_v28, %v4001_v35  ;;  %v1336_v16 = vcvt.s32.f32 %v824_v21  ;;  %v1344_v11 = vcvt.s32.f32 %v832_v59  ;;  %v1673_v15 = vpack.c.bf16 %v1345_v40, %v1337_v37  ;;  %v441_v40 = vld [vmem:[%s5468_s6 + $0x330] sm:$0xff] }
 0x41b   : > { %v4151_v0 = vmax.f32 %v4002_v1, 0.0  ;;  %v3413_v2 = vpop.f32.mrf.mxu2  ;;  %v1672_v1 = vpack.c.bf16 %v1344_v11, %v1336_v16 }
 0x41c   : > { %v3414_v5 = vadd.f32 %v3413_v2, %v3245_v60 }
 0x41d   : > { %v4858_v45 = vpack.c.bf16 %v4151_v0, %v4150_v48  ;;  %v3247_v58 = vpop.f32.mrf.mxu1  ;;  %v848_v0 = vunpack.c.3.s8 %v432_v56 }
 0x41e   : > { %v3582_v57 = vpop.f32.mrf.mxu3  ;;  %v3248_v23 = vadd.f32 %v3247_v58, %v5895_v38  ;;  %v1674_v38 = vpack.c.bf16 %v1346_v26, %v1338_v10  ;;  %v442_v10 = vld [vmem:[%s5468_s6 + $0x338] sm:$0xff] }
 0x41f   : > { %5002 = vst [vmem:[%s6164_s25 + $0x18] sm:$0xff] %v4858_v45   ;;  %v3583_v20 = vadd.f32 %v3582_v57, %v3414_v5  ;;  %v841_v45 = vunpack.c.2.s8 %v433_v50  ;;  %v849_v5 = vunpack.c.3.s8 %v433_v50 }
 0x420   : > { %v4004_v46 = vpop.f32.mrf.mxu0  ;;  %3286 = vmatmul.bf16.gmra.mxu1 %v1664_v9  ;;  %3455 = vmatmul.bf16.gmra.mxu2 %v1665_v49  ;;  %v842_v9 = vunpack.c.2.s8 %v434_v19  ;;  %v850_v49 = vunpack.c.3.s8 %v434_v19 }
 0x421   : > { %v3887_v27 = vpack.c.bf16 %v3583_v20, %v3581_v39  ;;  %v4005_v62 = vadd.f32 %v6156_v28, %v4004_v46  ;;  %v1360_v20 = vcvt.s32.f32 %v848_v0  ;;  %v1361_v21 = vcvt.s32.f32 %v849_v5 }
 0x422   : > { %v1354_v59 = vcvt.s32.f32 %v842_v9 }
 0x423   : > { %3624 = vmatmul.bf16.gmra.mxu3 %v1666_v51  ;;  %4043 = vmatmul.bf16.gmra.mxu0 %v3887_v27  ;;  %v3416_v55 = vpop.f32.mrf.mxu2  ;;  %v4152_v44 = vmax.f32 %v4005_v62, 0.0 }
 0x424   : > { %v3417_v17 = vadd.f32 %v3416_v55, %v3248_v23  ;;  %v1353_v55 = vcvt.s32.f32 %v841_v45 }
 0x425   : > { %v3249_v43 = vpop.f32.mrf.mxu1 }
 0x426   : > { %v3585_v8 = vpop.f32.mrf.mxu3  ;;  %v3250_v31 = vadd.f32 %v3249_v43, %v5900_v61  ;;  %v840_v61 = vunpack.c.2.s8 %v432_v56  ;;  %v1362_v56 = vcvt.s32.f32 %v850_v49  ;;  %v1681_v62 = vpack.c.bf16 %v1361_v21, %v1353_v55 }
 0x427   : > { %v3586_v24 = vadd.f32 %v3585_v8, %v3417_v17 }
 0x428   : > { %v4006_v14 = vpop.f32.mrf.mxu0  ;;  %v1352_v39 = vcvt.s32.f32 %v840_v61  ;;  %v1682_v16 = vpack.c.bf16 %v1362_v56, %v1354_v59 }
 0x429   : > { %v4007_v63 = vadd.f32 %v6156_v28, %v4006_v14 }
 0x42b   : > { %v4153_v33 = vmax.f32 %v4007_v63, 0.0  ;;  %v3418_v35 = vpop.f32.mrf.mxu2 }
 0x42c   : > { %v3419_v47 = vadd.f32 %v3418_v35, %v3250_v31  ;;  %v865_v35 = vunpack.c.1.s8 %v441_v40 }
 0x42d   : > { %v4863_v22 = vpack.c.bf16 %v4153_v33, %v4152_v44  ;;  %v3252_v54 = vpop.f32.mrf.mxu1  ;;  %v857_v33 = vunpack.c.0.s8 %v441_v40 }
 0x42e   : > { %v3587_v32 = vpop.f32.mrf.mxu3  ;;  %v3253_v46 = vadd.f32 %v3252_v54, %v5909_v12  ;;  %v1680_v12 = vpack.c.bf16 %v1360_v20, %v1352_v39 }
 0x42f   : > { %5003 = vst [vmem:[%s6164_s25 + $0x20] sm:$0xff] %v4863_v22   ;;  %v3588_v13 = vadd.f32 %v3587_v32, %v3419_v47  ;;  %v858_v47 = vunpack.c.0.s8 %v442_v10  ;;  %v866_v32 = vunpack.c.1.s8 %v442_v10 }
 0x430   : > { %v4009_v48 = vpop.f32.mrf.mxu0  ;;  %3291 = vmatmul.bf16.gmra.mxu1 %v1672_v1  ;;  %3460 = vmatmul.bf16.gmra.mxu2 %v1673_v15 }
 0x431   : > { %v3888_v52 = vpack.c.bf16 %v3588_v13, %v3586_v24  ;;  %v4010_v58 = vadd.f32 %v6156_v28, %v4009_v48  ;;  %v1369_v48 = vcvt.s32.f32 %v857_v33  ;;  %v1378_v61 = vcvt.s32.f32 %v866_v32 }
 0x433   : > { %3629 = vmatmul.bf16.gmra.mxu3 %v1674_v38  ;;  %4048 = vmatmul.bf16.gmra.mxu0 %v3888_v52  ;;  %v3421_v60 = vpop.f32.mrf.mxu2  ;;  %v4154_v8 = vmax.f32 %v4010_v58, 0.0  ;;  %v1377_v52 = vcvt.s32.f32 %v865_v35 }
 0x434   : > { %v3422_v29 = vadd.f32 %v3421_v60, %v3253_v46  ;;  %v1370_v60 = vcvt.s32.f32 %v858_v47 }
 0x435   : > { %v3254_v57 = vpop.f32.mrf.mxu1  ;;  %v1689_v39 = vpack.c.bf16 %v1377_v52, %v1369_v48 }
 0x436   : > { %v3590_v2 = vpop.f32.mrf.mxu3  ;;  %v3255_v50 = vadd.f32 %v3254_v57, %v5914_v3  ;;  %v440_v3 = vld [vmem:[%s5468_s6 + $0x328] sm:$0xff] }
 0x437   : > { %v3591_v11 = vadd.f32 %v3590_v2, %v3422_v29  ;;  %v856_v44 = vunpack.c.0.s8 %v440_v3  ;;  %v864_v17 = vunpack.c.1.s8 %v440_v3  ;;  %v880_v56 = vunpack.c.3.s8 %v440_v3 }
 0x438   : > { %v4011_v51 = vpop.f32.mrf.mxu0  ;;  %v873_v29 = vunpack.c.2.s8 %v441_v40 }
 0x439   : > { %v4012_v27 = vadd.f32 %v6156_v28, %v4011_v51  ;;  %v1368_v54 = vcvt.s32.f32 %v856_v44  ;;  %v1376_v38 = vcvt.s32.f32 %v864_v17 }
 0x43b   : > { %v4155_v7 = vmax.f32 %v4012_v27, 0.0  ;;  %v3423_v19 = vpop.f32.mrf.mxu2  ;;  %v1688_v51 = vpack.c.bf16 %v1376_v38, %v1368_v54  ;;  %v449_v38 = vld [vmem:[%s5468_s6 + $0x370] sm:$0xff] }
 0x43c   : > { %v3424_v25 = vadd.f32 %v3423_v19, %v3255_v50  ;;  %v881_v50 = vunpack.c.3.s8 %v441_v40  ;;  %v874_v19 = vunpack.c.2.s8 %v442_v10 }
 0x43d   : > { %v4868_v43 = vpack.c.bf16 %v4155_v7, %v4154_v8  ;;  %v3257_v14 = vpop.f32.mrf.mxu1 }
 0x43e   : > { %v3592_v36 = vpop.f32.mrf.mxu3  ;;  %v3258_v24 = vadd.f32 %v3257_v14, %v5929_v18  ;;  %v1690_v18 = vpack.c.bf16 %v1378_v61, %v1370_v60  ;;  %v889_v61 = vunpack.c.0.s8 %v449_v38 }
 0x43f   : > { %5004 = vst [vmem:[%s6164_s25 + $0x28] sm:$0xff] %v4868_v43   ;;  %v3593_v23 = vadd.f32 %v3592_v36, %v3424_v25  ;;  %v882_v43 = vunpack.c.3.s8 %v442_v10 }
 0x440   : > { %v4014_v63 = vpop.f32.mrf.mxu0  ;;  %3296 = vmatmul.bf16.gmra.mxu1 %v1680_v12  ;;  %3465 = vmatmul.bf16.gmra.mxu2 %v1681_v62  ;;  %v1392_v62 = vcvt.s32.f32 %v880_v56 }
 0x441   : > { %v3889_v37 = vpack.c.bf16 %v3593_v23, %v3591_v11  ;;  %v4015_v1 = vadd.f32 %v6156_v28, %v4014_v63  ;;  %v1385_v11 = vcvt.s32.f32 %v873_v29  ;;  %v1393_v23 = vcvt.s32.f32 %v881_v50 }
 0x442   : > { %v1386_v63 = vcvt.s32.f32 %v874_v19 }
 0x443   : > { %3634 = vmatmul.bf16.gmra.mxu3 %v1682_v16  ;;  %4053 = vmatmul.bf16.gmra.mxu0 %v3889_v37  ;;  %v3426_v26 = vpop.f32.mrf.mxu2  ;;  %v4156_v0 = vmax.f32 %v4015_v1, 0.0  ;;  %v1394_v37 = vcvt.s32.f32 %v882_v43  ;;  %v1697_v35 = vpack.c.bf16 %v1393_v23, %v1385_v11 }
 0x444   : > { %v3427_v2 = vadd.f32 %v3426_v26, %v3258_v24  ;;  %v450_v24 = vld [vmem:[%s5468_s6 + $0x378] sm:$0xff] }
 0x445   : > { %v3259_v22 = vpop.f32.mrf.mxu1  ;;  %v1698_v47 = vpack.c.bf16 %v1394_v37, %v1386_v63 }
 0x446   : > { %v3595_v31 = vpop.f32.mrf.mxu3  ;;  %v3260_v45 = vadd.f32 %v3259_v22, %v5932_v30  ;;  %v872_v30 = vunpack.c.2.s8 %v440_v3 }
 0x447   : > { %v3596_v46 = vadd.f32 %v3595_v31, %v3427_v2 }
 0x448   : > { %v4016_v15 = vpop.f32.mrf.mxu0  ;;  %v1384_v12 = vcvt.s32.f32 %v872_v30  ;;  %v6497_v30 = vld [vmem:[#allocation45_spill] sm:$0xff] }
 0x449   : > { %v4017_v13 = vadd.f32 %v6156_v28, %v4016_v15 }
 0x44b   : > { %v4157_v5 = vmax.f32 %v4017_v13, 0.0  ;;  %v3428_v57 = vpop.f32.mrf.mxu2 }
 0x44c   : > { %v3429_v49 = vadd.f32 %v3428_v57, %v3260_v45  ;;  %v890_v45 = vunpack.c.0.s8 %v450_v24 }
 0x44d   : > { %v4873_v9 = vpack.c.bf16 %v4157_v5, %v4156_v0  ;;  %v3262_v20 = vpop.f32.mrf.mxu1  ;;  %v897_v0 = vunpack.c.1.s8 %v449_v38  ;;  %v898_v5 = vunpack.c.1.s8 %v450_v24 }
 0x44e   : > { %v3597_v58 = vpop.f32.mrf.mxu3  ;;  %v3263_v14 = vadd.f32 %v3262_v20, %v5939_v53  ;;  %v1696_v53 = vpack.c.bf16 %v1392_v62, %v1384_v12 }
 0x44f   : > { %5005 = vst [vmem:[%s6164_s25 + $0x30] sm:$0xff] %v4873_v9   ;;  %v3598_v27 = vadd.f32 %v3597_v58, %v3429_v49 }
 0x450   : > { %v4019_v55 = vpop.f32.mrf.mxu0  ;;  %3301 = vmatmul.bf16.gmra.mxu1 %v1688_v51  ;;  %3470 = vmatmul.bf16.gmra.mxu2 %v1689_v39  ;;  %v6496_v51 = vld [vmem:[#allocation44_spill] sm:$0xff] }
 0x451   : > { %v3890_v21 = vpack.c.bf16 %v3598_v27, %v3596_v46  ;;  %v4020_v25 = vadd.f32 %v6156_v28, %v4019_v55  ;;  %v1409_v46 = vcvt.s32.f32 %v897_v0  ;;  %v1402_v27 = vcvt.s32.f32 %v890_v45 }
 0x452   : > { %v1410_v55 = vcvt.s32.f32 %v898_v5 }
 0x453   : > { %3639 = vmatmul.bf16.gmra.mxu3 %v1690_v18  ;;  %4058 = vmatmul.bf16.gmra.mxu0 %v3890_v21  ;;  %v3431_v59 = vpop.f32.mrf.mxu2  ;;  %v4158_v3 = vmax.f32 %v4020_v25, 0.0  ;;  %v1401_v18 = vcvt.s32.f32 %v889_v61 }
 0x454   : > { %v3432_v26 = vadd.f32 %v3431_v59, %v3263_v14  ;;  %v1706_v12 = vpack.c.bf16 %v1410_v55, %v1402_v27 }
 0x455   : > { %v3264_v7 = vpop.f32.mrf.mxu1  ;;  %v1705_v25 = vpack.c.bf16 %v1409_v46, %v1401_v18  ;;  %v457_v18 = vld [vmem:[%s5468_s6 + $0x3b0] sm:$0xff]  ;;  %v458_v46 = vld [vmem:[%s5468_s6 + $0x3b8] sm:$0xff] }
 0x456   : > { %v3600_v8 = vpop.f32.mrf.mxu3  ;;  %v3265_v40 = vadd.f32 %v3264_v7, %v5942_v41  ;;  %v448_v41 = vld [vmem:[%s5468_s6 + $0x368] sm:$0xff] }
 0x457   : > { %v3601_v32 = vadd.f32 %v3600_v8, %v3432_v26  ;;  %v888_v48 = vunpack.c.0.s8 %v448_v41  ;;  %v896_v52 = vunpack.c.1.s8 %v448_v41  ;;  %v904_v63 = vunpack.c.2.s8 %v448_v41 }
 0x458   : > { %v4021_v36 = vpop.f32.mrf.mxu0  ;;  %v912_v37 = vunpack.c.3.s8 %v448_v41  ;;  %v905_v26 = vunpack.c.2.s8 %v449_v38 }
 0x459   : > { %v4022_v16 = vadd.f32 %v6156_v28, %v4021_v36  ;;  %v1400_v49 = vcvt.s32.f32 %v888_v48  ;;  %v1408_v58 = vcvt.s32.f32 %v896_v52 }
 0x45b   : > { %v4159_v44 = vmax.f32 %v4022_v16, 0.0  ;;  %v3433_v10 = vpop.f32.mrf.mxu2  ;;  %v1704_v43 = vpack.c.bf16 %v1408_v58, %v1400_v49 }
 0x45c   : > { %v3434_v31 = vadd.f32 %v3433_v10, %v3265_v40  ;;  %v913_v40 = vunpack.c.3.s8 %v449_v38  ;;  %v906_v10 = vunpack.c.2.s8 %v450_v24  ;;  %v6499_v38 = vld [vmem:[#allocation19_spill] sm:$0xff] }
 0x45d   : > { %v4878_v17 = vpack.c.bf16 %v4159_v44, %v4158_v3  ;;  %v3267_v22 = vpop.f32.mrf.mxu1 }
 0x45e   : > { %v3602_v33 = vpop.f32.mrf.mxu3  ;;  %v3268_v39 = vadd.f32 %v3267_v22, %v6496_v51  ;;  %v6498_v22 = vld [vmem:[#allocation17_spill] sm:$0xff] }
 0x45f   : > { %5006 = vst [vmem:[%s6164_s25 + $0x38] sm:$0xff] %v4878_v17   ;;  %v3603_v1 = vadd.f32 %v3602_v33, %v3434_v31  ;;  %v914_v17 = vunpack.c.3.s8 %v450_v24 }
 0x460   : > { %v4024_v15 = vpop.f32.mrf.mxu0  ;;  %3306 = vmatmul.bf16.gmra.mxu1 %v1696_v53  ;;  %3475 = vmatmul.bf16.gmra.mxu2 %v1697_v35  ;;  %v1416_v53 = vcvt.s32.f32 %v904_v63  ;;  %v1424_v35 = vcvt.s32.f32 %v912_v37  ;;  %v6500_v37 = vld [vmem:[#allocation21_spill] sm:$0xff] }
 0x461   : > { %v3891_v54 = vpack.c.bf16 %v3603_v1, %v3601_v32  ;;  %v4025_v57 = vadd.f32 %v6156_v28, %v4024_v15  ;;  %v1417_v1 = vcvt.s32.f32 %v905_v26  ;;  %v1425_v15 = vcvt.s32.f32 %v913_v40 }
 0x462   : > { %v1426_v41 = vcvt.s32.f32 %v914_v17  ;;  %v1712_v45 = vpack.c.bf16 %v1424_v35, %v1416_v53 }
 0x463   : > { %3644 = vmatmul.bf16.gmra.mxu3 %v1698_v47  ;;  %4063 = vmatmul.bf16.gmra.mxu0 %v3891_v54  ;;  %v3436_v13 = vpop.f32.mrf.mxu2  ;;  %v4160_v21 = vmax.f32 %v4025_v57, 0.0  ;;  %v1418_v54 = vcvt.s32.f32 %v906_v10  ;;  %v1713_v5 = vpack.c.bf16 %v1425_v15, %v1417_v1 }
 0x464   : > { %v3437_v59 = vadd.f32 %v3436_v13, %v3268_v39 }
 0x465   : > { %v3269_v2 = vpop.f32.mrf.mxu1 }
 0x466   : > { %v3605_v60 = vpop.f32.mrf.mxu3  ;;  %v3270_v56 = vadd.f32 %v3269_v2, %v6497_v30  ;;  %v921_v30 = vunpack.c.0.s8 %v457_v18 }
 0x467   : > { %v3606_v62 = vadd.f32 %v3605_v60, %v3437_v59 }
 0x468   : > { %v4026_v9 = vpop.f32.mrf.mxu0 }
 0x469   : > { %v4027_v20 = vadd.f32 %v6156_v28, %v4026_v9  ;;  %v1714_v9 = vpack.c.bf16 %v1426_v41, %v1418_v54 }
 0x46b   : > { %v4161_v8 = vmax.f32 %v4027_v20, 0.0  ;;  %v3438_v29 = vpop.f32.mrf.mxu2  ;;  %v456_v20 = vld [vmem:[%s5468_s6 + $0x3a8] sm:$0xff] }
 0x46c   : > { %v3439_v7 = vadd.f32 %v3438_v29, %v3270_v56  ;;  %v920_v55 = vunpack.c.0.s8 %v456_v20  ;;  %v929_v56 = vunpack.c.1.s8 %v457_v18  ;;  %v922_v29 = vunpack.c.0.s8 %v458_v46 }
 0x46d   : > { %v4883_v50 = vpack.c.bf16 %v4161_v8, %v4160_v21  ;;  %v3272_v36 = vpop.f32.mrf.mxu1  ;;  %v928_v21 = vunpack.c.1.s8 %v456_v20  ;;  %v936_v15 = vunpack.c.2.s8 %v456_v20  ;;  %v944_v54 = vunpack.c.3.s8 %v456_v20 }
 0x46e   : > { %v3607_v19 = vpop.f32.mrf.mxu3  ;;  %v3273_v47 = vadd.f32 %v3272_v36, %v6498_v22 }
 0x46f   : > { %5007 = vst [vmem:[%s6164_s25 + $0x40] sm:$0xff] %v4883_v50   ;;  %v3608_v14 = vadd.f32 %v3607_v19, %v3439_v7  ;;  %v930_v50 = vunpack.c.1.s8 %v458_v46 }
 0x470   : > { %v4029_v16 = vpop.f32.mrf.mxu0  ;;  %3311 = vmatmul.bf16.gmra.mxu1 %v1704_v43  ;;  %3480 = vmatmul.bf16.gmra.mxu2 %v1705_v25  ;;  %v1432_v43 = vcvt.s32.f32 %v920_v55  ;;  %v1440_v25 = vcvt.s32.f32 %v928_v21 }
 0x471   : > { %v3892_v11 = vpack.c.bf16 %v3608_v14, %v3606_v62  ;;  %v4030_v31 = vadd.f32 %v6156_v28, %v4029_v16  ;;  %v1433_v62 = vcvt.s32.f32 %v921_v30  ;;  %v1441_v14 = vcvt.s32.f32 %v929_v56 }
 0x472   : > { %v1434_v16 = vcvt.s32.f32 %v922_v29 }
 0x473   : > { %3649 = vmatmul.bf16.gmra.mxu3 %v1706_v12  ;;  %4068 = vmatmul.bf16.gmra.mxu0 %v3892_v11  ;;  %v3441_v23 = vpop.f32.mrf.mxu2  ;;  %v4162_v13 = vmax.f32 %v4030_v31, 0.0  ;;  %v1442_v11 = vcvt.s32.f32 %v930_v50  ;;  %v1720_v31 = vpack.c.bf16 %v1440_v25, %v1432_v43 }
 0x474   : > { %v3442_v48 = vadd.f32 %v3441_v23, %v3273_v47 }
 0x475   : > { %v3274_v44 = vpop.f32.mrf.mxu1 }
 0x476   : > { %v3610_v3 = vpop.f32.mrf.mxu3  ;;  %v3275_v52 = vadd.f32 %v3274_v44, %v6499_v38 }
 0x477   : > { %v3611_v49 = vadd.f32 %v3610_v3, %v3442_v48  ;;  %v945_v48 = vunpack.c.3.s8 %v457_v18 }
 0x478   : > { %v4031_v33 = vpop.f32.mrf.mxu0 }
 0x479   : > { %v4032_v32 = vadd.f32 %v6156_v28, %v4031_v33  ;;  %v1721_v33 = vpack.c.bf16 %v1441_v14, %v1433_v62  ;;  %v465_v62 = vld [vmem:[%s5468_s6 + $0x3f0] sm:$0xff]  ;;  %v466_v14 = vld [vmem:[%s5468_s6 + $0x3f8] sm:$0xff] }
 0x47b   : > { %v4163_v60 = vmax.f32 %v4032_v32, 0.0  ;;  %v3443_v24 = vpop.f32.mrf.mxu2 }
 0x47c   : > { %v3444_v0 = vadd.f32 %v3443_v24, %v3275_v52  ;;  %v938_v52 = vunpack.c.2.s8 %v458_v46 }
 0x47d   : > { %v4888_v61 = vpack.c.bf16 %v4163_v60, %v4162_v13  ;;  %v3277_v57 = vpop.f32.mrf.mxu1  ;;  %v937_v13 = vunpack.c.2.s8 %v457_v18  ;;  %v946_v60 = vunpack.c.3.s8 %v458_v46 }
 0x47e   : > { %v3612_v2 = vpop.f32.mrf.mxu3  ;;  %v3278_v36 = vadd.f32 %v3277_v57, %v5997_v42  ;;  %v1722_v42 = vpack.c.bf16 %v1442_v11, %v1434_v16  ;;  %v1456_v57 = vcvt.s32.f32 %v944_v54  ;;  %v1450_v20 = vcvt.s32.f32 %v938_v52 }
 0x47f   : > { %5008 = vst [vmem:[%s6164_s25 + $0x48] sm:$0xff] %v4888_v61   ;;  %v3613_v58 = vadd.f32 %v3612_v2, %v3444_v0  ;;  %v6501_v61 = vld [vmem:[#allocation27_spill] sm:$0xff]  ;;  %v6502_v0 = vld [vmem:[#allocation25_spill] sm:$0xff]  ;;  %v1458_v18 = vcvt.s32.f32 %v946_v60 }
 0x480   : > { %v4034_v51 = vpop.f32.mrf.mxu0  ;;  %3316 = vmatmul.bf16.gmra.mxu1 %v1712_v45  ;;  %3485 = vmatmul.bf16.gmra.mxu2 %v1713_v5  ;;  %v3116_v2 = vadd.f32 %v6502_v0, %v6501_v61  ;;  %v1448_v5 = vcvt.s32.f32 %v936_v15 }
 0x481   : > { %v3893_v39 = vpack.c.bf16 %v3613_v58, %v3611_v49  ;;  %v4035_v7 = vadd.f32 %v6156_v28, %v4034_v51  ;;  %v1449_v51 = vcvt.s32.f32 %v937_v13 }
 0x482   : > { %v1728_v29 = vpack.c.bf16 %v1456_v57, %v1448_v5 }
 0x483   : > { %3654 = vmatmul.bf16.gmra.mxu3 %v1714_v9  ;;  %4073 = vmatmul.bf16.gmra.mxu0 %v3893_v39  ;;  %v3446_v27 = vpop.f32.mrf.mxu2  ;;  %v4164_v23 = vmax.f32 %v4035_v7, 0.0  ;;  %v6503_v9 = vld [vmem:[#allocation23_spill] sm:$0xff]  ;;  %v1457_v39 = vcvt.s32.f32 %v945_v48 }
 0x484   : > { %v3447_v63 = vadd.f32 %v3446_v27, %v3278_v36 }
 0x485   : > { %v3279_v8 = vpop.f32.mrf.mxu1  ;;  %v1729_v50 = vpack.c.bf16 %v1457_v39, %v1449_v51 }
 0x486   : > { %v3615_v59 = vpop.f32.mrf.mxu3  ;;  %v3280_v3 = vadd.f32 %v3279_v8, %v6500_v37  ;;  %v953_v37 = vunpack.c.0.s8 %v465_v62 }
 0x487   : > { %v3616_v35 = vadd.f32 %v3615_v59, %v3447_v63 }
 0x488   : > { %v4036_v19 = vpop.f32.mrf.mxu0 }
 0x489   : > { %v4037_v12 = vadd.f32 %v6156_v28, %v4036_v19 }
 0x48b   : > { %v4165_v26 = vmax.f32 %v4037_v12, 0.0  ;;  %v3448_v40 = vpop.f32.mrf.mxu2  ;;  %v464_v12 = vld [vmem:[%s5468_s6 + $0x3e8] sm:$0xff]  ;;  %s5255_s6 = scalar_lea.hbm %s6382_s4, 512 }
 0x48c   : > { %v3449_v10 = vadd.f32 %v3448_v40, %v3280_v3  ;;  %v952_v11 = vunpack.c.0.s8 %v464_v12  ;;  %v961_v3 = vunpack.c.1.s8 %v465_v62  ;;  %v954_v40 = vunpack.c.0.s8 %v466_v14  ;;  %p5257_p12 = scmp.lt.s32.totalorder %s5255_s6, %s5251_s24 }
 0x48d   : > { %v4893_v44 = vpack.c.bf16 %v4165_v26, %v4164_v23  ;;  %v3282_v53 = vpop.f32.mrf.mxu1  ;;  %v960_v23 = vunpack.c.1.s8 %v464_v12  ;;  %v968_v39 = vunpack.c.2.s8 %v464_v12 }
 0x48e   : > { %v3617_v17 = vpop.f32.mrf.mxu3  ;;  %v3283_v49 = vadd.f32 %v3282_v53, %v6503_v9  ;;  %v1473_v15 = vcvt.s32.f32 %v961_v3  ;;  %v1466_v54 = vcvt.s32.f32 %v954_v40  ;;  %p5258_p13 = por %p5257_p12, %p5256_p10 }
 0x48f   : > { %5009 = vst [vmem:[%s6164_s25 + $0x50] sm:$0xff] %v4893_v44   ;;  %v3618_v22 = vadd.f32 %v3617_v17, %v3449_v10  ;;  %v962_v44 = vunpack.c.1.s8 %v466_v14  ;;  %v6244_v10 = vld [vmem:[%s6381_s3] ss:$0 sm:$0xff] }
 0x490   : > { %v4039_v47 = vpop.f32.mrf.mxu0  ;;  %3321 = vmatmul.bf16.gmra.mxu1 %v1720_v31  ;;  %3490 = vmatmul.bf16.gmra.mxu2 %v1721_v33  ;;  %v6504_v31 = vld [vmem:[#allocation46_spill] sm:$0xff]  ;;  %p5259_p0 = pnand %p5258_p13, %p5254_p8 }
 0x491   : > { %v3894_v32 = vpack.c.bf16 %v3618_v22, %v3616_v35  ;;  %v4040_v24 = vadd.f32 %v6156_v28, %v4039_v47  ;;  %v3121_v33 = vadd.f32 %v6504_v31, %v6024_v6  ;;  %v1472_v35 = vcvt.s32.f32 %v960_v23  ;;  %v6505_v22 = vld [vmem:[#allocation29_spill] sm:$0xff] }
 0x493   : > { %3659 = vmatmul.bf16.gmra.mxu3 %v1722_v42  ;;  %4078 = vmatmul.bf16.gmra.mxu0 %v3894_v32  ;;  %v3451_v1 = vpop.f32.mrf.mxu2  ;;  %v4166_v27 = vmax.f32 %v4040_v24, 0.0  ;;  %v1464_v42 = vcvt.s32.f32 %v952_v11 }
 0x494   : > { %v3452_v55 = vadd.f32 %v3451_v1, %v3283_v49  ;;  %v1465_v1 = vcvt.s32.f32 %v953_v37 }
 0x495   : > { %v3284_v38 = vpop.f32.mrf.mxu1  ;;  %v1736_v0 = vpack.c.bf16 %v1472_v35, %v1464_v42 }
 0x496   : > { %v3620_v41 = vpop.f32.mrf.mxu3  ;;  %v3285_v46 = vadd.f32 %v3284_v38, %v3116_v2  ;;  %v1737_v2 = vpack.c.bf16 %v1473_v15, %v1465_v1 }
 0x497   : > { %v3621_v19 = vadd.f32 %v3620_v41, %v3452_v55  ;;  %v1474_v41 = vcvt.s32.f32 %v962_v44  ;;  %v977_v55 = vunpack.c.3.s8 %v465_v62 }
 0x498   : > { %v4041_v45 = vpop.f32.mrf.mxu0 }
 0x499   : > { %v4042_v58 = vadd.f32 %v6156_v28, %v4041_v45  ;;  %v1730_v28 = vpack.c.bf16 %v1458_v18, %v1450_v20  ;;  %v1738_v5 = vpack.c.bf16 %v1474_v41, %v1466_v54  ;;  %v976_v20 = vunpack.c.3.s8 %v464_v12  ;;  %v6509_v41 = vld [vmem:[#allocation39_spill] sm:$0xff] }
 0x49a   : > { %v1489_v12 = vcvt.s32.f32 %v977_v55 }
 0x49b   : > { %v4167_v21 = vmax.f32 %v4042_v58, 0.0  ;;  %v3453_v59 = vpop.f32.mrf.mxu2 }
 0x49c   : > { %v3454_v56 = vadd.f32 %v3453_v59, %v3285_v46  ;;  %v978_v59 = vunpack.c.3.s8 %v466_v14 }
 0x49d   : > { %v4898_v30 = vpack.c.bf16 %v4167_v21, %v4166_v27  ;;  %v3287_v7 = vpop.f32.mrf.mxu1  ;;  %v969_v27 = vunpack.c.2.s8 %v465_v62  ;;  %v970_v21 = vunpack.c.2.s8 %v466_v14 }
 0x49e   : > { %v3622_v8 = vpop.f32.mrf.mxu3  ;;  %v3288_v47 = vadd.f32 %v3287_v7, %v6505_v22  ;;  %v1480_v7 = vcvt.s32.f32 %v968_v39  ;;  %v1490_v62 = vcvt.s32.f32 %v978_v59  ;;  %v6513_v59 = vld [vmem:[#allocation48_spill] sm:$0xff] }
 0x49f   : > { %5010 = vst [vmem:[%s6164_s25 + $0x58] sm:$0xff] %v4898_v30   ;;  %v3623_v43 = vadd.f32 %v3622_v8, %v3454_v56  ;;  %v6506_v56 = vld [vmem:[#allocation35_spill] sm:$0xff]  ;;  %v6507_v8 = vld [vmem:[#allocation33_spill] sm:$0xff] }
 0x4a0   : > { %v4044_v25 = vpop.f32.mrf.mxu0  ;;  %3326 = vmatmul.bf16.gmra.mxu1 %v1728_v29  ;;  %3495 = vmatmul.bf16.gmra.mxu2 %v1729_v50  ;;  %v3126_v29 = vadd.f32 %v6507_v8, %v6506_v56  ;;  %v6514_v56 = vld [vmem:[#allocation13_spill] sm:$0xff] }
 0x4a1   : > { %v3895_v36 = vpack.c.bf16 %v3623_v43, %v3621_v19  ;;  %v4045_v17 = vadd.f32 %v6244_v10, %v4044_v25  ;;  %v6508_v19 = vld [vmem:[#allocation31_spill] sm:$0xff] }
 0x4a3   : > { %3664 = vmatmul.bf16.gmra.mxu3 %v1730_v28  ;;  %4083 = vmatmul.bf16.gmra.mxu0 %v3895_v36  ;;  %v3456_v16 = vpop.f32.mrf.mxu2  ;;  %v4168_v13 = vmax.f32 %v4045_v17, 0.0  ;;  %v1488_v28 = vcvt.s32.f32 %v976_v20  ;;  %v1481_v36 = vcvt.s32.f32 %v969_v27 }
 0x4a4   : > { %v3457_v48 = vadd.f32 %v3456_v16, %v3288_v47  ;;  %v1482_v16 = vcvt.s32.f32 %v970_v21  ;;  %v6512_v21 = vld [vmem:[#allocation14_spill] sm:$0xff] }
 0x4a5   : > { %v3289_v26 = vpop.f32.mrf.mxu1  ;;  %v1744_v44 = vpack.c.bf16 %v1488_v28, %v1480_v7  ;;  %v1745_v17 = vpack.c.bf16 %v1489_v12, %v1481_v36 }
 0x4a6   : > { %v3625_v63 = vpop.f32.mrf.mxu3  ;;  %v3290_v38 = vadd.f32 %v3289_v26, %v3121_v33  ;;  %v1746_v33 = vpack.c.bf16 %v1490_v62, %v1482_v16 }
 0x4a7   : > { %v3626_v57 = vadd.f32 %v3625_v63, %v3457_v48 }
 0x4a8   : > { %v4046_v53 = vpop.f32.mrf.mxu0 }
 0x4a9   : > { %v4047_v32 = vadd.f32 %v6244_v10, %v4046_v53 }
 0x4ab   : > { %v4169_v52 = vmax.f32 %v4047_v32, 0.0  ;;  %v3458_v60 = vpop.f32.mrf.mxu2 }
 0x4ac   : > { %v3459_v61 = vadd.f32 %v3458_v60, %v3290_v38  ;;  %v6511_v38 = vld [vmem:[#allocation37_spill] sm:$0xff] }
 0x4ad   : > { %v4903_v24 = vpack.c.bf16 %v4169_v52, %v4168_v13  ;;  %v3292_v45 = vpop.f32.mrf.mxu1  ;;  %v6510_v13 = vld [vmem:[#allocation47_spill] sm:$0xff] }
 0x4ae   : > { %v3627_v6 = vpop.f32.mrf.mxu3  ;;  %v3293_v43 = vadd.f32 %v3292_v45, %v6508_v19  ;;  %v3131_v48 = vadd.f32 %v6510_v13, %v6509_v41 }
 0x4af   : > { %5011 = vst [vmem:[%s6164_s25 + $0x60] sm:$0xff] %v4903_v24   ;;  %v3628_v9 = vadd.f32 %v3627_v6, %v3459_v61 }
 0x4b0   : > { %v4049_v49 = vpop.f32.mrf.mxu0  ;;  %3331 = vmatmul.bf16.gmra.mxu1 %v1736_v0  ;;  %3500 = vmatmul.bf16.gmra.mxu2 %v1737_v2 }
 0x4b1   : > { %v3896_v58 = vpack.c.bf16 %v3628_v9, %v3626_v57  ;;  %v4050_v30 = vadd.f32 %v6244_v10, %v4049_v49 }
 0x4b3   : > { %3669 = vmatmul.bf16.gmra.mxu3 %v1738_v5  ;;  %4088 = vmatmul.bf16.gmra.mxu0 %v3896_v58  ;;  %v3461_v51 = vpop.f32.mrf.mxu2  ;;  %v4170_v11 = vmax.f32 %v4050_v30, 0.0  ;;  %v3136_v30 = vadd.f32 %v6513_v59, %v6512_v21 }
 0x4b4   : > { %v3462_v23 = vadd.f32 %v3461_v51, %v3293_v43 }
 0x4b5   : > { %v3294_v46 = vpop.f32.mrf.mxu1 }
 0x4b6   : > { %v3630_v18 = vpop.f32.mrf.mxu3  ;;  %v3295_v14 = vadd.f32 %v3294_v46, %v3126_v29 }
 0x4b7   : > { %v3631_v53 = vadd.f32 %v3630_v18, %v3462_v23 }
 0x4b8   : > { %v4051_v50 = vpop.f32.mrf.mxu0 }
 0x4b9   : > { %v4052_v25 = vadd.f32 %v6244_v10, %v4051_v50 }
 0x4bb   : > { %v4171_v63 = vmax.f32 %v4052_v25, 0.0  ;;  %v3463_v37 = vpop.f32.mrf.mxu2 }
 0x4bc   : > { %v3464_v26 = vadd.f32 %v3463_v37, %v3295_v14 }
 0x4bd   : > { %v4908_v3 = vpack.c.bf16 %v4171_v63, %v4170_v11  ;;  %v3297_v31 = vpop.f32.mrf.mxu1 }
 0x4be   : > { %v3632_v40 = vpop.f32.mrf.mxu3  ;;  %v3298_v52 = vadd.f32 %v3297_v31, %v6511_v38 }
 0x4bf   : > { %5012 = vst [vmem:[%s6164_s25 + $0x68] sm:$0xff] %v4908_v3   ;;  %v3633_v42 = vadd.f32 %v3632_v40, %v3464_v26 }
 0x4c0   : > { %v4054_v35 = vpop.f32.mrf.mxu0  ;;  %3336 = vmatmul.bf16.gmra.mxu1 %v1744_v44  ;;  %3505 = vmatmul.bf16.gmra.mxu2 %v1745_v17  ;;  %v6515_v44 = vld [vmem:[#allocation16_spill] sm:$0xff]  ;;  %v6516_v17 = vld [vmem:[#allocation49_spill] sm:$0xff] }
 0x4c1   : > { %v3897_v22 = vpack.c.bf16 %v3633_v42, %v3631_v53  ;;  %v4055_v15 = vadd.f32 %v6244_v10, %v4054_v35  ;;  %v3141_v31 = vadd.f32 %v6516_v17, %v6515_v44 }
 0x4c3   : > { %3674 = vmatmul.bf16.gmra.mxu3 %v1746_v33  ;;  %4093 = vmatmul.bf16.gmra.mxu0 %v3897_v22  ;;  %v3466_v47 = vpop.f32.mrf.mxu2  ;;  %v4172_v24 = vmax.f32 %v4055_v15, 0.0  ;;  %v6517_v33 = vld [vmem:[#allocation15_spill] sm:$0xff] }
 0x4c4   : > { %v3467_v61 = vadd.f32 %v3466_v47, %v3298_v52 }
 0x4c5   : > { %v3299_v1 = vpop.f32.mrf.mxu1 }
 0x4c6   : > { %v3635_v32 = vpop.f32.mrf.mxu3  ;;  %v3300_v6 = vadd.f32 %v3299_v1, %v3131_v48 }
 0x4c7   : > { %v3636_v49 = vadd.f32 %v3635_v32, %v3467_v61 }
 0x4c8   : > { %v4056_v54 = vpop.f32.mrf.mxu0 }
 0x4c9   : > { %v4057_v60 = vadd.f32 %v6244_v10, %v4056_v54 }
 0x4cb   : > { %v4173_v0 = vmax.f32 %v4057_v60, 0.0  ;;  %v3468_v2 = vpop.f32.mrf.mxu2 }
 0x4cc   : > { %v3469_v5 = vadd.f32 %v3468_v2, %v3300_v6 }
 0x4cd   : > { %v4913_v45 = vpack.c.bf16 %v4173_v0, %v4172_v24  ;;  %v3302_v9 = vpop.f32.mrf.mxu1 }
 0x4ce   : > { %v3637_v57 = vpop.f32.mrf.mxu3  ;;  %v3303_v8 = vadd.f32 %v3302_v9, %v6514_v56  ;;  %v6520_v9 = vld [vmem:[#allocation18_spill] sm:$0xff] }
 0x4cf   : > { %5013 = vst [vmem:[%s6164_s25 + $0x70] sm:$0xff] %v4913_v45   ;;  %v3638_v58 = vadd.f32 %v3637_v57, %v3469_v5  ;;  %v6518_v45 = vld [vmem:[#allocation20_spill] sm:$0xff]  ;;  %v6519_v5 = vld [vmem:[#allocation50_spill] sm:$0xff] }
 0x4d0   : > { %v4059_v51 = vpop.f32.mrf.mxu0  ;;  %v3146_v57 = vadd.f32 %v6519_v5, %v6518_v45 }
 0x4d1   : > { %v3898_v39 = vpack.c.bf16 %v3638_v58, %v3636_v49  ;;  %v4060_v55 = vadd.f32 %v6244_v10, %v4059_v51 }
 0x4d3   : > { %4098 = vmatmul.bf16.gmra.mxu0 %v3898_v39  ;;  %v3471_v20 = vpop.f32.mrf.mxu2  ;;  %v4174_v50 = vmax.f32 %v4060_v55, 0.0 }
 0x4d4   : > { %v3472_v7 = vadd.f32 %v3471_v20, %v3303_v8 }
 0x4d5   : > { %v3304_v27 = vpop.f32.mrf.mxu1 }
 0x4d6   : > { %v3640_v18 = vpop.f32.mrf.mxu3  ;;  %v3305_v28 = vadd.f32 %v3304_v27, %v3136_v30 }
 0x4d7   : > { %v3641_v62 = vadd.f32 %v3640_v18, %v3472_v7 }
 0x4d8   : > { %v4061_v46 = vpop.f32.mrf.mxu0 }
 0x4d9   : > { %v4062_v29 = vadd.f32 %v6244_v10, %v4061_v46 }
 0x4db   : > { %v4175_v19 = vmax.f32 %v4062_v29, 0.0  ;;  %v3473_v43 = vpop.f32.mrf.mxu2 }
 0x4dc   : > { %v3474_v36 = vadd.f32 %v3473_v43, %v3305_v28 }
 0x4dd   : > { %v4918_v25 = vpack.c.bf16 %v4175_v19, %v4174_v50  ;;  %v3307_v16 = vpop.f32.mrf.mxu1 }
 0x4de   : > { %v3642_v12 = vpop.f32.mrf.mxu3  ;;  %v3308_v53 = vadd.f32 %v3307_v16, %v6517_v33  ;;  %v6523_v16 = vld [vmem:[#allocation22_spill] sm:$0xff] }
 0x4df   : > { %5014 = vst [vmem:[%s6164_s25 + $0x78] sm:$0xff] %v4918_v25   ;;  %v3643_v11 = vadd.f32 %v3642_v12, %v3474_v36  ;;  %v6521_v25 = vld [vmem:[#allocation24_spill] sm:$0xff]  ;;  %v6522_v36 = vld [vmem:[#allocation51_spill] sm:$0xff] }
 0x4e0   : > { %v4064_v23 = vpop.f32.mrf.mxu0  ;;  %v3151_v12 = vadd.f32 %v6522_v36, %v6521_v25 }
 0x4e1   : > { %v3899_v14 = vpack.c.bf16 %v3643_v11, %v3641_v62  ;;  %v4065_v26 = vadd.f32 %v6244_v10, %v4064_v23 }
 0x4e3   : > { %4103 = vmatmul.bf16.gmra.mxu0 %v3899_v14  ;;  %v3476_v63 = vpop.f32.mrf.mxu2  ;;  %v4176_v35 = vmax.f32 %v4065_v26, 0.0 }
 0x4e4   : > { %v3477_v22 = vadd.f32 %v3476_v63, %v3308_v53 }
 0x4e5   : > { %v3309_v3 = vpop.f32.mrf.mxu1 }
 0x4e6   : > { %v3645_v37 = vpop.f32.mrf.mxu3  ;;  %v3310_v47 = vadd.f32 %v3309_v3, %v3141_v31 }
 0x4e7   : > { %v3646_v48 = vadd.f32 %v3645_v37, %v3477_v22 }
 0x4e8   : > { %v4066_v40 = vpop.f32.mrf.mxu0 }
 0x4e9   : > { %v4067_v42 = vadd.f32 %v6244_v10, %v4066_v40 }
 0x4eb   : > { %v4177_v32 = vmax.f32 %v4067_v42, 0.0  ;;  %v3478_v1 = vpop.f32.mrf.mxu2 }
 0x4ec   : > { %v3479_v54 = vadd.f32 %v3478_v1, %v3310_v47 }
 0x4ed   : > { %v4923_v15 = vpack.c.bf16 %v4177_v32, %v4176_v35  ;;  %v3312_v13 = vpop.f32.mrf.mxu1 }
 0x4ee   : > { %v3647_v41 = vpop.f32.mrf.mxu3  ;;  %v3313_v49 = vadd.f32 %v3312_v13, %v6520_v9  ;;  %v6526_v13 = vld [vmem:[#allocation26_spill] sm:$0xff] }
 0x4ef   : > { %5015 = vst [vmem:[%s6164_s25 + $0x80] sm:$0xff] %v4923_v15   ;;  %v3648_v38 = vadd.f32 %v3647_v41, %v3479_v54  ;;  %v6524_v15 = vld [vmem:[#allocation28_spill] sm:$0xff] }
 0x4f0   : > { %v4069_v52 = vpop.f32.mrf.mxu0  ;;  %v6525_v54 = vld [vmem:[#allocation52_spill] sm:$0xff] }
 0x4f1   : > { %v3900_v60 = vpack.c.bf16 %v3648_v38, %v3646_v48  ;;  %v4070_v0 = vadd.f32 %v6244_v10, %v4069_v52  ;;  %v3156_v41 = vadd.f32 %v6525_v54, %v6524_v15 }
 0x4f3   : > { %4108 = vmatmul.bf16.gmra.mxu0 %v3900_v60  ;;  %v3481_v24 = vpop.f32.mrf.mxu2  ;;  %v4178_v51 = vmax.f32 %v4070_v0, 0.0 }
 0x4f4   : > { %v3482_v39 = vadd.f32 %v3481_v24, %v3313_v49 }
 0x4f5   : > { %v3314_v6 = vpop.f32.mrf.mxu1 }
 0x4f6   : > { %v3650_v61 = vpop.f32.mrf.mxu3  ;;  %v3315_v20 = vadd.f32 %v3314_v6, %v3146_v57 }
 0x4f7   : > { %v3651_v30 = vadd.f32 %v3650_v61, %v3482_v39 }
 0x4f8   : > { %v4071_v2 = vpop.f32.mrf.mxu0 }
 0x4f9   : > { %v4072_v58 = vadd.f32 %v6244_v10, %v4071_v2 }
 0x4fb   : > { %v4179_v18 = vmax.f32 %v4072_v58, 0.0  ;;  %v3483_v27 = vpop.f32.mrf.mxu2 }
 0x4fc   : > { %v3484_v46 = vadd.f32 %v3483_v27, %v3315_v20 }
 0x4fd   : > { %v4928_v55 = vpack.c.bf16 %v4179_v18, %v4178_v51  ;;  %v3317_v59 = vpop.f32.mrf.mxu1 }
 0x4fe   : > { %v3652_v21 = vpop.f32.mrf.mxu3  ;;  %v3318_v62 = vadd.f32 %v3317_v59, %v6523_v16 }
 0x4ff   : > { %5016 = vst [vmem:[%s6164_s25 + $0x88] sm:$0xff] %v4928_v55   ;;  %v3653_v56 = vadd.f32 %v3652_v21, %v3484_v46  ;;  %v6527_v55 = vld [vmem:[#allocation53_spill] sm:$0xff]  ;;  %v6528_v21 = vld [vmem:[#allocation30_spill] sm:$0xff] }
 0x500   : > { %v4074_v8 = vpop.f32.mrf.mxu0  ;;  %v3161_v46 = vadd.f32 %v6527_v55, %v6100_v34 }
 0x501   : > { %v3901_v29 = vpack.c.bf16 %v3653_v56, %v3651_v30  ;;  %v4075_v19 = vadd.f32 %v6244_v10, %v4074_v8 }
 0x503   : > { %4113 = vmatmul.bf16.gmra.mxu0 %v3901_v29  ;;  %v3486_v50 = vpop.f32.mrf.mxu2  ;;  %v4180_v23 = vmax.f32 %v4075_v19, 0.0 }
 0x504   : > { %v3487_v14 = vadd.f32 %v3486_v50, %v3318_v62 }
 0x505   : > { %v3319_v28 = vpop.f32.mrf.mxu1 }
 0x506   : > { %v3655_v7 = vpop.f32.mrf.mxu3  ;;  %v3320_v63 = vadd.f32 %v3319_v28, %v3151_v12 }
 0x507   : > { %v3656_v31 = vadd.f32 %v3655_v7, %v3487_v14 }
 0x508   : > { %v4076_v43 = vpop.f32.mrf.mxu0 }
 0x509   : > { %v4077_v11 = vadd.f32 %v6244_v10, %v4076_v43 }
 0x50b   : > { %v4181_v37 = vmax.f32 %v4077_v11, 0.0  ;;  %v3488_v3 = vpop.f32.mrf.mxu2 }
 0x50c   : > { %v3489_v40 = vadd.f32 %v3488_v3, %v3320_v63  ;;  %v6530_v3 = vld [vmem:[#allocation34_spill] sm:$0xff] }
 0x50d   : > { %v4933_v26 = vpack.c.bf16 %v4181_v37, %v4180_v23  ;;  %v3322_v17 = vpop.f32.mrf.mxu1  ;;  %v6529_v37 = vld [vmem:[#allocation36_spill] sm:$0xff] }
 0x50e   : > { %v3657_v44 = vpop.f32.mrf.mxu3  ;;  %v3323_v48 = vadd.f32 %v3322_v17, %v6526_v13 }
 0x50f   : > { %5017 = vst [vmem:[%s6164_s25 + $0x90] sm:$0xff] %v4933_v26   ;;  %v3658_v33 = vadd.f32 %v3657_v44, %v3489_v40  ;;  %v3166_v26 = vadd.f32 %v6530_v3, %v6529_v37  ;;  %v6531_v40 = vld [vmem:[#allocation32_spill] sm:$0xff] }
 0x510   : > { %v4079_v53 = vpop.f32.mrf.mxu0 }
 0x511   : > { %v3902_v42 = vpack.c.bf16 %v3658_v33, %v3656_v31  ;;  %v4080_v32 = vadd.f32 %v6244_v10, %v4079_v53 }
 0x513   : > { %4118 = vmatmul.bf16.gmra.mxu0 %v3902_v42  ;;  %v3491_v35 = vpop.f32.mrf.mxu2  ;;  %v4182_v52 = vmax.f32 %v4080_v32, 0.0 }
 0x514   : > { %v3492_v60 = vadd.f32 %v3491_v35, %v3323_v48 }
 0x515   : > { %v3324_v47 = vpop.f32.mrf.mxu1 }
 0x516   : > { %v3660_v22 = vpop.f32.mrf.mxu3  ;;  %v3325_v24 = vadd.f32 %v3324_v47, %v3156_v41 }
 0x517   : > { %v3661_v57 = vadd.f32 %v3660_v22, %v3492_v60 }
 0x518   : > { %v4081_v1 = vpop.f32.mrf.mxu0 }
 0x519   : > { %v4082_v38 = vadd.f32 %v6244_v10, %v4081_v1 }
 0x51b   : > { %v4183_v61 = vmax.f32 %v4082_v38, 0.0  ;;  %v3493_v6 = vpop.f32.mrf.mxu2 }
 0x51c   : > { %v3494_v2 = vadd.f32 %v3493_v6, %v3325_v24 }
 0x51d   : > { %v4938_v0 = vpack.c.bf16 %v4183_v61, %v4182_v52  ;;  %v3327_v5 = vpop.f32.mrf.mxu1  ;;  %v6532_v61 = vld [vmem:[#allocation54_spill] sm:$0xff] }
 0x51e   : > { %v3662_v45 = vpop.f32.mrf.mxu3  ;;  %v3328_v59 = vadd.f32 %v3327_v5, %v6528_v21  ;;  %v3171_v6 = vadd.f32 %v6147_v4, %v6532_v61 }
 0x51f   : > { %5018 = vst [vmem:[%s6164_s25 + $0x98] sm:$0xff] %v4938_v0   ;;  %v3663_v9 = vadd.f32 %v3662_v45, %v3494_v2  ;;  %v6533_v0 = vld [vmem:[#allocation38_spill] sm:$0xff] }
 0x520   : > { %v4084_v49 = vpop.f32.mrf.mxu0 }
 0x521   : > { %v3903_v58 = vpack.c.bf16 %v3663_v9, %v3661_v57  ;;  %v4085_v18 = vadd.f32 %v6244_v10, %v4084_v49 }
 0x523   : > { %4123 = vmatmul.bf16.gmra.mxu0 %v3903_v58  ;;  %v3496_v51 = vpop.f32.mrf.mxu2  ;;  %v4184_v56 = vmax.f32 %v4085_v18, 0.0 }
 0x524   : > { %v3497_v8 = vadd.f32 %v3496_v51, %v3328_v59 }
 0x525   : > { %v3329_v20 = vpop.f32.mrf.mxu1 }
 0x526   : > { %v3665_v39 = vpop.f32.mrf.mxu3  ;;  %v3330_v29 = vadd.f32 %v3329_v20, %v3161_v46 }
 0x527   : > { %v3666_v36 = vadd.f32 %v3665_v39, %v3497_v8 }
 0x528   : > { %v4086_v27 = vpop.f32.mrf.mxu0 }
 0x529   : > { %v4087_v30 = vadd.f32 %v6244_v10, %v4086_v27 }
 0x52b   : > { %v4185_v50 = vmax.f32 %v4087_v30, 0.0  ;;  %v3498_v7 = vpop.f32.mrf.mxu2 }
 0x52c   : > { %v3499_v19 = vadd.f32 %v3498_v7, %v3330_v29 }
 0x52d   : > { %v4943_v28 = vpack.c.bf16 %v4185_v50, %v4184_v56  ;;  %v3332_v25 = vpop.f32.mrf.mxu1 }
 0x52e   : > { %v3667_v43 = vpop.f32.mrf.mxu3  ;;  %v3333_v44 = vadd.f32 %v3332_v25, %v6531_v40 }
 0x52f   : > { %5019 = vst [vmem:[%s6164_s25 + $0xa0] sm:$0xff] %v4943_v28   ;;  %v3668_v12 = vadd.f32 %v3667_v43, %v3499_v19 }
 0x530   : > { %v4089_v16 = vpop.f32.mrf.mxu0 }
 0x531   : > { %v3904_v62 = vpack.c.bf16 %v3668_v12, %v3666_v36  ;;  %v4090_v14 = vadd.f32 %v6244_v10, %v4089_v16 }
 0x533   : > { %4128 = vmatmul.bf16.gmra.mxu0 %v3904_v62  ;;  %v3501_v34 = vpop.f32.mrf.mxu2  ;;  %v4186_v31 = vmax.f32 %v4090_v14, 0.0 }
 0x534   : > { %v3502_v33 = vadd.f32 %v3501_v34, %v3333_v44 }
 0x535   : > { %v3334_v23 = vpop.f32.mrf.mxu1 }
 0x536   : > { %v3670_v11 = vpop.f32.mrf.mxu3  ;;  %v3335_v53 = vadd.f32 %v3334_v23, %v3166_v26 }
 0x537   : > { %v3671_v15 = vadd.f32 %v3670_v11, %v3502_v33 }
 0x538   : > { %v4091_v63 = vpop.f32.mrf.mxu0 }
 0x539   : > { %v4092_v17 = vadd.f32 %v6244_v10, %v4091_v63 }
 0x53b   : > { %v4187_v42 = vmax.f32 %v4092_v17, 0.0  ;;  %v3503_v35 = vpop.f32.mrf.mxu2 }
 0x53c   : > { %v3504_v47 = vadd.f32 %v3503_v35, %v3335_v53 }
 0x53d   : > { %v4948_v22 = vpack.c.bf16 %v4187_v42, %v4186_v31  ;;  %v3337_v1 = vpop.f32.mrf.mxu1 }
 0x53e   : > { %v3672_v32 = vpop.f32.mrf.mxu3  ;;  %v3338_v2 = vadd.f32 %v3337_v1, %v6533_v0 }
 0x53f   : > { %5020 = vst [vmem:[%s6164_s25 + $0xa8] sm:$0xff] %v4948_v22   ;;  %v3673_v54 = vadd.f32 %v3672_v32, %v3504_v47 }
 0x540   : > { %v4094_v41 = vpop.f32.mrf.mxu0 }
 0x541   : > { %v3905_v13 = vpack.c.bf16 %v3673_v54, %v3671_v15  ;;  %v4095_v52 = vadd.f32 %v6244_v10, %v4094_v41 }
 0x543   : > { %4133 = vmatmul.bf16.gmra.mxu0 %v3905_v13  ;;  %v3506_v48 = vpop.f32.mrf.mxu2  ;;  %v4188_v5 = vmax.f32 %v4095_v52, 0.0 }
 0x544   : > { %v3507_v57 = vadd.f32 %v3506_v48, %v3338_v2 }
 0x545   : > { %v3339_v60 = vpop.f32.mrf.mxu1 }
 0x546   : > { %v3675_v38 = vpop.f32.mrf.mxu3  ;;  %v3340_v9 = vadd.f32 %v3339_v60, %v3171_v6 }
 0x547   : > { %v3676_v18 = vadd.f32 %v3675_v38, %v3507_v57 }
 0x548   : > { %v4096_v24 = vpop.f32.mrf.mxu0 }
 0x549   : > { %v4097_v45 = vadd.f32 %v6244_v10, %v4096_v24 }
 0x54b   : > { %v4189_v49 = vmax.f32 %v4097_v45, 0.0  ;;  %v3508_v58 = vpop.f32.mrf.mxu2 }
 0x54c   : > { %v3509_v39 = vadd.f32 %v3508_v58, %v3340_v9 }
 0x54d   : > { %v4953_v51 = vpack.c.bf16 %v4189_v49, %v4188_v5 }
 0x54e   : > { %v3677_v20 = vpop.f32.mrf.mxu3 }
 0x54f   : > { %5021 = vst [vmem:[%s6164_s25 + $0xb0] sm:$0xff] %v4953_v51   ;;  %v3678_v27 = vadd.f32 %v3677_v20, %v3509_v39 }
 0x550   : > { %v4099_v55 = vpop.f32.mrf.mxu0 }
 0x551   : > { %v3906_v46 = vpack.c.bf16 %v3678_v27, %v3676_v18  ;;  %v4100_v4 = vadd.f32 %v6244_v10, %v4099_v55 }
 0x553   : > { %4138 = vmatmul.bf16.gmra.mxu0 %v3906_v46  ;;  %v4190_v30 = vmax.f32 %v4100_v4, 0.0 }
 0x558   : > { %v4101_v21 = vpop.f32.mrf.mxu0 }
 0x559   : > { %v4102_v59 = vadd.f32 %v6244_v10, %v4101_v21 }
 0x55b   : > { %v4191_v56 = vmax.f32 %v4102_v59, 0.0 }
 0x55d   : > { %v4958_v8 = vpack.c.bf16 %v4191_v56, %v4190_v30 }
 0x55f   : > { %5022 = vst [vmem:[%s6164_s25 + $0xb8] sm:$0xff] %v4958_v8  }
 0x560   : > { %v4104_v29 = vpop.f32.mrf.mxu0 }
 0x561   : > { %v4105_v50 = vadd.f32 %v6244_v10, %v4104_v29 }
 0x563   : > { %v4192_v19 = vmax.f32 %v4105_v50, 0.0 }
 0x568   : > { %v4106_v7 = vpop.f32.mrf.mxu0 }
 0x569   : > { %v4107_v28 = vadd.f32 %v6244_v10, %v4106_v7 }
 0x56b   : > { %v4193_v43 = vmax.f32 %v4107_v28, 0.0 }
 0x56d   : > { %v4963_v25 = vpack.c.bf16 %v4193_v43, %v4192_v19 }
 0x56f   : > { %5023 = vst [vmem:[%s6164_s25 + $0xc0] sm:$0xff] %v4963_v25  }
 0x570   : > { %v4109_v36 = vpop.f32.mrf.mxu0 }
 0x571   : > { %v4110_v12 = vadd.f32 %v6244_v10, %v4109_v36 }
 0x573   : > { %v4194_v34 = vmax.f32 %v4110_v12, 0.0 }
 0x578   : > { %v4111_v16 = vpop.f32.mrf.mxu0 }
 0x579   : > { %v4112_v62 = vadd.f32 %v6244_v10, %v4111_v16 }
 0x57b   : > { %v4195_v11 = vmax.f32 %v4112_v62, 0.0 }
 0x57d   : > { %v4968_v23 = vpack.c.bf16 %v4195_v11, %v4194_v34 }
 0x57f   : > { %5024 = vst [vmem:[%s6164_s25 + $0xc8] sm:$0xff] %v4968_v23  }
 0x580   : > { %v4114_v14 = vpop.f32.mrf.mxu0 }
 0x581   : > { %v4115_v63 = vadd.f32 %v6244_v10, %v4114_v14 }
 0x583   : > { %v4196_v26 = vmax.f32 %v4115_v63, 0.0 }
 0x588   : > { %v4116_v37 = vpop.f32.mrf.mxu0 }
 0x589   : > { %v4117_v3 = vadd.f32 %v6244_v10, %v4116_v37 }
 0x58b   : > { %v4197_v40 = vmax.f32 %v4117_v3, 0.0 }
 0x58d   : > { %v4973_v44 = vpack.c.bf16 %v4197_v40, %v4196_v26 }
 0x58f   : > { %5025 = vst [vmem:[%s6164_s25 + $0xd0] sm:$0xff] %v4973_v44  }
 0x590   : > { %v4119_v17 = vpop.f32.mrf.mxu0 }
 0x591   : > { %v4120_v31 = vadd.f32 %v6244_v10, %v4119_v17 }
 0x593   : > { %v4198_v42 = vmax.f32 %v4120_v31, 0.0 }
 0x598   : > { %v4121_v33 = vpop.f32.mrf.mxu0 }
 0x599   : > { %v4122_v53 = vadd.f32 %v6244_v10, %v4121_v33 }
 0x59b   : > { %v4199_v35 = vmax.f32 %v4122_v53, 0.0 }
 0x59d   : > { %v4978_v22 = vpack.c.bf16 %v4199_v35, %v4198_v42 }
 0x59f   : > { %5026 = vst [vmem:[%s6164_s25 + $0xd8] sm:$0xff] %v4978_v22  }
 0x5a0   : > { %v4124_v47 = vpop.f32.mrf.mxu0 }
 0x5a1   : > { %v4125_v32 = vadd.f32 %v6244_v10, %v4124_v47 }
 0x5a3   : > { %v4200_v54 = vmax.f32 %v4125_v32, 0.0 }
 0x5a8   : > { %v4126_v1 = vpop.f32.mrf.mxu0 }
 0x5a9   : > { %v4127_v15 = vadd.f32 %v6244_v10, %v4126_v1 }
 0x5ab   : > { %v4201_v41 = vmax.f32 %v4127_v15, 0.0 }
 0x5ad   : > { %v4983_v13 = vpack.c.bf16 %v4201_v41, %v4200_v54 }
 0x5af   : > { %5027 = vst [vmem:[%s6164_s25 + $0xe0] sm:$0xff] %v4983_v13  }
 0x5b0   : > { %v4129_v48 = vpop.f32.mrf.mxu0 }
 0x5b1   : > { %v4130_v38 = vadd.f32 %v6244_v10, %v4129_v48 }
 0x5b3   : > { %v4202_v24 = vmax.f32 %v4130_v38, 0.0 }
 0x5b8   : > { %v4131_v52 = vpop.f32.mrf.mxu0 }
 0x5b9   : > { %v4132_v60 = vadd.f32 %v6244_v10, %v4131_v52 }
 0x5bb   : > { %v4203_v61 = vmax.f32 %v4132_v60, 0.0 }
 0x5bd   : > { %v4988_v6 = vpack.c.bf16 %v4203_v61, %v4202_v24 }
 0x5bf   : > { %5028 = vst [vmem:[%s6164_s25 + $0xe8] sm:$0xff] %v4988_v6  }
 0x5c0   : > { %v4134_v0 = vpop.f32.mrf.mxu0 }
 0x5c1   : > { %v4135_v2 = vadd.f32 %v6244_v10, %v4134_v0 }
 0x5c3   : > { %v4204_v57 = vmax.f32 %v4135_v2, 0.0 }
 0x5c8   : > { %v4136_v45 = vpop.f32.mrf.mxu0 }
 0x5c9   : > { %v4137_v5 = vadd.f32 %v6244_v10, %v4136_v45 }
 0x5cb   : > { %v4205_v9 = vmax.f32 %v4137_v5, 0.0 }
 0x5cd   : > { %v4993_v49 = vpack.c.bf16 %v4205_v9, %v4204_v57 }
 0x5cf   : > { %5029 = vst [vmem:[%s6164_s25 + $0xf0] sm:$0xff] %v4993_v49  }
 0x5d0   : > { %v4139_v58 = vpop.f32.mrf.mxu0 }
 0x5d1   : > { %v4140_v51 = vadd.f32 %v6244_v10, %v4139_v58 }
 0x5d3   : > { %v4206_v18 = vmax.f32 %v4140_v51, 0.0 }
 0x5d8   : > { %v4141_v39 = vpop.f32.mrf.mxu0 }
 0x5d9   : > { %v4142_v20 = vadd.f32 %v6244_v10, %v4141_v39 }
 0x5db   : > { %v4207_v27 = vmax.f32 %v4142_v20, 0.0 }
 0x5dd   : > { %v4998_v55 = vpack.c.bf16 %v4207_v27, %v4206_v18 }
 0x5df   : > { %5030 = vst [vmem:[%s6164_s25 + $0xf8] sm:$0xff] %v4998_v55  }
 0x5e0   : > { %5262 = shalt.err (!%p5259_p0)
}
 0x5e1   : > { %s5328_s21 = smov 64   ;;  %s5329_s23 = smov 4  }
 0x5e2   : > { %5065 = dma.vmem_to_hbm [thread:$0]  (%p5442_p7), %s4350_s11, 4096, %s4352_s12, %s4337_s13, %s5328_s21, %s5328_s21, %s5329_s23  }
 0x5e3 PF: > { %s4366_s25 = sand.u32 1, %s5301_s15   ;;  %p5079_p3 = pnand %p4462_p11, %p5404_p6 }
 0x5e4   : > { %s4367_s30 = scalar_lea.sflag [#allocation5], %s4366_s25 }
 0x5e5   : > { %p5080_p5 = pneg %p5079_p3 }
 0x5e7   : > { %5296 = dma.done.wait (%p5080_p5), %s4367_s30, 4096  }
 0x5e8   : > { %5298 = vsyncadd (%p5080_p5), %s4367_s30, 4294963200  ;;  %s21_s20 = sadd.s32 1, %s5321_s20   ;;  %s6534_s15 = smov %s5305_s16 }
 0x5e9   : > { %p18_p9 = scmp.ge.s32.totalorder %s21_s20, 4   ;;  %s6535_s16 = smov %s5309_s17 }
 0x5ea   : > { %s6536_s17 = smov %s5451_s7  ;;  %s6537_s18 = smov %s5317_s19 }
 0x5eb   : > { %s6538_s19 = smov %s6540_s14  ;;  %20 = sbr.rel (!%p18_p9) target bundleno = 10 (0xa), region = 98 }
 0x5f0   :  { %4373 = vsyncpa [#allocation4], 1 }
 0x5f1   :  { %4375 = vsyncpa [#allocation4 + $0x1], 1 }
 0x5f2   :  { %4376 = vsyncpa [#allocation7], 1 }
 0x5f3   :  { %4377 = vsyncpa [#allocation5], 1 }
 0x5f4   :  { %4379 = vsyncpa [#allocation5 + $0x1], 1 }

</bundles_post_ra>
